<compile_context>
chip_gen: v5e
topology: v5e:2x2
jax: 0.10.0
libtpu: 0.0.40
codegen_flags: <defaults>
</compile_context>

<pallas_src>
import jax
import jax.numpy as jnp
from jax import lax
from jax.experimental import pallas as pl
from jax.experimental.pallas import tpu as pltpu

EPS = 1e-5  # nn.BatchNorm2d default eps


# ------------------------------------------------------------------ kernel helpers

def _conv3x3(tile, w_ref):
    """3x3 'valid' conv of a halo tile.

    tile : (TH+2, W+2, C) bf16 activation tile (body rows + 2 halo rows).
    w_ref: (9*C, C) bf16 weight ref, rows ordered (kh, kw, cin).
    Returns (TH*W, C) f32 (bf16 MXU inputs, f32 accumulation).
    """
    th2, wp, c = tile.shape
    th, w = th2 - 2, wp - 2
    if c % 128 == 0:
        # Lane-aligned channels: one K=9C matmul (fills the 256-deep MXU and keeps the
        # tap accumulation inside the MXU instead of 8 VPU adds).
        cols = [tile[dy:dy + th, dx:dx + w, :] for dy in range(3) for dx in range(3)]
        lhs = jnp.concatenate(cols, axis=-1).reshape(th * w, 9 * c)
        return jnp.dot(lhs, w_ref[...], preferred_element_type=jnp.float32)
    # Small / lane-unaligned C: per-tap (TH*W, C) x (C, C) matmuls with f32 accumulation
    # (a lane-unaligned 9C concat would relayout more than it saves at this size).
    acc = jnp.zeros((th * w, c), jnp.float32)
    for dy in range(3):
        for dx in range(3):
            tap = dy * 3 + dx
            lhs = tile[dy:dy + th, dx:dx + w, :].reshape(th * w, c)
            acc = acc + jnp.dot(lhs, w_ref[tap * c:(tap + 1) * c, :],
                                preferred_element_type=jnp.float32)
    return acc


def _partial_stats(acc):
    """(2, C) per-channel (sum, sum_sq) partials from the f32 conv accumulator."""
    return jnp.concatenate([jnp.sum(acc, axis=0, keepdims=True),
                            jnp.sum(acc * acc, axis=0, keepdims=True)], axis=0)


# ------------------------------------------------------------------ kernels

def conv_stats_kernel(body_ref, halo_ref, w_ref, c_ref, s_ref):
    """conv1: body+halo rows -> raw conv tile (bf16) + resident BN partial stats."""
    tile = jnp.concatenate([body_ref[...], halo_ref[...]], axis=0)   # (TH+2, W+2, C) bf16
    acc = _conv3x3(tile, w_ref)                                      # (TH*W, C) f32
    c_ref[...] = acc.astype(c_ref.dtype)

    @pl.when(pl.program_id(1) == 0)
    def _():
        s_ref[...] = jnp.zeros_like(s_ref)
    s_ref[...] += _partial_stats(acc)


def bn_relu_conv_stats_kernel(body_ref, halo_ref, w_ref, a_ref, b_ref, c_ref, s_ref):
    """conv2: fused BN1+ReLU on the raw conv1 tile, then conv + resident BN partials."""
    c = body_ref.shape[-1]
    tile = jnp.concatenate([body_ref[...], halo_ref[...]], axis=0).astype(jnp.float32)
    a = a_ref[...].reshape(1, 1, c)
    b = b_ref[...].reshape(1, 1, c)
    tile = jnp.maximum(tile * a + b, 0.0).astype(jnp.bfloat16)       # BN1 (folded) + ReLU
    acc = _conv3x3(tile, w_ref)
    c_ref[...] = acc.astype(c_ref.dtype)

    @pl.when(pl.program_id(1) == 0)
    def _():
        s_ref[...] = jnp.zeros_like(s_ref)
    s_ref[...] += _partial_stats(acc)


def bn_relu_residual_kernel(c_ref, x_ref, a_ref, b_ref, o_ref):
    """out = x + relu(conv2_raw * a2 + b2)   (BN2 folded into a2/b2); lane dim = W*C."""
    h = jnp.maximum(c_ref[...].astype(jnp.float32) * a_ref[...] + b_ref[...], 0.0)
    o_ref[...] = x_ref[...] + h


# ------------------------------------------------------------------ wrapper glue

def _params(dims):
    return pltpu.CompilerParams(dimension_semantics=dims,
                                vmem_limit_bytes=32 * 1024 * 1024)


def _resident(shape):
    """BlockSpec for a small array kept fully resident across the whole grid."""
    return pl.BlockSpec(shape, lambda i, j: (0,) * len(shape))


def _pick_tile_h(h, w, c, itemsize=2, budget_bytes=4 << 20):
    """Largest row tile TH that divides H, is even (2-row halo block), is 16-row
    aligned or full-H (bf16 sublane packing of the stored blocks), and whose
    (TH, W+2, C) body tile fits the per-buffer VMEM budget.

    The 4 MiB default is v7x-safe (64 MiB physical VMEM, double-buffered body +
    outputs); on v5e/v6e (128 MiB VMEM) it can be raised to 6-8 MiB.
    """
    valid = [t for t in range(2, h + 1, 2)
             if h % t == 0 and (t % 16 == 0 or t == h)]
    if not valid:
        raise ValueError(f"no valid row tile for H={h} (H must be even)")
    fitting = [t for t in valid if t * (w + 2) * c * itemsize <= budget_bytes]
    return max(fitting) if fitting else min(valid)


def _fold_bn(stats, gamma, beta, count):
    """Fold per-image (sum, sum_sq) stats into a per-channel scale/shift (train BN)."""
    # TODO(synk): E[x^2]-E[x]^2 in f32 can cancel for very large batches / large-mean
    #             activations; switch to mean-shifted partials (Chan combine) if needed.
    s = jnp.sum(stats, axis=0)                               # (2, C)
    mean = s[0] / count
    var = jnp.maximum(s[1] / count - mean * mean, 0.0)       # biased var (PyTorch fwd)
    a = gamma * lax.rsqrt(var + EPS)
    return a.reshape(1, -1), (beta - mean * a).reshape(1, -1)


def _conv_pass(kernel, xp, w_mat, extras, n, t, th, h, w, c):
    """Shared pallas_call builder for the two conv(+BN-partials) passes.

    xp is the reflect-padded activation (N, H+2, W+2, C) in bf16.  It is passed twice
    so each grid step streams a TH-row body block plus the 2-row halo below it; the
    overlapping window is assembled in VMEM, never materialized in HBM.
    """
    wp = w + 2
    body_spec = pl.BlockSpec((None, th, wp, c), lambda i, j: (i, j, 0, 0))
    halo_spec = pl.BlockSpec((None, 2, wp, c),
                             lambda i, j: (i, (j + 1) * (th // 2), 0, 0))
    in_specs = ([body_spec, halo_spec, _resident((9 * c, c))] +
                [_resident(tuple(e.shape)) for e in extras])
    out_specs = (pl.BlockSpec((None, th * w, c), lambda i, j: (i, j, 0)),
                 pl.BlockSpec((None, 2, c), lambda i, j: (i, 0, 0)))   # resident over t
    out_shape = (jax.ShapeDtypeStruct((n, h * w, c), jnp.bfloat16),    # raw conv output
                 jax.ShapeDtypeStruct((n, 2, c), jnp.float32))         # per-image stats
    cost = pl.CostEstimate(
        flops=2 * n * h * w * 9 * c * c,
        transcendentals=0,
        bytes_accessed=int(xp.size) * xp.dtype.itemsize
        + n * h * w * c * 2 + n * 2 * c * 4 + 9 * c * c * 2,
    )
    return pl.pallas_call(
        kernel,
        grid=(n, t),
        in_specs=in_specs,
        out_specs=out_specs,
        out_shape=out_shape,
        compiler_params=_params(("parallel", "arbitrary")),
        cost_estimate=cost,
    )(xp, xp, w_mat, *extras)


def resblock_forward(x_nchw, params):
    n, c, h, w = x_nchw.shape
    assert h >= 2 and w >= 2, "reflect padding needs H, W >= 2"
    assert h % 2 == 0, "even H required by the 2-row halo block"
    # TODO(synk): odd H would need a 1-row halo split (or a manual halo DMA).

    x = jnp.transpose(x_nchw, (0, 2, 3, 1)).astype(jnp.float32)      # NCHW -> NHWC
    count = n * h * w
    pad = ((0, 0), (1, 1), (1, 1), (0, 0))

    th = _pick_tile_h(h, w, c)
    t = h // th

    def to_mat(wt):   # PyTorch (Cout, Cin, 3, 3) -> (9*Cin, Cout), rows ordered (kh, kw, cin)
        return jnp.transpose(wt, (2, 3, 1, 0)).reshape(9 * c, c).astype(jnp.bfloat16)

    w1 = to_mat(params["w1"])
    w2 = to_mat(params["w2"])

    # ConvBlock 1: cast to bf16, reflect-pad ONCE, conv + BN partials.
    xp1 = jnp.pad(x.astype(jnp.bfloat16), pad, mode="reflect")
    c1, s1 = _conv_pass(conv_stats_kernel, xp1, w1, [], n, t, th, h, w, c)
    a1, b1 = _fold_bn(s1, params["g1"], params["b1"], count)

    # ConvBlock 2: BN1+ReLU fused onto conv1's raw bf16 tiles inside the kernel
    # (reflect padding commutes with the elementwise BN/ReLU).
    xp2 = jnp.pad(c1.reshape(n, h, w, c), pad, mode="reflect")
    c2, s2 = _conv_pass(bn_relu_conv_stats_kernel, xp2, w2, [a1, b1], n, t, th, h, w, c)
    a2, b2 = _fold_bn(s2, params["g2"], params["b2"], count)

    # BN2 + ReLU + residual add: lane-dense (N, H, W*C) layout (free reshapes), its own
    # larger streaming row tile, output aliased onto the residual input buffer.
    thr = _pick_tile_h(h, w, c, itemsize=4, budget_bytes=8 << 20)
    tr = h // thr
    row = pl.BlockSpec((None, thr, w * c), lambda i, j: (i, j, 0))
    x2d = x.reshape(n, h, w * c)
    c2d = c2.reshape(n, h, w * c)
    a2wc = jnp.tile(a2, (1, w))
    b2wc = jnp.tile(b2, (1, w))
    y = pl.pallas_call(
        bn_relu_residual_kernel,
        grid=(n, tr),
        in_specs=[row, row, _resident((1, w * c)), _resident((1, w * c))],
        out_specs=row,
        out_shape=jax.ShapeDtypeStruct((n, h, w * c), jnp.float32),
        input_output_aliases={1: 0},                 # write over the residual input
        compiler_params=_params(("parallel", "parallel")),
        cost_estimate=pl.CostEstimate(flops=3 * n * h * w * c, transcendentals=0,
                                      bytes_accessed=n * h * w * c * (2 + 4 + 4)),
    )(c2d, x2d, a2wc, b2wc)

    return jnp.transpose(y.reshape(n, h, w, c), (0, 3, 1, 2))        # back to NCHW


# ------------------------------------------------------------------ pure-JAX reference

def resblock_ref(x_nchw, params):
    """Pure-JAX reference mirroring the kernel's precision choices: bf16 conv inputs /
    weights with f32 accumulation (MXU), bf16 storage of the raw conv outputs, and
    BatchNorm / ReLU / residual in f32 using batch statistics (training-mode forward).
    """
    def conv(h_nhwc, wt):
        nn_, hh, ww, cc = h_nhwc.shape
        xp = jnp.pad(h_nhwc.astype(jnp.bfloat16), ((0, 0), (1, 1), (1, 1), (0, 0)),
                     mode="reflect")
        cols = [xp[:, dy:dy + hh, dx:dx + ww, :] for dy in range(3) for dx in range(3)]
        patches = jnp.concatenate(cols, axis=-1).reshape(nn_ * hh * ww, 9 * cc)
        wm = jnp.transpose(wt, (2, 3, 1, 0)).reshape(9 * cc, cc).astype(jnp.bfloat16)
        y = jnp.dot(patches, wm, preferred_element_type=jnp.float32)
        return y.reshape(nn_, hh, ww, cc)

    def bn_fold(y, g, b):
        mean = jnp.mean(y, axis=(0, 1, 2))
        var = jnp.mean((y - mean) ** 2, axis=(0, 1, 2))
        a = g * lax.rsqrt(var + EPS)
        return a, b - mean * a

    x = jnp.transpose(x_nchw, (0, 2, 3, 1)).astype(jnp.float32)
    y1 = conv(x, params["w1"])
    a1, b1 = bn_fold(y1, params["g1"], params["b1"])
    y1 = y1.astype(jnp.bfloat16).astype(jnp.float32)        # bf16 storage of conv1
    h1 = jnp.maximum(y1 * a1 + b1, 0.0)
    y2 = conv(h1, params["w2"])
    a2, b2 = bn_fold(y2, params["g2"], params["b2"])
    y2 = y2.astype(jnp.bfloat16).astype(jnp.float32)        # bf16 storage of conv2
    h2 = jnp.maximum(y2 * a2 + b2, 0.0)
    return jnp.transpose(x + h2, (0, 3, 1, 2))


if __name__ == "__main__":
    N, C, H, W = 2, 4, 16, 16
    key = jax.random.PRNGKey(0)
    k_x, k_w1, k_w2 = jax.random.split(key, 3)

    x = jax.random.normal(k_x, (N, C, H, W), jnp.float32)

    # Conv2d(ch, ch, 3, bias=False) weights, PyTorch-style uniform(-1/sqrt(fan_in), +).
    bound = 1.0 / float(C * 3 * 3) ** 0.5
    # BatchNorm2d default affine init: gamma=1, beta=0.  The forward uses batch
    # statistics (training mode), matching PyTorch train().
    # TODO(synk): running_mean/running_var momentum buffers are not modeled.
    params = dict(
        w1=jax.random.uniform(k_w1, (C, C, 3, 3), jnp.float32, -bound, bound),
        g1=jnp.ones((C,), jnp.float32), b1=jnp.zeros((C,), jnp.float32),
        w2=jax.random.uniform(k_w2, (C, C, 3, 3), jnp.float32, -bound, bound),
        g2=jnp.ones((C,), jnp.float32), b2=jnp.zeros((C,), jnp.float32),
    )

    out = jax.block_until_ready(jax.jit(resblock_forward)(x, params))
    ref = jax.block_until_ready(jax.jit(resblock_ref)(x, params))

    assert out.shape == (N, C, H, W) and out.dtype == jnp.float32
    if not bool(jnp.allclose(out, ref, atol=2e-3, rtol=2e-3)):
        raise AssertionError("Pallas ResBlock does not match JAX reference")
    print("KERNEL_OK")
</pallas_src>

<mosaic_0001>
module attributes {stable_mosaic.version = 11 : i64} {
  func.func @conv_stats_kernel(%arg0: i32, %arg1: i32, %arg2: memref<1x16x18x4xbf16, #tpu.memory_space<vmem>>, %arg3: memref<1x2x18x4xbf16, #tpu.memory_space<vmem>>, %arg4: memref<36x4xbf16, #tpu.memory_space<vmem>>, %arg5: memref<1x256x4xbf16, #tpu.memory_space<vmem>>, %arg6: memref<1x2x4xf32, #tpu.memory_space<vmem>>) attributes {dimension_semantics = [#tpu.dimension_semantics<parallel>, #tpu.dimension_semantics<arbitrary>], iteration_bounds = array<i64: 2, 1>, scalar_prefetch = 0 : i64, scratch_operands = 0 : i64, tpu.core_type = #tpu.core_type<tc>, window_params = [{transform_indices = @transform_0, window_bounds = array<i64: 1, 16, 18, 4>}, {transform_indices = @transform_1, window_bounds = array<i64: 1, 2, 18, 4>}, {pipeline_mode = #tpu.pipeline_mode<synchronous>, transform_indices = @transform_2, window_bounds = array<i64: 36, 4>}, {transform_indices = @transform_3, window_bounds = array<i64: 1, 256, 4>}, {transform_indices = @transform_4, window_bounds = array<i64: 1, 2, 4>}]} {
    %c0 = arith.constant 0 : index
    %c0_0 = arith.constant 0 : index
    %c0_1 = arith.constant 0 : index
    %c0_2 = arith.constant 0 : index
    %0 = vector.load %arg2[%c0, %c0_0, %c0_1, %c0_2] : memref<1x16x18x4xbf16, #tpu.memory_space<vmem>>, vector<1x16x18x4xbf16>
    %1 = vector.shape_cast %0 : vector<1x16x18x4xbf16> to vector<16x18x4xbf16>
    %c0_3 = arith.constant 0 : index
    %c0_4 = arith.constant 0 : index
    %c0_5 = arith.constant 0 : index
    %c0_6 = arith.constant 0 : index
    %2 = vector.load %arg3[%c0_3, %c0_4, %c0_5, %c0_6] : memref<1x2x18x4xbf16, #tpu.memory_space<vmem>>, vector<1x2x18x4xbf16>
    %3 = vector.shape_cast %2 : vector<1x2x18x4xbf16> to vector<2x18x4xbf16>
    %4 = tpu.concatenate %1, %3 in 0 : vector<16x18x4xbf16>, vector<2x18x4xbf16> -> vector<18x18x4xbf16>
    %cst = arith.constant 0.000000e+00 : f32
    %5 = vector.broadcast %cst : f32 to vector<256x4xf32>
    %6 = vector.extract_strided_slice %4 {offsets = [0, 0, 0], sizes = [16, 16, 4], strides = [1, 1, 1]} : vector<18x18x4xbf16> to vector<16x16x4xbf16>
    %7 = vector.shape_cast %6 : vector<16x16x4xbf16> to vector<256x4xbf16>
    %c0_7 = arith.constant 0 : index
    %c0_8 = arith.constant 0 : index
    %8 = vector.load %arg4[%c0_7, %c0_8] : memref<36x4xbf16, #tpu.memory_space<vmem>>, vector<4x4xbf16>
    %cst_9 = arith.constant dense<0.000000e+00> : vector<256x4xf32>
    %9 = tpu.matmul %7, %8, %cst_9 {dimension_numbers = #tpu.dot_dimension_numbers<[1], [0], [0], [1], [0, 0, 1, 1], [], []>} : vector<256x4xbf16>, vector<4x4xbf16>, vector<256x4xf32> -> vector<256x4xf32>
    %10 = arith.addf %5, %9 : vector<256x4xf32>
    %11 = vector.extract_strided_slice %4 {offsets = [0, 1, 0], sizes = [16, 16, 4], strides = [1, 1, 1]} : vector<18x18x4xbf16> to vector<16x16x4xbf16>
    %12 = vector.shape_cast %11 : vector<16x16x4xbf16> to vector<256x4xbf16>
    %c4 = arith.constant 4 : index
    %c0_10 = arith.constant 0 : index
    %13 = vector.load %arg4[%c4, %c0_10] : memref<36x4xbf16, #tpu.memory_space<vmem>>, vector<4x4xbf16>
    %cst_11 = arith.constant dense<0.000000e+00> : vector<256x4xf32>
    %14 = tpu.matmul %12, %13, %cst_11 {dimension_numbers = #tpu.dot_dimension_numbers<[1], [0], [0], [1], [0, 0, 1, 1], [], []>} : vector<256x4xbf16>, vector<4x4xbf16>, vector<256x4xf32> -> vector<256x4xf32>
    %15 = arith.addf %10, %14 : vector<256x4xf32>
    %16 = vector.extract_strided_slice %4 {offsets = [0, 2, 0], sizes = [16, 16, 4], strides = [1, 1, 1]} : vector<18x18x4xbf16> to vector<16x16x4xbf16>
    %17 = vector.shape_cast %16 : vector<16x16x4xbf16> to vector<256x4xbf16>
    %c8 = arith.constant 8 : index
    %c0_12 = arith.constant 0 : index
    %18 = vector.load %arg4[%c8, %c0_12] : memref<36x4xbf16, #tpu.memory_space<vmem>>, vector<4x4xbf16>
    %cst_13 = arith.constant dense<0.000000e+00> : vector<256x4xf32>
    %19 = tpu.matmul %17, %18, %cst_13 {dimension_numbers = #tpu.dot_dimension_numbers<[1], [0], [0], [1], [0, 0, 1, 1], [], []>} : vector<256x4xbf16>, vector<4x4xbf16>, vector<256x4xf32> -> vector<256x4xf32>
    %20 = arith.addf %15, %19 : vector<256x4xf32>
    %21 = vector.extract_strided_slice %4 {offsets = [1, 0, 0], sizes = [16, 16, 4], strides = [1, 1, 1]} : vector<18x18x4xbf16> to vector<16x16x4xbf16>
    %22 = vector.shape_cast %21 : vector<16x16x4xbf16> to vector<256x4xbf16>
    %c12 = arith.constant 12 : index
    %c0_14 = arith.constant 0 : index
    %23 = vector.load %arg4[%c12, %c0_14] : memref<36x4xbf16, #tpu.memory_space<vmem>>, vector<4x4xbf16>
    %cst_15 = arith.constant dense<0.000000e+00> : vector<256x4xf32>
    %24 = tpu.matmul %22, %23, %cst_15 {dimension_numbers = #tpu.dot_dimension_numbers<[1], [0], [0], [1], [0, 0, 1, 1], [], []>} : vector<256x4xbf16>, vector<4x4xbf16>, vector<256x4xf32> -> vector<256x4xf32>
    %25 = arith.addf %20, %24 : vector<256x4xf32>
    %26 = vector.extract_strided_slice %4 {offsets = [1, 1, 0], sizes = [16, 16, 4], strides = [1, 1, 1]} : vector<18x18x4xbf16> to vector<16x16x4xbf16>
    %27 = vector.shape_cast %26 : vector<16x16x4xbf16> to vector<256x4xbf16>
    %c16 = arith.constant 16 : index
    %c0_16 = arith.constant 0 : index
    %28 = vector.load %arg4[%c16, %c0_16] : memref<36x4xbf16, #tpu.memory_space<vmem>>, vector<4x4xbf16>
    %cst_17 = arith.constant dense<0.000000e+00> : vector<256x4xf32>
    %29 = tpu.matmul %27, %28, %cst_17 {dimension_numbers = #tpu.dot_dimension_numbers<[1], [0], [0], [1], [0, 0, 1, 1], [], []>} : vector<256x4xbf16>, vector<4x4xbf16>, vector<256x4xf32> -> vector<256x4xf32>
    %30 = arith.addf %25, %29 : vector<256x4xf32>
    %31 = vector.extract_strided_slice %4 {offsets = [1, 2, 0], sizes = [16, 16, 4], strides = [1, 1, 1]} : vector<18x18x4xbf16> to vector<16x16x4xbf16>
    %32 = vector.shape_cast %31 : vector<16x16x4xbf16> to vector<256x4xbf16>
    %c20 = arith.constant 20 : index
    %c0_18 = arith.constant 0 : index
    %33 = vector.load %arg4[%c20, %c0_18] : memref<36x4xbf16, #tpu.memory_space<vmem>>, vector<4x4xbf16>
    %cst_19 = arith.constant dense<0.000000e+00> : vector<256x4xf32>
    %34 = tpu.matmul %32, %33, %cst_19 {dimension_numbers = #tpu.dot_dimension_numbers<[1], [0], [0], [1], [0, 0, 1, 1], [], []>} : vector<256x4xbf16>, vector<4x4xbf16>, vector<256x4xf32> -> vector<256x4xf32>
    %35 = arith.addf %30, %34 : vector<256x4xf32>
    %36 = vector.extract_strided_slice %4 {offsets = [2, 0, 0], sizes = [16, 16, 4], strides = [1, 1, 1]} : vector<18x18x4xbf16> to vector<16x16x4xbf16>
    %37 = vector.shape_cast %36 : vector<16x16x4xbf16> to vector<256x4xbf16>
    %c24 = arith.constant 24 : index
    %c0_20 = arith.constant 0 : index
    %38 = vector.load %arg4[%c24, %c0_20] : memref<36x4xbf16, #tpu.memory_space<vmem>>, vector<4x4xbf16>
    %cst_21 = arith.constant dense<0.000000e+00> : vector<256x4xf32>
    %39 = tpu.matmul %37, %38, %cst_21 {dimension_numbers = #tpu.dot_dimension_numbers<[1], [0], [0], [1], [0, 0, 1, 1], [], []>} : vector<256x4xbf16>, vector<4x4xbf16>, vector<256x4xf32> -> vector<256x4xf32>
    %40 = arith.addf %35, %39 : vector<256x4xf32>
    %41 = vector.extract_strided_slice %4 {offsets = [2, 1, 0], sizes = [16, 16, 4], strides = [1, 1, 1]} : vector<18x18x4xbf16> to vector<16x16x4xbf16>
    %42 = vector.shape_cast %41 : vector<16x16x4xbf16> to vector<256x4xbf16>
    %c28 = arith.constant 28 : index
    %c0_22 = arith.constant 0 : index
    %43 = vector.load %arg4[%c28, %c0_22] : memref<36x4xbf16, #tpu.memory_space<vmem>>, vector<4x4xbf16>
    %cst_23 = arith.constant dense<0.000000e+00> : vector<256x4xf32>
    %44 = tpu.matmul %42, %43, %cst_23 {dimension_numbers = #tpu.dot_dimension_numbers<[1], [0], [0], [1], [0, 0, 1, 1], [], []>} : vector<256x4xbf16>, vector<4x4xbf16>, vector<256x4xf32> -> vector<256x4xf32>
    %45 = arith.addf %40, %44 : vector<256x4xf32>
    %46 = vector.extract_strided_slice %4 {offsets = [2, 2, 0], sizes = [16, 16, 4], strides = [1, 1, 1]} : vector<18x18x4xbf16> to vector<16x16x4xbf16>
    %47 = vector.shape_cast %46 : vector<16x16x4xbf16> to vector<256x4xbf16>
    %c32 = arith.constant 32 : index
    %c0_24 = arith.constant 0 : index
    %48 = vector.load %arg4[%c32, %c0_24] : memref<36x4xbf16, #tpu.memory_space<vmem>>, vector<4x4xbf16>
    %cst_25 = arith.constant dense<0.000000e+00> : vector<256x4xf32>
    %49 = tpu.matmul %47, %48, %cst_25 {dimension_numbers = #tpu.dot_dimension_numbers<[1], [0], [0], [1], [0, 0, 1, 1], [], []>} : vector<256x4xbf16>, vector<4x4xbf16>, vector<256x4xf32> -> vector<256x4xf32>
    %50 = arith.addf %45, %49 : vector<256x4xf32>
    %51 = arith.truncf %50 : vector<256x4xf32> to vector<256x4xbf16>
    %c0_26 = arith.constant 0 : index
    %c0_27 = arith.constant 0 : index
    %c0_28 = arith.constant 0 : index
    %52 = vector.load %arg5[%c0_26, %c0_27, %c0_28] : memref<1x256x4xbf16, #tpu.memory_space<vmem>>, vector<1x256x4xbf16>
    %53 = vector.shape_cast %52 : vector<1x256x4xbf16> to vector<256x4xbf16>
    %54 = vector.shape_cast %51 : vector<256x4xbf16> to vector<1x256x4xbf16>
    tpu.vector_store %arg5[%c0_26, %c0_27, %c0_28], %54 {strides = array<i32>} : memref<1x256x4xbf16, #tpu.memory_space<vmem>>, vector<1x256x4xbf16>,
    %c0_i32 = arith.constant 0 : i32
    %55 = arith.cmpi eq, %arg1, %c0_i32 : i32
    %56 = arith.extui %55 : i1 to i32
    %c0_i32_29 = arith.constant 0 : i32
    %57 = arith.cmpi ne, %56, %c0_i32_29 : i32
    scf.if %57 {
      %cst_38 = arith.constant 0.000000e+00 : f32
      %70 = vector.broadcast %cst_38 : f32 to vector<2x4xf32>
      %c0_39 = arith.constant 0 : index
      %c0_40 = arith.constant 0 : index
      %c0_41 = arith.constant 0 : index
      %71 = vector.load %arg6[%c0_39, %c0_40, %c0_41] : memref<1x2x4xf32, #tpu.memory_space<vmem>>, vector<1x2x4xf32>
      %72 = vector.shape_cast %71 : vector<1x2x4xf32> to vector<2x4xf32>
      %73 = vector.shape_cast %70 : vector<2x4xf32> to vector<1x2x4xf32>
      tpu.vector_store %arg6[%c0_39, %c0_40, %c0_41], %73 {strides = array<i32>} : memref<1x2x4xf32, #tpu.memory_space<vmem>>, vector<1x2x4xf32>,
    } else {
    }
    %c0_30 = arith.constant 0 : index
    %c0_31 = arith.constant 0 : index
    %c0_32 = arith.constant 0 : index
    %58 = vector.load %arg6[%c0_30, %c0_31, %c0_32] : memref<1x2x4xf32, #tpu.memory_space<vmem>>, vector<1x2x4xf32>
    %59 = vector.shape_cast %58 : vector<1x2x4xf32> to vector<2x4xf32>
    %cst_33 = arith.constant dense<0.000000e+00> : vector<4xf32>
    %60 = vector.multi_reduction <add>, %50, %cst_33 [0] : vector<256x4xf32> to vector<4xf32>
    %61 = vector.shape_cast %60 : vector<4xf32> to vector<1x4xf32>
    %62 = arith.mulf %50, %50 : vector<256x4xf32>
    %cst_34 = arith.constant dense<0.000000e+00> : vector<4xf32>
    %63 = vector.multi_reduction <add>, %62, %cst_34 [0] : vector<256x4xf32> to vector<4xf32>
    %64 = vector.shape_cast %63 : vector<4xf32> to vector<1x4xf32>
    %65 = tpu.concatenate %61, %64 in 0 : vector<1x4xf32>, vector<1x4xf32> -> vector<2x4xf32>
    %66 = arith.addf %59, %65 : vector<2x4xf32>
    %c0_35 = arith.constant 0 : index
    %c0_36 = arith.constant 0 : index
    %c0_37 = arith.constant 0 : index
    %67 = vector.load %arg6[%c0_35, %c0_36, %c0_37] : memref<1x2x4xf32, #tpu.memory_space<vmem>>, vector<1x2x4xf32>
    %68 = vector.shape_cast %67 : vector<1x2x4xf32> to vector<2x4xf32>
    %69 = vector.shape_cast %66 : vector<2x4xf32> to vector<1x2x4xf32>
    tpu.vector_store %arg6[%c0_35, %c0_36, %c0_37], %69 {strides = array<i32>} : memref<1x2x4xf32, #tpu.memory_space<vmem>>, vector<1x2x4xf32>,
    return
  }
  func.func @transform_0(%arg0: i32, %arg1: i32) -> (i32, i32, i32, i32) {
    %c0_i32 = arith.constant 0 : i32
    %c0_i32_0 = arith.constant 0 : i32
    %c0_i32_1 = arith.constant 0 : i32
    return %arg0, %arg1, %c0_i32, %c0_i32_0 : i32, i32, i32, i32
  }
  func.func @transform_1(%arg0: i32, %arg1: i32) -> (i32, i32, i32, i32) {
    %c1_i32 = arith.constant 1 : i32
    %0 = arith.addi %arg1, %c1_i32 : i32
    %c8_i32 = arith.constant 8 : i32
    %1 = arith.muli %0, %c8_i32 : i32
    %c0_i32 = arith.constant 0 : i32
    %c0_i32_0 = arith.constant 0 : i32
    %c0_i32_1 = arith.constant 0 : i32
    return %arg0, %1, %c0_i32, %c0_i32_0 : i32, i32, i32, i32
  }
  func.func @transform_2(%arg0: i32, %arg1: i32) -> (i32, i32) {
    %c0_i32 = arith.constant 0 : i32
    %c0_i32_0 = arith.constant 0 : i32
    %c0_i32_1 = arith.constant 0 : i32
    return %c0_i32, %c0_i32_0 : i32, i32
  }
  func.func @transform_3(%arg0: i32, %arg1: i32) -> (i32, i32, i32) {
    %c0_i32 = arith.constant 0 : i32
    %c0_i32_0 = arith.constant 0 : i32
    return %arg0, %arg1, %c0_i32 : i32, i32, i32
  }
  func.func @transform_4(%arg0: i32, %arg1: i32) -> (i32, i32, i32) {
    %c0_i32 = arith.constant 0 : i32
    %c0_i32_0 = arith.constant 0 : i32
    %c0_i32_1 = arith.constant 0 : i32
    return %arg0, %c0_i32, %c0_i32_0 : i32, i32, i32
  }
}

module attributes {stable_mosaic.version = 11 : i64} {
  func.func @bn_relu_conv_stats_kernel(%arg0: i32, %arg1: i32, %arg2: memref<1x16x18x4xbf16, #tpu.memory_space<vmem>>, %arg3: memref<1x2x18x4xbf16, #tpu.memory_space<vmem>>, %arg4: memref<36x4xbf16, #tpu.memory_space<vmem>>, %arg5: memref<1x4xf32, #tpu.memory_space<vmem>>, %arg6: memref<1x4xf32, #tpu.memory_space<vmem>>, %arg7: memref<1x256x4xbf16, #tpu.memory_space<vmem>>, %arg8: memref<1x2x4xf32, #tpu.memory_space<vmem>>) attributes {dimension_semantics = [#tpu.dimension_semantics<parallel>, #tpu.dimension_semantics<arbitrary>], iteration_bounds = array<i64: 2, 1>, scalar_prefetch = 0 : i64, scratch_operands = 0 : i64, tpu.core_type = #tpu.core_type<tc>, window_params = [{transform_indices = @transform_0, window_bounds = array<i64: 1, 16, 18, 4>}, {transform_indices = @transform_1, window_bounds = array<i64: 1, 2, 18, 4>}, {pipeline_mode = #tpu.pipeline_mode<synchronous>, transform_indices = @transform_2, window_bounds = array<i64: 36, 4>}, {pipeline_mode = #tpu.pipeline_mode<synchronous>, transform_indices = @transform_3, window_bounds = array<i64: 1, 4>}, {pipeline_mode = #tpu.pipeline_mode<synchronous>, transform_indices = @transform_4, window_bounds = array<i64: 1, 4>}, {transform_indices = @transform_5, window_bounds = array<i64: 1, 256, 4>}, {transform_indices = @transform_6, window_bounds = array<i64: 1, 2, 4>}]} {
    %c0 = arith.constant 0 : index
    %c0_0 = arith.constant 0 : index
    %c0_1 = arith.constant 0 : index
    %c0_2 = arith.constant 0 : index
    %0 = vector.load %arg2[%c0, %c0_0, %c0_1, %c0_2] : memref<1x16x18x4xbf16, #tpu.memory_space<vmem>>, vector<1x16x18x4xbf16>
    %1 = vector.shape_cast %0 : vector<1x16x18x4xbf16> to vector<16x18x4xbf16>
    %c0_3 = arith.constant 0 : index
    %c0_4 = arith.constant 0 : index
    %c0_5 = arith.constant 0 : index
    %c0_6 = arith.constant 0 : index
    %2 = vector.load %arg3[%c0_3, %c0_4, %c0_5, %c0_6] : memref<1x2x18x4xbf16, #tpu.memory_space<vmem>>, vector<1x2x18x4xbf16>
    %3 = vector.shape_cast %2 : vector<1x2x18x4xbf16> to vector<2x18x4xbf16>
    %4 = tpu.concatenate %1, %3 in 0 : vector<16x18x4xbf16>, vector<2x18x4xbf16> -> vector<18x18x4xbf16>
    %5 = arith.extf %4 : vector<18x18x4xbf16> to vector<18x18x4xf32>
    %c0_7 = arith.constant 0 : index
    %c0_8 = arith.constant 0 : index
    %6 = vector.load %arg5[%c0_7, %c0_8] : memref<1x4xf32, #tpu.memory_space<vmem>>, vector<1x4xf32>
    %7 = vector.shape_cast %6 : vector<1x4xf32> to vector<1x1x4xf32>
    %c0_9 = arith.constant 0 : index
    %c0_10 = arith.constant 0 : index
    %8 = vector.load %arg6[%c0_9, %c0_10] : memref<1x4xf32, #tpu.memory_space<vmem>>, vector<1x4xf32>
    %9 = vector.shape_cast %8 : vector<1x4xf32> to vector<1x1x4xf32>
    %10 = vector.broadcast %7 : vector<1x1x4xf32> to vector<18x18x4xf32>
    %11 = arith.mulf %5, %10 : vector<18x18x4xf32>
    %12 = vector.broadcast %9 : vector<1x1x4xf32> to vector<18x18x4xf32>
    %13 = arith.addf %11, %12 : vector<18x18x4xf32>
    %cst = arith.constant 0.000000e+00 : f32
    %14 = vector.broadcast %cst : f32 to vector<18x18x4xf32>
    %15 = arith.maximumf %13, %14 : vector<18x18x4xf32>
    %16 = arith.truncf %15 : vector<18x18x4xf32> to vector<18x18x4xbf16>
    %cst_11 = arith.constant 0.000000e+00 : f32
    %17 = vector.broadcast %cst_11 : f32 to vector<256x4xf32>
    %18 = vector.extract_strided_slice %16 {offsets = [0, 0, 0], sizes = [16, 16, 4], strides = [1, 1, 1]} : vector<18x18x4xbf16> to vector<16x16x4xbf16>
    %19 = vector.shape_cast %18 : vector<16x16x4xbf16> to vector<256x4xbf16>
    %c0_12 = arith.constant 0 : index
    %c0_13 = arith.constant 0 : index
    %20 = vector.load %arg4[%c0_12, %c0_13] : memref<36x4xbf16, #tpu.memory_space<vmem>>, vector<4x4xbf16>
    %cst_14 = arith.constant dense<0.000000e+00> : vector<256x4xf32>
    %21 = tpu.matmul %19, %20, %cst_14 {dimension_numbers = #tpu.dot_dimension_numbers<[1], [0], [0], [1], [0, 0, 1, 1], [], []>} : vector<256x4xbf16>, vector<4x4xbf16>, vector<256x4xf32> -> vector<256x4xf32>
    %22 = arith.addf %17, %21 : vector<256x4xf32>
    %23 = vector.extract_strided_slice %16 {offsets = [0, 1, 0], sizes = [16, 16, 4], strides = [1, 1, 1]} : vector<18x18x4xbf16> to vector<16x16x4xbf16>
    %24 = vector.shape_cast %23 : vector<16x16x4xbf16> to vector<256x4xbf16>
    %c4 = arith.constant 4 : index
    %c0_15 = arith.constant 0 : index
    %25 = vector.load %arg4[%c4, %c0_15] : memref<36x4xbf16, #tpu.memory_space<vmem>>, vector<4x4xbf16>
    %cst_16 = arith.constant dense<0.000000e+00> : vector<256x4xf32>
    %26 = tpu.matmul %24, %25, %cst_16 {dimension_numbers = #tpu.dot_dimension_numbers<[1], [0], [0], [1], [0, 0, 1, 1], [], []>} : vector<256x4xbf16>, vector<4x4xbf16>, vector<256x4xf32> -> vector<256x4xf32>
    %27 = arith.addf %22, %26 : vector<256x4xf32>
    %28 = vector.extract_strided_slice %16 {offsets = [0, 2, 0], sizes = [16, 16, 4], strides = [1, 1, 1]} : vector<18x18x4xbf16> to vector<16x16x4xbf16>
    %29 = vector.shape_cast %28 : vector<16x16x4xbf16> to vector<256x4xbf16>
    %c8 = arith.constant 8 : index
    %c0_17 = arith.constant 0 : index
    %30 = vector.load %arg4[%c8, %c0_17] : memref<36x4xbf16, #tpu.memory_space<vmem>>, vector<4x4xbf16>
    %cst_18 = arith.constant dense<0.000000e+00> : vector<256x4xf32>
    %31 = tpu.matmul %29, %30, %cst_18 {dimension_numbers = #tpu.dot_dimension_numbers<[1], [0], [0], [1], [0, 0, 1, 1], [], []>} : vector<256x4xbf16>, vector<4x4xbf16>, vector<256x4xf32> -> vector<256x4xf32>
    %32 = arith.addf %27, %31 : vector<256x4xf32>
    %33 = vector.extract_strided_slice %16 {offsets = [1, 0, 0], sizes = [16, 16, 4], strides = [1, 1, 1]} : vector<18x18x4xbf16> to vector<16x16x4xbf16>
    %34 = vector.shape_cast %33 : vector<16x16x4xbf16> to vector<256x4xbf16>
    %c12 = arith.constant 12 : index
    %c0_19 = arith.constant 0 : index
    %35 = vector.load %arg4[%c12, %c0_19] : memref<36x4xbf16, #tpu.memory_space<vmem>>, vector<4x4xbf16>
    %cst_20 = arith.constant dense<0.000000e+00> : vector<256x4xf32>
    %36 = tpu.matmul %34, %35, %cst_20 {dimension_numbers = #tpu.dot_dimension_numbers<[1], [0], [0], [1], [0, 0, 1, 1], [], []>} : vector<256x4xbf16>, vector<4x4xbf16>, vector<256x4xf32> -> vector<256x4xf32>
    %37 = arith.addf %32, %36 : vector<256x4xf32>
    %38 = vector.extract_strided_slice %16 {offsets = [1, 1, 0], sizes = [16, 16, 4], strides = [1, 1, 1]} : vector<18x18x4xbf16> to vector<16x16x4xbf16>
    %39 = vector.shape_cast %38 : vector<16x16x4xbf16> to vector<256x4xbf16>
    %c16 = arith.constant 16 : index
    %c0_21 = arith.constant 0 : index
    %40 = vector.load %arg4[%c16, %c0_21] : memref<36x4xbf16, #tpu.memory_space<vmem>>, vector<4x4xbf16>
    %cst_22 = arith.constant dense<0.000000e+00> : vector<256x4xf32>
    %41 = tpu.matmul %39, %40, %cst_22 {dimension_numbers = #tpu.dot_dimension_numbers<[1], [0], [0], [1], [0, 0, 1, 1], [], []>} : vector<256x4xbf16>, vector<4x4xbf16>, vector<256x4xf32> -> vector<256x4xf32>
    %42 = arith.addf %37, %41 : vector<256x4xf32>
    %43 = vector.extract_strided_slice %16 {offsets = [1, 2, 0], sizes = [16, 16, 4], strides = [1, 1, 1]} : vector<18x18x4xbf16> to vector<16x16x4xbf16>
    %44 = vector.shape_cast %43 : vector<16x16x4xbf16> to vector<256x4xbf16>
    %c20 = arith.constant 20 : index
    %c0_23 = arith.constant 0 : index
    %45 = vector.load %arg4[%c20, %c0_23] : memref<36x4xbf16, #tpu.memory_space<vmem>>, vector<4x4xbf16>
    %cst_24 = arith.constant dense<0.000000e+00> : vector<256x4xf32>
    %46 = tpu.matmul %44, %45, %cst_24 {dimension_numbers = #tpu.dot_dimension_numbers<[1], [0], [0], [1], [0, 0, 1, 1], [], []>} : vector<256x4xbf16>, vector<4x4xbf16>, vector<256x4xf32> -> vector<256x4xf32>
    %47 = arith.addf %42, %46 : vector<256x4xf32>
    %48 = vector.extract_strided_slice %16 {offsets = [2, 0, 0], sizes = [16, 16, 4], strides = [1, 1, 1]} : vector<18x18x4xbf16> to vector<16x16x4xbf16>
    %49 = vector.shape_cast %48 : vector<16x16x4xbf16> to vector<256x4xbf16>
    %c24 = arith.constant 24 : index
    %c0_25 = arith.constant 0 : index
    %50 = vector.load %arg4[%c24, %c0_25] : memref<36x4xbf16, #tpu.memory_space<vmem>>, vector<4x4xbf16>
    %cst_26 = arith.constant dense<0.000000e+00> : vector<256x4xf32>
    %51 = tpu.matmul %49, %50, %cst_26 {dimension_numbers = #tpu.dot_dimension_numbers<[1], [0], [0], [1], [0, 0, 1, 1], [], []>} : vector<256x4xbf16>, vector<4x4xbf16>, vector<256x4xf32> -> vector<256x4xf32>
    %52 = arith.addf %47, %51 : vector<256x4xf32>
    %53 = vector.extract_strided_slice %16 {offsets = [2, 1, 0], sizes = [16, 16, 4], strides = [1, 1, 1]} : vector<18x18x4xbf16> to vector<16x16x4xbf16>
    %54 = vector.shape_cast %53 : vector<16x16x4xbf16> to vector<256x4xbf16>
    %c28 = arith.constant 28 : index
    %c0_27 = arith.constant 0 : index
    %55 = vector.load %arg4[%c28, %c0_27] : memref<36x4xbf16, #tpu.memory_space<vmem>>, vector<4x4xbf16>
    %cst_28 = arith.constant dense<0.000000e+00> : vector<256x4xf32>
    %56 = tpu.matmul %54, %55, %cst_28 {dimension_numbers = #tpu.dot_dimension_numbers<[1], [0], [0], [1], [0, 0, 1, 1], [], []>} : vector<256x4xbf16>, vector<4x4xbf16>, vector<256x4xf32> -> vector<256x4xf32>
    %57 = arith.addf %52, %56 : vector<256x4xf32>
    %58 = vector.extract_strided_slice %16 {offsets = [2, 2, 0], sizes = [16, 16, 4], strides = [1, 1, 1]} : vector<18x18x4xbf16> to vector<16x16x4xbf16>
    %59 = vector.shape_cast %58 : vector<16x16x4xbf16> to vector<256x4xbf16>
    %c32 = arith.constant 32 : index
    %c0_29 = arith.constant 0 : index
    %60 = vector.load %arg4[%c32, %c0_29] : memref<36x4xbf16, #tpu.memory_space<vmem>>, vector<4x4xbf16>
    %cst_30 = arith.constant dense<0.000000e+00> : vector<256x4xf32>
    %61 = tpu.matmul %59, %60, %cst_30 {dimension_numbers = #tpu.dot_dimension_numbers<[1], [0], [0], [1], [0, 0, 1, 1], [], []>} : vector<256x4xbf16>, vector<4x4xbf16>, vector<256x4xf32> -> vector<256x4xf32>
    %62 = arith.addf %57, %61 : vector<256x4xf32>
    %63 = arith.truncf %62 : vector<256x4xf32> to vector<256x4xbf16>
    %c0_31 = arith.constant 0 : index
    %c0_32 = arith.constant 0 : index
    %c0_33 = arith.constant 0 : index
    %64 = vector.load %arg7[%c0_31, %c0_32, %c0_33] : memref<1x256x4xbf16, #tpu.memory_space<vmem>>, vector<1x256x4xbf16>
    %65 = vector.shape_cast %64 : vector<1x256x4xbf16> to vector<256x4xbf16>
    %66 = vector.shape_cast %63 : vector<256x4xbf16> to vector<1x256x4xbf16>
    tpu.vector_store %arg7[%c0_31, %c0_32, %c0_33], %66 {strides = array<i32>} : memref<1x256x4xbf16, #tpu.memory_space<vmem>>, vector<1x256x4xbf16>,
    %c0_i32 = arith.constant 0 : i32
    %67 = arith.cmpi eq, %arg1, %c0_i32 : i32
    %68 = arith.extui %67 : i1 to i32
    %c0_i32_34 = arith.constant 0 : i32
    %69 = arith.cmpi ne, %68, %c0_i32_34 : i32
    scf.if %69 {
      %cst_43 = arith.constant 0.000000e+00 : f32
      %82 = vector.broadcast %cst_43 : f32 to vector<2x4xf32>
      %c0_44 = arith.constant 0 : index
      %c0_45 = arith.constant 0 : index
      %c0_46 = arith.constant 0 : index
      %83 = vector.load %arg8[%c0_44, %c0_45, %c0_46] : memref<1x2x4xf32, #tpu.memory_space<vmem>>, vector<1x2x4xf32>
      %84 = vector.shape_cast %83 : vector<1x2x4xf32> to vector<2x4xf32>
      %85 = vector.shape_cast %82 : vector<2x4xf32> to vector<1x2x4xf32>
      tpu.vector_store %arg8[%c0_44, %c0_45, %c0_46], %85 {strides = array<i32>} : memref<1x2x4xf32, #tpu.memory_space<vmem>>, vector<1x2x4xf32>,
    } else {
    }
    %c0_35 = arith.constant 0 : index
    %c0_36 = arith.constant 0 : index
    %c0_37 = arith.constant 0 : index
    %70 = vector.load %arg8[%c0_35, %c0_36, %c0_37] : memref<1x2x4xf32, #tpu.memory_space<vmem>>, vector<1x2x4xf32>
    %71 = vector.shape_cast %70 : vector<1x2x4xf32> to vector<2x4xf32>
    %cst_38 = arith.constant dense<0.000000e+00> : vector<4xf32>
    %72 = vector.multi_reduction <add>, %62, %cst_38 [0] : vector<256x4xf32> to vector<4xf32>
    %73 = vector.shape_cast %72 : vector<4xf32> to vector<1x4xf32>
    %74 = arith.mulf %62, %62 : vector<256x4xf32>
    %cst_39 = arith.constant dense<0.000000e+00> : vector<4xf32>
    %75 = vector.multi_reduction <add>, %74, %cst_39 [0] : vector<256x4xf32> to vector<4xf32>
    %76 = vector.shape_cast %75 : vector<4xf32> to vector<1x4xf32>
    %77 = tpu.concatenate %73, %76 in 0 : vector<1x4xf32>, vector<1x4xf32> -> vector<2x4xf32>
    %78 = arith.addf %71, %77 : vector<2x4xf32>
    %c0_40 = arith.constant 0 : index
    %c0_41 = arith.constant 0 : index
    %c0_42 = arith.constant 0 : index
    %79 = vector.load %arg8[%c0_40, %c0_41, %c0_42] : memref<1x2x4xf32, #tpu.memory_space<vmem>>, vector<1x2x4xf32>
    %80 = vector.shape_cast %79 : vector<1x2x4xf32> to vector<2x4xf32>
    %81 = vector.shape_cast %78 : vector<2x4xf32> to vector<1x2x4xf32>
    tpu.vector_store %arg8[%c0_40, %c0_41, %c0_42], %81 {strides = array<i32>} : memref<1x2x4xf32, #tpu.memory_space<vmem>>, vector<1x2x4xf32>,
    return
  }
  func.func @transform_0(%arg0: i32, %arg1: i32) -> (i32, i32, i32, i32) {
    %c0_i32 = arith.constant 0 : i32
    %c0_i32_0 = arith.constant 0 : i32
    %c0_i32_1 = arith.constant 0 : i32
    return %arg0, %arg1, %c0_i32, %c0_i32_0 : i32, i32, i32, i32
  }
  func.func @transform_1(%arg0: i32, %arg1: i32) -> (i32, i32, i32, i32) {
    %c1_i32 = arith.constant 1 : i32
    %0 = arith.addi %arg1, %c1_i32 : i32
    %c8_i32 = arith.constant 8 : i32
    %1 = arith.muli %0, %c8_i32 : i32
    %c0_i32 = arith.constant 0 : i32
    %c0_i32_0 = arith.constant 0 : i32
    %c0_i32_1 = arith.constant 0 : i32
    return %arg0, %1, %c0_i32, %c0_i32_0 : i32, i32, i32, i32
  }
  func.func @transform_2(%arg0: i32, %arg1: i32) -> (i32, i32) {
    %c0_i32 = arith.constant 0 : i32
    %c0_i32_0 = arith.constant 0 : i32
    %c0_i32_1 = arith.constant 0 : i32
    return %c0_i32, %c0_i32_0 : i32, i32
  }
  func.func @transform_3(%arg0: i32, %arg1: i32) -> (i32, i32) {
    %c0_i32 = arith.constant 0 : i32
    %c0_i32_0 = arith.constant 0 : i32
    %c0_i32_1 = arith.constant 0 : i32
    return %c0_i32, %c0_i32_0 : i32, i32
  }
  func.func @transform_4(%arg0: i32, %arg1: i32) -> (i32, i32) {
    %c0_i32 = arith.constant 0 : i32
    %c0_i32_0 = arith.constant 0 : i32
    %c0_i32_1 = arith.constant 0 : i32
    return %c0_i32, %c0_i32_0 : i32, i32
  }
  func.func @transform_5(%arg0: i32, %arg1: i32) -> (i32, i32, i32) {
    %c0_i32 = arith.constant 0 : i32
    %c0_i32_0 = arith.constant 0 : i32
    return %arg0, %arg1, %c0_i32 : i32, i32, i32
  }
  func.func @transform_6(%arg0: i32, %arg1: i32) -> (i32, i32, i32) {
    %c0_i32 = arith.constant 0 : i32
    %c0_i32_0 = arith.constant 0 : i32
    %c0_i32_1 = arith.constant 0 : i32
    return %arg0, %c0_i32, %c0_i32_0 : i32, i32, i32
  }
}

module attributes {stable_mosaic.version = 11 : i64} {
  func.func @bn_relu_residual_kernel(%arg0: i32, %arg1: i32, %arg2: memref<1x16x64xbf16, #tpu.memory_space<vmem>>, %arg3: memref<1x16x64xf32, #tpu.memory_space<vmem>>, %arg4: memref<1x64xf32, #tpu.memory_space<vmem>>, %arg5: memref<1x64xf32, #tpu.memory_space<vmem>>, %arg6: memref<1x16x64xf32, #tpu.memory_space<vmem>>) attributes {dimension_semantics = [#tpu.dimension_semantics<parallel>, #tpu.dimension_semantics<parallel>], iteration_bounds = array<i64: 2, 1>, scalar_prefetch = 0 : i64, scratch_operands = 0 : i64, tpu.core_type = #tpu.core_type<tc>, window_params = [{transform_indices = @transform_0, window_bounds = array<i64: 1, 16, 64>}, {transform_indices = @transform_1, window_bounds = array<i64: 1, 16, 64>}, {pipeline_mode = #tpu.pipeline_mode<synchronous>, transform_indices = @transform_2, window_bounds = array<i64: 1, 64>}, {pipeline_mode = #tpu.pipeline_mode<synchronous>, transform_indices = @transform_3, window_bounds = array<i64: 1, 64>}, {transform_indices = @transform_4, window_bounds = array<i64: 1, 16, 64>}]} {
    %c0 = arith.constant 0 : index
    %c0_0 = arith.constant 0 : index
    %c0_1 = arith.constant 0 : index
    %0 = vector.load %arg2[%c0, %c0_0, %c0_1] : memref<1x16x64xbf16, #tpu.memory_space<vmem>>, vector<1x16x64xbf16>
    %1 = vector.shape_cast %0 : vector<1x16x64xbf16> to vector<16x64xbf16>
    %2 = arith.extf %1 : vector<16x64xbf16> to vector<16x64xf32>
    %c0_2 = arith.constant 0 : index
    %c0_3 = arith.constant 0 : index
    %3 = vector.load %arg4[%c0_2, %c0_3] : memref<1x64xf32, #tpu.memory_space<vmem>>, vector<1x64xf32>
    %4 = vector.broadcast %3 : vector<1x64xf32> to vector<16x64xf32>
    %5 = arith.mulf %2, %4 : vector<16x64xf32>
    %c0_4 = arith.constant 0 : index
    %c0_5 = arith.constant 0 : index
    %6 = vector.load %arg5[%c0_4, %c0_5] : memref<1x64xf32, #tpu.memory_space<vmem>>, vector<1x64xf32>
    %7 = vector.broadcast %6 : vector<1x64xf32> to vector<16x64xf32>
    %8 = arith.addf %5, %7 : vector<16x64xf32>
    %cst = arith.constant 0.000000e+00 : f32
    %9 = vector.broadcast %cst : f32 to vector<16x64xf32>
    %10 = arith.maximumf %8, %9 : vector<16x64xf32>
    %c0_6 = arith.constant 0 : index
    %c0_7 = arith.constant 0 : index
    %c0_8 = arith.constant 0 : index
    %11 = vector.load %arg3[%c0_6, %c0_7, %c0_8] : memref<1x16x64xf32, #tpu.memory_space<vmem>>, vector<1x16x64xf32>
    %12 = vector.shape_cast %11 : vector<1x16x64xf32> to vector<16x64xf32>
    %13 = arith.addf %12, %10 : vector<16x64xf32>
    %c0_9 = arith.constant 0 : index
    %c0_10 = arith.constant 0 : index
    %c0_11 = arith.constant 0 : index
    %14 = vector.load %arg6[%c0_9, %c0_10, %c0_11] : memref<1x16x64xf32, #tpu.memory_space<vmem>>, vector<1x16x64xf32>
    %15 = vector.shape_cast %14 : vector<1x16x64xf32> to vector<16x64xf32>
    %16 = vector.shape_cast %13 : vector<16x64xf32> to vector<1x16x64xf32>
    tpu.vector_store %arg6[%c0_9, %c0_10, %c0_11], %16 {strides = array<i32>} : memref<1x16x64xf32, #tpu.memory_space<vmem>>, vector<1x16x64xf32>,
    return
  }
  func.func @transform_0(%arg0: i32, %arg1: i32) -> (i32, i32, i32) {
    %c0_i32 = arith.constant 0 : i32
    %c0_i32_0 = arith.constant 0 : i32
    return %arg0, %arg1, %c0_i32 : i32, i32, i32
  }
  func.func @transform_1(%arg0: i32, %arg1: i32) -> (i32, i32, i32) {
    %c0_i32 = arith.constant 0 : i32
    %c0_i32_0 = arith.constant 0 : i32
    return %arg0, %arg1, %c0_i32 : i32, i32, i32
  }
  func.func @transform_2(%arg0: i32, %arg1: i32) -> (i32, i32) {
    %c0_i32 = arith.constant 0 : i32
    %c0_i32_0 = arith.constant 0 : i32
    %c0_i32_1 = arith.constant 0 : i32
    return %c0_i32, %c0_i32_0 : i32, i32
  }
  func.func @transform_3(%arg0: i32, %arg1: i32) -> (i32, i32) {
    %c0_i32 = arith.constant 0 : i32
    %c0_i32_0 = arith.constant 0 : i32
    %c0_i32_1 = arith.constant 0 : i32
    return %c0_i32, %c0_i32_0 : i32, i32
  }
  func.func @transform_4(%arg0: i32, %arg1: i32) -> (i32, i32, i32) {
    %c0_i32 = arith.constant 0 : i32
    %c0_i32_0 = arith.constant 0 : i32
    return %arg0, %arg1, %c0_i32 : i32, i32, i32
  }
}

</mosaic_0001>

<bundles_post_ra>
// kernel: resblock_forward.5
= control target key start
LH: loop header
LB: loop body
LE: loop exit
PB: predicated region body
PF: predicated region fallthrough
CT: control target
= control target key end

     0   :  { %s498_s15 = smov 0   ;;  %s500_s16 = smov 0   ;;  %s540_s0 = inlined_call_operand.vmem [shape: bf16[2,16,64], index: 0, kind: input, shape index: {}]   ;;  %s541_s1 = inlined_call_operand.vmem [shape: f32[2,16,64], index: 1, kind: input, shape index: {}, may-alias: {1,4}]   ;;  %s542_s2 = inlined_call_operand.vmem [shape: f32[1,64], index: 2, kind: input, shape index: {}]   ;;  %s543_s3 = inlined_call_operand.vmem [shape: f32[1,64], index: 3, kind: input, shape index: {}]   ;;  %s544_s4 = inlined_call_operand.vmem [shape: f32[2,16,64], index: 4, kind: output, shape index: {}, may-alias: {1,4}]  }
   0x1   :  { %s502_s17 = smov 0  }
   0x2 LB: > { %s26_s18 = sadd.s32 1, %s467_s16  ;;  %p407_p0 = scmp.ge.s32.totalorder %s471_s17, 1  ;;  %s471_s17 = sphi %s502_s17, %s14_s17   ;;  %s467_s16 = sphi %s500_s16, %s546_s16   ;;  %s463_s15 = sphi %s498_s15, %s545_s15  }
   0x3   : > { %p28_p1 = scmp.ge.s32.totalorder %s26_s18, 2  ;;  %p200_p2 = scmp.lt.s32.totalorder %s471_s17, 3 }
   0x5   : > { %s548_s18 = smov (%p28_p1, %s26_s18), 0  ;;  %p201_p3 = pnand %p407_p0, %p200_p2 }
   0x6   : > { %p244_p4 = scmp.lt.s32.totalorder (!%p201_p3), %s463_s15, 1 }
   0x7   : > { %204 = sbr.rel (%p201_p3) target bundleno = 28 (0x1c), region = 36 }
   0xc   : > { %s550_s15 = smov (!%p244_p4, %s463_s15), 1  ;;  %v447_v0 = vld [vmem:[%s542_s2] ss:$0 sm:$0xff]  ;;  %vm295_vm0 = vcmask 523264  }
   0xd   : > { %s416_s19 = sshll.u32 %s550_s15, 3  ;;  %s417_s25 = sshll.u32 %s550_s15, 4  ;;  %v448_v4 = vld [vmem:[%s543_s3] ss:$0 sm:$0xff] }
   0xe   : > { %s251_s22 = scalar_lea.vmem %s540_s0, %s416_s19  ;;  %s261_s30 = scalar_lea.vmem %s541_s1, %s417_s25 }
   0xf   : > { %v420_v1 = vld [vmem:[%s251_s22] sm:$0xff]   ;;  %v292_v10 = vld [vmem:[%s261_s30 + $0x8] sm:$0xff]  ;;  %s271_s7 = scalar_lea.vmem %s544_s4, %s417_s25 }
  0x10   : > { %v421_v2 = vunpack.c.l.bf16 %v420_v1  ;;  %v422_v3 = vunpack.c.h.bf16 %v420_v1  ;;  %v291_v9 = vld [vmem:[%s261_s30] sm:$0xff] }
  0x12   : > { %v281_v5 = vmul.f32 %v447_v0, %v421_v2  ;;  %v282_v6 = vmul.f32 %v447_v0, %v422_v3 }
  0x14   : > { %v287_v7 = vadd.f32 %v448_v4, %v281_v5  ;;  %v288_v8 = vadd.f32 %v448_v4, %v282_v6 }
  0x16   : > { %v289_v11 = vmax.f32 %v287_v7, 0.0  ;;  %v290_v12 = vmax.f32 %v288_v8, 0.0 }
  0x18   : > { %v293_v13 = vadd.f32 %v291_v9, %v289_v11  ;;  %v294_v14 = vadd.f32 %v292_v10, %v290_v12 }
  0x1a   : > { %296 = vst.msk [vmem:[%s271_s7] sm:$0xff] %vm295_vm0, %v293_v13 }
  0x1b   : > { %297 = vst.msk [vmem:[%s271_s7 + $0x8] sm:$0xff] %vm295_vm0, %v294_v14 }
  0x1c PF: > { %s14_s17 = sadd.s32 1, %s471_s17   ;;  %s545_s15 = smov %s467_s16 }
  0x1d   : > { %p11_p5 = scmp.ge.s32.totalorder %s14_s17, 4   ;;  %s546_s16 = smov %s548_s18 }
  0x1f   :  { %13 = sbr.rel (!%p11_p5) target bundleno = 2 (0x2), region = 69 }

// kernel: resblock_forward.3
= control target key start
LH: loop header
LB: loop body
LE: loop exit
PB: predicated region body
PF: predicated region fallthrough
CT: control target
= control target key end

     0   :  { %s3151_s15 = smov 0   ;;  %s3153_s16 = smov 0   ;;  %s4379_s0 = inlined_call_operand.vmem [shape: bf16[2,18,18,4], index: 0, kind: input, shape index: {}, may-alias: {0,1}]   ;;  %s4380_s1 = inlined_call_operand.vmem [shape: bf16[2,18,18,4], index: 1, kind: input, shape index: {}, may-alias: {0,1}]   ;;  %s4381_s2 = inlined_call_operand.vmem [shape: bf16[36,4], index: 2, kind: input, shape index: {}]   ;;  %s4382_s3 = inlined_call_operand.vmem [shape: bf16[2,256,4], index: 3, kind: output, shape index: {0}]   ;;  %s4383_s4 = inlined_call_operand.vmem [shape: f32[2,2,4], index: 4, kind: output, shape index: {1}]  }
   0x1   :  { %s3155_s17 = smov 0  }
   0x2 LB: > { %s27_s18 = sadd.s32 1, %s3119_s16  ;;  %p2798_p0 = scmp.ge.s32.totalorder %s3123_s17, 1  ;;  %s3123_s17 = sphi %s3155_s17, %s15_s17   ;;  %s3119_s16 = sphi %s3153_s16, %s4523_s16   ;;  %s3115_s15 = sphi %s3151_s15, %s4522_s15  }
   0x3   : > { %p29_p1 = scmp.ge.s32.totalorder %s27_s18, 2  ;;  %p223_p2 = scmp.lt.s32.totalorder %s3123_s17, 3 }
   0x5   : > { %s4525_s18 = smov (%p29_p1, %s27_s18), 0  ;;  %p224_p3 = pnand %p2798_p0, %p223_p2 }
   0x7   : > { %227 = sbr.rel (%p224_p3) target bundleno = 776 (0x308), region = 32 }
   0xc   : > { %v772_v0 = vld [vmem:[%s4381_s2] sm:$0xc]  ;;  %p285_p4 = scmp.lt.s32.totalorder %s3115_s15, 1  ;;  %v1318_v3 = vld [vmem:[%s4381_s2 + $0x4] sm:$0x3]  ;;  %vm874_vm0 = vcmask 1041408  }
   0xd   : > { %v822_v1 = vunpack.c.l.b16 %v772_v0  ;;  %v384_v4 = vld [vmem:[%s4381_s2] sm:$0x3]  ;;  %v1700_v5 = vld [vmem:[%s4381_s2 + $0x8] sm:$0x3]  ;;  %vm385_vm1 = vsmask.f32 3328 }
   0xe   : > { %s4527_s15 = smov (!%p285_p4, %s3115_s15), 1  ;;  %vm386_vm2 = vsmask.f32 7440  ;;  %v1416_v7 = vsel %vm874_vm0, %v1318_v3, 0  ;;  %v1539_v8 = vld [vmem:[%s4381_s2 + $0x4] sm:$0xc] }
   0xf   : > { %v823_v2 = vpack.c.b16 %v822_v1, %v822_v1  ;;  %s3064_s25 = smul.u32 216, %s4527_s15  ;;  %v1096_v9 = vsel %vm874_vm0, %v384_v4, 0  ;;  %v1708_v13 = vsel %vm874_vm0, %v1700_v5, 0  ;;  %v1546_v22 = vunpack.c.l.b16 %v1539_v8  ;;  %vm3219_vm4 = vmor %vm385_vm1, %vm386_vm2  ;;  %s3042_s23 = sshll.u32 %s4527_s15, 7 }
  0x10   : > { %vm825_vm3 = vcmask 31744   ;;  %vm1203_vm5 = vcmask 1042432   ;;  %vm1204_vm6 = vcmask 1046532   ;;  %s4121_s26 = scalar_lea.vmem %s4382_s3, %s3042_s23  ;;  %vm2437_vm8 = vcmask 27648   ;;  %s2803_s27 = sshll.u32 %s4527_s15, 1 }
  0x11   : > { %v824_v6 = vrot.slane %v823_v2, 2  ;;  %s3189_s30 = scalar_lea.vmem %s4379_s0, %s3064_s25  ;;  %v1547_v42 = vpack.c.b16 %v1546_v22, %v1546_v22  ;;  %vm3522_vm7 = vmor %vm1203_vm5, %vm1204_vm6  ;;  %s3041_s19 = sadd.s32 192, %s3064_s25  ;;  %vm2474_vm9 = vcmask 25600   ;;  %vm2647_vm10 = vcmask 1040384  }
  0x12   : > { %v3198_v11 = vld [vmem:[%s3189_s30 + $0x30] sm:$0xf]  ;;  %v3201_v12 = vld [vmem:[%s3189_s30 + $0x34] sm:$0xf]  ;;  %v3205_v14 = vld [vmem:[%s3189_s30 + $0x38] sm:$0x1]  ;;  %s3919_s22 = scalar_lea.vmem %s4380_s1, %s3041_s19 }
  0x13   : > { %v876_v10 = vsel %vm874_vm0, %v824_v6, 0  ;;  %v485_v15 = vshrl.u32 %v3198_v11, 16  ;;  %v488_v16 = vshll.u32 %v3198_v11, 16  ;;  %v494_v17 = vshll.u32 %v3201_v12, 16  ;;  %v354_v20 = vld [vmem:[%s3189_s30 + $0x60] sm:$0xf] }
  0x14   : > { %3061 = vmatpush.bf16.msra.mxu1 %v876_v10  ;;  %3062 = vmatpush.bf16.msra.mxu2 %v876_v10  ;;  %v498_v18 = vshrl.u32 %v3201_v12, 16  ;;  %v504_v19 = vshll.u32 %v3205_v14, 16  ;;  %v355_v21 = vld [vmem:[%s3189_s30 + $0x64] sm:$0xf]  ;;  %v356_v27 = vld [vmem:[%s3189_s30 + $0x68] sm:$0x1] }
  0x15   : > { %3063 = vmatpush.bf16.msra.mxu3 %v876_v10  ;;  %885 = vmatpush.bf16.msra.mxu0 %v876_v10  ;;  %v487_v23 = vrot.slane %v485_v15, 4  ;;  %v490_v24 = vrot.slane %v488_v16, 5  ;;  %v496_v25 = vrot.slane %v494_v17, 5  ;;  %v581_v29 = vshrl.u32 %v354_v20, 16  ;;  %v366_v36 = vld [vmem:[%s3189_s30 + $0x90] sm:$0xf] }
  0x16   : > { %v500_v26 = vrot.slane %v498_v18, 4  ;;  %v506_v28 = vrot.slane %v504_v19, 5  ;;  %v584_v30 = vshll.u32 %v354_v20, 16  ;;  %v590_v31 = vshll.u32 %v355_v21, 16  ;;  %v367_v37 = vld [vmem:[%s3189_s30 + $0x94] sm:$0xf] }
  0x17   : > { %v491_v32 = vor.u32 %v490_v24, %v487_v23  ;;  %v594_v34 = vshrl.u32 %v355_v21, 16  ;;  %v600_v35 = vshll.u32 %v356_v27, 16  ;;  %v583_v39 = vrot.slane %v581_v29, 4  ;;  %v368_v54 = vld [vmem:[%s3189_s30 + $0x98] sm:$0x1] }
  0x18   : > { %1425 = vmatpush.bf16.msrb.mxu2 %v1416_v7  ;;  %1105 = vmatpush.bf16.msrb.mxu1 %v1096_v9  ;;  %v501_v33 = vor.u32 %v500_v26, %v496_v25  ;;  %v586_v40 = vrot.slane %v584_v30, 5  ;;  %v592_v41 = vrot.slane %v590_v31, 5  ;;  %v677_v48 = vshrl.u32 %v366_v36, 16  ;;  %v3229_v0 = vld [vmem:[%s3189_s30] sm:$0xf] }
  0x19   : > { %1717 = vmatpush.bf16.msrb.mxu0 %v1708_v13  ;;  %v492_v43 = vrot.slane %v491_v32, 4  ;;  %v596_v45 = vrot.slane %v594_v34, 4  ;;  %v602_v46 = vrot.slane %v600_v35, 5  ;;  %v680_v49 = vshll.u32 %v366_v36, 16  ;;  %v3236_v4 = vld [vmem:[%s3189_s30 + $0x4] sm:$0xf] }
  0x1a   : > { %v502_v44 = vrot.slane %v501_v33, 4  ;;  %v587_v47 = vor.u32 %v586_v40, %v583_v39  ;;  %v686_v50 = vshll.u32 %v367_v37, 16  ;;  %v690_v55 = vshrl.u32 %v367_v37, 16  ;;  %v3241_v10 = vld [vmem:[%s3189_s30 + $0x8] sm:$0x1] }
  0x1b   : > { %v497_v51 = vsel %vm3219_vm4, %v492_v43, %v496_v25  ;;  %v597_v53 = vor.u32 %v596_v45, %v592_v41  ;;  %v679_v59 = vrot.slane %v677_v48, 4  ;;  %v682_v61 = vrot.slane %v680_v49, 5  ;;  %v3253_v26 = vld [vmem:[%s3189_s30 + $0x3c] sm:$0xf]  ;;  %v3260_v31 = vld [vmem:[%s3189_s30 + $0x40] sm:$0xf] }
  0x1c   : > { %v507_v52 = vsel %vm3219_vm4, %v502_v44, %v506_v28  ;;  %v781_v56 = vunpack.c.l.b16 %v497_v51  ;;  %v588_v58 = vrot.slane %v587_v47, 4  ;;  %v688_v62 = vrot.slane %v686_v50, 5  ;;  %v3265_v35 = vld [vmem:[%s3189_s30 + $0x44] sm:$0x1]  ;;  %v3279_v50 = vld [vmem:[%s3189_s30 + $0x70] sm:$0xf] }
  0x1d   : > { %v782_v57 = vunpack.c.l.b16 %v507_v52  ;;  %v598_v60 = vrot.slane %v597_v53, 4  ;;  %v692_v63 = vrot.slane %v690_v55, 4  ;;  %v696_v3 = vshll.u32 %v368_v54, 16  ;;  %v3286_v54 = vld [vmem:[%s3189_s30 + $0x74] sm:$0x1] }
  0x1e   : > { %v593_v2 = vsel %vm3219_vm4, %v588_v58, %v592_v41  ;;  %v1548_v5 = vrot.slane %v1547_v42, 2  ;;  %v683_v8 = vor.u32 %v682_v61, %v679_v59  ;;  %v389_v16 = vshrl.u32 %v3229_v0, 16  ;;  %v3270_v41 = vld [vmem:[%s3189_s30 + $0x6c] sm:$0xf] }
  0x1f   : > { %v3231_v1 = vpack.c.b16 %v782_v57, %v781_v56  ;;  %v603_v6 = vsel %vm3219_vm4, %v598_v60, %v602_v46  ;;  %v789_v7 = vunpack.c.l.b16 %v593_v2  ;;  %v693_v9 = vor.u32 %v692_v63, %v688_v62 }
  0x20   : > { %v790_v13 = vunpack.c.l.b16 %v603_v6  ;;  %v698_v15 = vrot.slane %v696_v3, 5  ;;  %v392_v17 = vshll.u32 %v3229_v0, 16  ;;  %v684_v18 = vrot.slane %v683_v8, 4 }
  0x21   : > { %2808 = vmatmul.msk.bf16.vlgmr.msra.gmra.mxu1 %vm825_vm3, %v3231_v1  ;;  %v694_v19 = vrot.slane %v693_v9, 4  ;;  %v398_v20 = vshll.u32 %v3236_v4, 16  ;;  %v402_v21 = vshrl.u32 %v3236_v4, 16  ;;  %v391_v23 = vrot.slane %v389_v16, 4 }
  0x22   : > { %v3249_v22 = vpack.c.b16 %v790_v13, %v789_v7  ;;  %v394_v24 = vrot.slane %v392_v17, 5  ;;  %v408_v25 = vshll.u32 %v3241_v10, 16  ;;  %v689_v27 = vsel %vm3219_vm4, %v684_v18, %v688_v62  ;;  %v369_v7 = vld [vmem:[%s3189_s30 + $0x9c] sm:$0xf] }
  0x23   : > { %v699_v28 = vsel %vm3219_vm4, %v694_v19, %v698_v15  ;;  %v400_v29 = vrot.slane %v398_v20, 5  ;;  %v404_v30 = vrot.slane %v402_v21, 4  ;;  %v797_v32 = vunpack.c.l.b16 %v689_v27  ;;  %v370_v15 = vld [vmem:[%s3189_s30 + $0xa0] sm:$0xf] }
  0x24   : > { %4426 = vst [vmem:[#allocation2_spill] sm:$0xff] %v3249_v22  ;;  %2812 = vmatmul.msk.bf16.vlgmr.msra.gmra.mxu2 %vm825_vm3, %v3249_v22  ;;  %v798_v33 = vunpack.c.l.b16 %v699_v28  ;;  %v395_v34 = vor.u32 %v394_v24, %v391_v23  ;;  %v410_v37 = vrot.slane %v408_v25, 5  ;;  %v1553_v39 = vsel %vm874_vm0, %v1548_v5, 0  ;;  %v371_v23 = vld [vmem:[%s3189_s30 + $0xa4] sm:$0x1] }
  0x25   : > { %v405_v36 = vor.u32 %v404_v30, %v400_v29  ;;  %v509_v40 = vshrl.u32 %v3253_v26, 16  ;;  %1562 = vmatpush.bf16.msrb.mxu3 %v1553_v39  ;;  %v512_v44 = vshll.u32 %v3253_v26, 16  ;;  %v518_v45 = vshll.u32 %v3260_v31, 16 }
  0x26   : > { %v3272_v42 = vpack.c.b16 %v798_v33, %v797_v32  ;;  %v396_v43 = vrot.slane %v395_v34, 4  ;;  %v522_v48 = vshrl.u32 %v3260_v31, 16  ;;  %v528_v49 = vshll.u32 %v3265_v35, 16 }
  0x27   : > { %v406_v46 = vrot.slane %v405_v36, 4  ;;  %v511_v47 = vrot.slane %v509_v40, 4  ;;  %v514_v52 = vrot.slane %v512_v44, 5  ;;  %v520_v53 = vrot.slane %v518_v45, 5  ;;  %v3304_v44 = vld [vmem:[%s3189_s30 + $0xc] sm:$0xf] }
  0x28   : > { %4427 = vst [vmem:[#allocation3_spill] sm:$0xff] %v3272_v42  ;;  %2816 = vmatmul.msk.bf16.vlgmr.msra.gmra.mxu3 %vm825_vm3, %v3272_v42  ;;  %v401_v51 = vsel %vm3219_vm4, %v396_v43, %v400_v29  ;;  %v605_v55 = vshrl.u32 %v3270_v41, 16  ;;  %v524_v58 = vrot.slane %v522_v48, 4  ;;  %v530_v59 = vrot.slane %v528_v49, 5  ;;  %v3311_v48 = vld [vmem:[%s3189_s30 + $0x10] sm:$0xf] }
  0x29   : > { %v411_v56 = vsel %vm3219_vm4, %v406_v46, %v410_v37  ;;  %v773_v57 = vunpack.c.l.b16 %v401_v51  ;;  %v515_v61 = vor.u32 %v514_v52, %v511_v47  ;;  %v608_v63 = vshll.u32 %v3270_v41, 16  ;;  %v3314_v49 = vld [vmem:[%s3189_s30 + $0x14] sm:$0x1] }
  0x2a   : > { %v774_v60 = vunpack.c.l.b16 %v411_v56  ;;  %v607_v62 = vrot.slane %v605_v55, 4  ;;  %v525_v2 = vor.u32 %v524_v58, %v520_v53  ;;  %v614_v3 = vshll.u32 %v3279_v50, 16 }
  0x2b   : > { %v618_v5 = vshrl.u32 %v3279_v50, 16  ;;  %v624_v6 = vshll.u32 %v3286_v54, 16  ;;  %v516_v9 = vrot.slane %v515_v61, 4  ;;  %v610_v13 = vrot.slane %v608_v63, 5 }
  0x2c   : > { %v805_v8 = vpack.c.b16 %v774_v60, %v773_v57  ;;  %v526_v16 = vrot.slane %v525_v2, 4  ;;  %v616_v17 = vrot.slane %v614_v3, 5  ;;  %v701_v24 = vshrl.u32 %v369_v7, 16  ;;  %v3326_v2 = vld [vmem:[%s3189_s30 + $0x48] sm:$0xf] }
  0x2d   : > { %v620_v18 = vrot.slane %v618_v5, 4  ;;  %v626_v19 = vrot.slane %v624_v6, 5  ;;  %v521_v20 = vsel %vm3219_vm4, %v516_v9, %v520_v53  ;;  %v611_v21 = vor.u32 %v610_v13, %v607_v62 }
  0x2e   : > { %2804 = vmatmul.msk.bf16.vlgmr.msra.gmra.mxu0 %vm825_vm3, %v805_v8  ;;  %v704_v25 = vshll.u32 %v369_v7, 16  ;;  %v531_v27 = vsel %vm3219_vm4, %v526_v16, %v530_v59  ;;  %v783_v28 = vunpack.c.l.b16 %v521_v20  ;;  %v710_v30 = vshll.u32 %v370_v15, 16  ;;  %v3333_v8 = vld [vmem:[%s3189_s30 + $0x4c] sm:$0xf] }
  0x2f   : > { %v621_v29 = vor.u32 %v620_v18, %v616_v17  ;;  %v784_v32 = vunpack.c.l.b16 %v531_v27  ;;  %v612_v33 = vrot.slane %v611_v21, 4  ;;  %v703_v34 = vrot.slane %v701_v24, 4 }
  0x30   : > { %v706_v36 = vrot.slane %v704_v25, 5  ;;  %v712_v39 = vrot.slane %v710_v30, 5  ;;  %v714_v40 = vshrl.u32 %v370_v15, 16  ;;  %v720_v43 = vshll.u32 %v371_v23, 16 }
  0x31   : > { %v622_v37 = vrot.slane %v621_v29, 4  ;;  %v3306_v45 = vpack.c.b16 %v784_v32, %v783_v28  ;;  %v617_v46 = vsel %vm3219_vm4, %v612_v33, %v616_v17  ;;  %v413_v58 = vshrl.u32 %v3304_v44, 16  ;;  %v3347_v28 = vld [vmem:[%s3189_s30 + $0x78] sm:$0xf] }
  0x32   : > { %v707_v47 = vor.u32 %v706_v36, %v703_v34  ;;  %v791_v52 = vunpack.c.l.b16 %v617_v46  ;;  %v716_v53 = vrot.slane %v714_v40, 4  ;;  %v722_v55 = vrot.slane %v720_v43, 5 }
  0x33   : > { %v627_v51 = vsel %vm3219_vm4, %v622_v37, %v626_v19  ;;  %2809 = vmatmul.msk.bf16.gmra.mxu1 %vm825_vm3, %v3306_v45  ;;  %v416_v59 = vshll.u32 %v3304_v44, 16  ;;  %v422_v61 = vshll.u32 %v3311_v48, 16  ;;  %v426_v62 = vshrl.u32 %v3311_v48, 16  ;;  %v3338_v19 = vld [vmem:[%s3189_s30 + $0x50] sm:$0x1] }
  0x34   : > { %v792_v56 = vunpack.c.l.b16 %v627_v51  ;;  %v708_v57 = vrot.slane %v707_v47, 4  ;;  %v717_v60 = vor.u32 %v716_v53, %v712_v39  ;;  %v432_v63 = vshll.u32 %v3314_v49, 16  ;;  %v3355_v47 = vld [vmem:[%s3189_s30 + $0x7c] sm:$0xf]  ;;  %v3358_v51 = vld [vmem:[%s3189_s30 + $0x80] sm:$0x1] }
  0x35   : > { %v415_v6 = vrot.slane %v413_v58, 4  ;;  %v418_v7 = vrot.slane %v416_v59, 5  ;;  %v424_v15 = vrot.slane %v422_v61, 5  ;;  %v428_v16 = vrot.slane %v426_v62, 4 }
  0x36   : > { %v3328_v3 = vpack.c.b16 %v792_v56, %v791_v52  ;;  %v713_v5 = vsel %vm3219_vm4, %v708_v57, %v712_v39  ;;  %v718_v9 = vrot.slane %v717_v60, 4  ;;  %v434_v18 = vrot.slane %v432_v63, 5 }
  0x37   : > { %v799_v13 = vunpack.c.l.b16 %v713_v5  ;;  %v419_v17 = vor.u32 %v418_v7, %v415_v6  ;;  %v533_v20 = vshrl.u32 %v3326_v2, 16  ;;  %v536_v21 = vshll.u32 %v3326_v2, 16  ;;  %v3370_v7 = vld [vmem:[%s3189_s30 + $0xa8] sm:$0xf] }
  0x38   : > { %2813 = vmatmul.msk.bf16.gmra.mxu2 %vm825_vm3, %v3328_v3  ;;  %v723_v23 = vsel %vm3219_vm4, %v718_v9, %v722_v55  ;;  %v429_v24 = vor.u32 %v428_v16, %v424_v15  ;;  %v542_v25 = vshll.u32 %v3333_v8, 16  ;;  %v546_v27 = vshrl.u32 %v3333_v8, 16  ;;  %4429 = vst [vmem:[#allocation5_spill] sm:$0xff] %v3370_v7  ;;  %v3377_v16 = vld [vmem:[%s3189_s30 + $0xac] sm:$0xf] }
  0x39   : > { %v800_v29 = vunpack.c.l.b16 %v723_v23  ;;  %v420_v30 = vrot.slane %v419_v17, 4  ;;  %v535_v32 = vrot.slane %v533_v20, 4  ;;  %v538_v33 = vrot.slane %v536_v21, 5  ;;  %4430 = vst [vmem:[#allocation6_spill] sm:$0xff] %v3377_v16  ;;  %v3382_v23 = vld [vmem:[%s3189_s30 + $0xb0] sm:$0x1] }
  0x3a   : > { %v430_v34 = vrot.slane %v429_v24, 4  ;;  %v544_v36 = vrot.slane %v542_v25, 5  ;;  %v548_v37 = vrot.slane %v546_v27, 4  ;;  %v552_v39 = vshll.u32 %v3338_v19, 16  ;;  %4431 = vst [vmem:[#allocation7_spill] sm:$0xff] %v3382_v23 }
  0x3b   : > { %v3350_v40 = vpack.c.b16 %v800_v29, %v799_v13  ;;  %v425_v43 = vsel %vm3219_vm4, %v420_v30, %v424_v15  ;;  %v539_v46 = vor.u32 %v538_v33, %v535_v32  ;;  %v629_v52 = vshrl.u32 %v3347_v28, 16 }
  0x3c   : > { %v435_v53 = vsel %vm3219_vm4, %v430_v34, %v434_v18  ;;  %v775_v55 = vunpack.c.l.b16 %v425_v43  ;;  %v549_v56 = vor.u32 %v548_v37, %v544_v36  ;;  %v554_v57 = vrot.slane %v552_v39, 5 }
  0x3d   : > { %4428 = vst [vmem:[#allocation4_spill] sm:$0xff] %v3350_v40  ;;  %2817 = vmatmul.msk.bf16.gmra.mxu3 %vm825_vm3, %v3350_v40  ;;  %v776_v58 = vunpack.c.l.b16 %v435_v53  ;;  %v540_v59 = vrot.slane %v539_v46, 4  ;;  %v631_v60 = vrot.slane %v629_v52, 4  ;;  %v632_v61 = vshll.u32 %v3347_v28, 16 }
  0x3e   : > { %v550_v62 = vrot.slane %v549_v56, 4  ;;  %v638_v63 = vshll.u32 %v3355_v47, 16  ;;  %v642_v5 = vshrl.u32 %v3355_v47, 16  ;;  %v648_v6 = vshll.u32 %v3358_v51, 16 }
  0x3f   : > { %v3372_v9 = vpack.c.b16 %v776_v58, %v775_v55  ;;  %v545_v13 = vsel %vm3219_vm4, %v540_v59, %v544_v36  ;;  %v634_v15 = vrot.slane %v632_v61, 5  ;;  %v725_v29 = vshrl.u32 %v3370_v7, 16  ;;  %v3391_v36 = vld [vmem:[%s3189_s30 + $0x18] sm:$0xf] }
  0x40   : > { %v555_v17 = vsel %vm3219_vm4, %v550_v62, %v554_v57  ;;  %v785_v18 = vunpack.c.l.b16 %v545_v13  ;;  %v640_v20 = vrot.slane %v638_v63, 5  ;;  %v644_v21 = vrot.slane %v642_v5, 4  ;;  %v3397_v57 = vld [vmem:[%s3189_s30 + $0x1c] sm:$0xf]  ;;  %v3410_v13 = vld [vmem:[%s3189_s30 + $0x54] sm:$0xf] }
  0x41   : > { %2805 = vmatmul.msk.bf16.gmra.mxu0 %vm825_vm3, %v3372_v9  ;;  %v786_v24 = vunpack.c.l.b16 %v555_v17  ;;  %v635_v25 = vor.u32 %v634_v15, %v631_v60  ;;  %v650_v27 = vrot.slane %v648_v6, 5  ;;  %v728_v32 = vshll.u32 %v3370_v7, 16  ;;  %v3404_v60 = vld [vmem:[%s3189_s30 + $0x20] sm:$0x1] }
  0x42   : > { %v645_v30 = vor.u32 %v644_v21, %v640_v20  ;;  %v734_v33 = vshll.u32 %v3377_v16, 16  ;;  %v738_v34 = vshrl.u32 %v3377_v16, 16  ;;  %v727_v43 = vrot.slane %v725_v29, 4  ;;  %v3490_v16 = vld [vmem:[%s3189_s30 + $0x2c] sm:$0x1] }
  0x43   : > { %v3393_v37 = vpack.c.b16 %v786_v24, %v785_v18  ;;  %v636_v39 = vrot.slane %v635_v25, 4  ;;  %v744_v46 = vshll.u32 %v3382_v23, 16  ;;  %v730_v53 = vrot.slane %v728_v32, 5 }
  0x44   : > { %v646_v52 = vrot.slane %v645_v30, 4  ;;  %v736_v55 = vrot.slane %v734_v33, 5  ;;  %v740_v56 = vrot.slane %v738_v34, 4  ;;  %v437_v61 = vshrl.u32 %v3391_v36, 16  ;;  %v3419_v33 = vld [vmem:[%s3189_s30 + $0x58] sm:$0xf] }
  0x45   : > { %4432 = vst [vmem:[#allocation8_spill] sm:$0xff] %v3393_v37  ;;  %2810 = vmatmul.msk.bf16.gmra.mxu1 %vm825_vm3, %v3393_v37  ;;  %v641_v58 = vsel %vm3219_vm4, %v636_v39, %v640_v20  ;;  %v746_v59 = vrot.slane %v744_v46, 5  ;;  %v731_v5 = vor.u32 %v730_v53, %v727_v43  ;;  %v440_v18 = vshll.u32 %v3391_v36, 16  ;;  %v3427_v53 = vld [vmem:[%s3189_s30 + $0x5c] sm:$0x1] }
  0x46   : > { %v651_v62 = vsel %vm3219_vm4, %v646_v52, %v650_v27  ;;  %v793_v63 = vunpack.c.l.b16 %v641_v58  ;;  %v741_v6 = vor.u32 %v740_v56, %v736_v55  ;;  %v439_v17 = vrot.slane %v437_v61, 4  ;;  %v3430_v56 = vld [vmem:[%s3189_s30 + $0x84] sm:$0xf] }
  0x47   : > { %v794_v15 = vunpack.c.l.b16 %v651_v62  ;;  %v446_v20 = vshll.u32 %v3397_v57, 16  ;;  %v732_v21 = vrot.slane %v731_v5, 4  ;;  %v450_v25 = vshrl.u32 %v3397_v57, 16  ;;  %4433 = vst [vmem:[#allocation9_spill] sm:$0xff] %v3430_v56 }
  0x48   : > { %v742_v24 = vrot.slane %v741_v6, 4  ;;  %v456_v27 = vshll.u32 %v3404_v60, 16  ;;  %v442_v30 = vrot.slane %v440_v18, 5  ;;  %v557_v34 = vshrl.u32 %v3410_v13, 16 }
  0x49   : > { %v3416_v29 = vpack.c.b16 %v794_v15, %v793_v63  ;;  %v448_v32 = vrot.slane %v446_v20, 5  ;;  %v737_v39 = vsel %vm3219_vm4, %v732_v21, %v736_v55  ;;  %v452_v46 = vrot.slane %v450_v25, 4 }
  0x4a   : > { %v747_v43 = vsel %vm3219_vm4, %v742_v24, %v746_v59  ;;  %v458_v52 = vrot.slane %v456_v27, 5  ;;  %v801_v58 = vunpack.c.l.b16 %v737_v39  ;;  %v443_v62 = vor.u32 %v442_v30, %v439_v17  ;;  %v3442_v30 = vld [vmem:[%s3189_s30 + $0x88] sm:$0xf] }
  0x4b   : > { %2814 = vmatmul.msk.bf16.gmra.mxu2 %vm825_vm3, %v3416_v29  ;;  %v802_v61 = vunpack.c.l.b16 %v747_v43  ;;  %v559_v63 = vrot.slane %v557_v34, 4  ;;  %v453_v5 = vor.u32 %v452_v46, %v448_v32  ;;  %v560_v55 = vshll.u32 %v3410_v13, 16  ;;  %v3449_v43 = vld [vmem:[%s3189_s30 + $0x8c] sm:$0x1] }
  0x4c   : > { %v566_v59 = vshll.u32 %v3419_v33, 16  ;;  %v570_v6 = vshrl.u32 %v3419_v33, 16  ;;  %v444_v18 = vrot.slane %v443_v62, 4  ;;  %v576_v20 = vshll.u32 %v3427_v53, 16 }
  0x4d   : > { %v3437_v15 = vpack.c.b16 %v802_v61, %v801_v58  ;;  %v653_v21 = vshrl.u32 %v3430_v56, 16  ;;  %v454_v24 = vrot.slane %v453_v5, 4  ;;  %v562_v25 = vrot.slane %v560_v55, 5 }
  0x4e   : > { %v568_v27 = vrot.slane %v566_v59, 5  ;;  %v572_v17 = vrot.slane %v570_v6, 4  ;;  %v449_v34 = vsel %vm3219_vm4, %v444_v18, %v448_v32  ;;  %v578_v39 = vrot.slane %v576_v20, 5  ;;  %v3457_v18 = vld [vmem:[%s3189_s30 + $0xb4] sm:$0xf] }
  0x4f   : > { %4434 = vst [vmem:[#allocation10_spill] sm:$0xff] %v3437_v15  ;;  %2818 = vmatmul.msk.bf16.gmra.mxu3 %vm825_vm3, %v3437_v15  ;;  %v655_v46 = vrot.slane %v653_v21, 4  ;;  %v656_v58 = vshll.u32 %v3430_v56, 16  ;;  %v459_v61 = vsel %vm3219_vm4, %v454_v24, %v458_v52  ;;  %v777_v62 = vunpack.c.l.b16 %v449_v34 }
  0x50   : > { %v563_v5 = vor.u32 %v562_v25, %v559_v63  ;;  %v573_v55 = vor.u32 %v572_v17, %v568_v27  ;;  %v778_v59 = vunpack.c.l.b16 %v459_v61  ;;  %v662_v15 = vshll.u32 %v3442_v30, 16  ;;  %4435 = vst [vmem:[#allocation11_spill] sm:$0xff] %v3457_v18  ;;  %v3463_v63 = vld [vmem:[%s3189_s30 + $0xb8] sm:$0xf]  ;;  %v3470_v61 = vld [vmem:[%s3189_s30 + $0xbc] sm:$0x1] }
  0x51   : > { %v658_v6 = vrot.slane %v656_v58, 5  ;;  %v666_v32 = vshrl.u32 %v3442_v30, 16  ;;  %v672_v7 = vshll.u32 %v3449_v43, 16  ;;  %4436 = vst [vmem:[#allocation12_spill] sm:$0xff] %v3463_v63 }
  0x52   : > { %v564_v20 = vrot.slane %v563_v5, 4  ;;  %v574_v21 = vrot.slane %v573_v55, 4  ;;  %v3460_v23 = vpack.c.b16 %v778_v59, %v777_v62  ;;  %v664_v24 = vrot.slane %v662_v15, 5  ;;  %4437 = vst [vmem:[#allocation13_spill] sm:$0xff] %v3470_v61 }
  0x53   : > { %v659_v52 = vor.u32 %v658_v6, %v655_v46  ;;  %v668_v34 = vrot.slane %v666_v32, 4  ;;  %v674_v58 = vrot.slane %v672_v7, 5  ;;  %v749_v5 = vshrl.u32 %v3457_v18, 16 }
  0x54   : > { %v569_v25 = vsel %vm3219_vm4, %v564_v20, %v568_v27  ;;  %v579_v17 = vsel %vm3219_vm4, %v574_v21, %v578_v39  ;;  %2806 = vmatmul.msk.bf16.gmra.mxu0 %vm825_vm3, %v3460_v23  ;;  %v752_v27 = vshll.u32 %v3457_v18, 16  ;;  %v758_v6 = vshll.u32 %v3463_v63, 16  ;;  %v3479_v39 = vld [vmem:[%s3189_s30 + $0x24] sm:$0xf] }
  0x55   : > { %v787_v15 = vunpack.c.l.b16 %v569_v25  ;;  %v788_v46 = vunpack.c.l.b16 %v579_v17  ;;  %v660_v62 = vrot.slane %v659_v52, 4  ;;  %v669_v55 = vor.u32 %v668_v34, %v664_v24  ;;  %v3487_v52 = vld [vmem:[%s3189_s30 + $0x28] sm:$0xf] }
  0x56   : > { %v751_v59 = vrot.slane %v749_v5, 4  ;;  %v762_v7 = vshrl.u32 %v3463_v63, 16  ;;  %v768_v25 = vshll.u32 %v3470_v61, 16  ;;  %v754_v17 = vrot.slane %v752_v27, 5 }
  0x57   : > { %v3481_v32 = vpack.c.b16 %v788_v46, %v787_v15  ;;  %v665_v20 = vsel %vm3219_vm4, %v660_v62, %v664_v24  ;;  %v670_v21 = vrot.slane %v669_v55, 4  ;;  %v760_v5 = vrot.slane %v758_v6, 5 }
  0x58   : > { %v795_v34 = vunpack.c.l.b16 %v665_v20  ;;  %v764_v18 = vrot.slane %v762_v7, 4  ;;  %v1211_v63 = vrot.slane %v3241_v10, 5  ;;  %v770_v24 = vrot.slane %v768_v25, 5 }
  0x59   : > { %4438 = vst [vmem:[#allocation14_spill] sm:$0xff] %v3481_v32  ;;  %2811 = vmatmul.msk.bf16.gmra.mxu1 %vm825_vm3, %v3481_v32  ;;  %v675_v15 = vsel %vm3219_vm4, %v670_v21, %v674_v58  ;;  %v461_v46 = vshrl.u32 %v3479_v39, 16  ;;  %v755_v55 = vor.u32 %v754_v17, %v751_v59  ;;  %v464_v27 = vshll.u32 %v3479_v39, 16  ;;  %v1974_v21 = vld [vmem:[%s4381_s2 + $0xc] sm:$0x3] }
  0x5a   : > { %v796_v62 = vunpack.c.l.b16 %v675_v15  ;;  %v765_v61 = vor.u32 %v764_v18, %v760_v5  ;;  %v470_v7 = vshll.u32 %v3487_v52, 16  ;;  %v474_v20 = vshrl.u32 %v3487_v52, 16  ;;  %v2131_v17 = vld [vmem:[%s4381_s2 + $0xc] sm:$0xc] }
  0x5b   : > { %v463_v6 = vrot.slane %v461_v46, 4  ;;  %v480_v10 = vshll.u32 %v3490_v16, 16  ;;  %v756_v42 = vrot.slane %v755_v55, 4  ;;  %v466_v58 = vrot.slane %v464_v27, 5  ;;  %v1839_v46 = vld [vmem:[%s4381_s2 + $0x8] sm:$0xc] }
  0x5c   : > { %v3502_v40 = vpack.c.b16 %v796_v62, %v795_v34  ;;  %v766_v56 = vrot.slane %v765_v61, 4  ;;  %v472_v59 = vrot.slane %v470_v7, 5  ;;  %v476_v18 = vrot.slane %v474_v20, 4  ;;  %v2274_v62 = vld [vmem:[%s4381_s2 + $0x10] sm:$0x3] }
  0x5d   : > { %v482_v25 = vrot.slane %v480_v10, 5  ;;  %v761_v34 = vsel %vm3219_vm4, %v756_v42, %v760_v5  ;;  %v467_v15 = vor.u32 %v466_v58, %v463_v6  ;;  %v2900_v42 = vrot.slane %v3229_v0, 9 }
  0x5e   : > { %4439 = vst [vmem:[#allocation15_spill] sm:$0xff] %v3502_v40  ;;  %2815 = vmatmul.msk.bf16.gmra.mxu2 %vm825_vm3, %v3502_v40  ;;  %v771_v61 = vsel %vm3219_vm4, %v766_v56, %v770_v24  ;;  %v803_v55 = vunpack.c.l.b16 %v761_v34  ;;  %v477_v7 = vor.u32 %v476_v18, %v472_v59  ;;  %v1208_v5 = vrot.slane %v3236_v4, 5 }
  0x5f   : > { %v804_v27 = vunpack.c.l.b16 %v771_v61  ;;  %v468_v56 = vrot.slane %v467_v15, 4  ;;  %v1984_v24 = vsel %vm874_vm0, %v1974_v21, 0  ;;  %v2136_v6 = vunpack.c.l.b16 %v2131_v17 }
  0x60   : > { %v478_v58 = vrot.slane %v477_v7, 4  ;;  %1993 = vmatpush.bf16.msra.mxu2 %v1984_v24  ;;  %v1844_v40 = vunpack.c.l.b16 %v1839_v46  ;;  %v2282_v18 = vsel %vm874_vm0, %v2274_v62, 0  ;;  %v1209_v0 = vsel %vm3522_vm7, %v2900_v42, %v1208_v5  ;;  %v3043_v7 = vld [vmem:[%s3189_s30] sm:$0xff] }
  0x61   : > { %v3529_v10 = vpack.c.b16 %v804_v27, %v803_v55  ;;  %v473_v34 = vsel %vm3219_vm4, %v468_v56, %v472_v59  ;;  %v1210_v61 = vrot.slane %v1208_v5, 4  ;;  %v2137_v15 = vpack.c.b16 %v2136_v6, %v2136_v6  ;;  %2291 = vmatpush.bf16.msra.mxu0 %v2282_v18 }
  0x62   : > { %v483_v4 = vsel %vm3219_vm4, %v478_v58, %v482_v25  ;;  %v779_v21 = vunpack.c.l.b16 %v473_v34  ;;  %v1319_v17 = vunpack.c.l.b16 %v1209_v0  ;;  %v1845_v46 = vpack.c.b16 %v1844_v40, %v1844_v40  ;;  %v3044_v0 = vld [vmem:[%s3189_s30 + $0xc] sm:$0xff] }
  0x63   : > { %2819 = vmatmul.msk.bf16.gmra.mxu3 %vm825_vm3, %v3529_v10  ;;  %v780_v55 = vunpack.c.l.b16 %v483_v4  ;;  %v1212_v62 = vsel %vm3522_vm7, %v1210_v61, %v1211_v63  ;;  %v2138_v59 = vrot.slane %v2137_v15, 2  ;;  %v2901_v27 = vrot.slane %v3304_v44, 9  ;;  %v3569_v15 = vld [vmem:[%s3189_s30 + $0x18] sm:$0xff] }
  0x64   : > { %v1320_v42 = vunpack.c.l.b16 %v1212_v62  ;;  %v1846_v56 = vrot.slane %v1845_v46, 2  ;;  %v1215_v5 = vrot.slane %v3311_v48, 5  ;;  %v1218_v24 = vrot.slane %v3314_v49, 5  ;;  %v3589_v62 = vld [vmem:[%s3189_s30 + $0x24] sm:$0xff] }
  0x65   : > { %v3546_v6 = vpack.c.b16 %v780_v55, %v779_v21  ;;  %v2143_v25 = vsel %vm874_vm0, %v2138_v59, 0  ;;  %v1222_v61 = vrot.slane %v3397_v57, 5  ;;  %v2902_v4 = vrot.slane %v3391_v36, 9 }
  0x66   : > { %v1351_v40 = vpack.c.b16 %v1320_v42, %v1319_v17  ;;  %2152 = vmatpush.bf16.msra.mxu3 %v2143_v25  ;;  %v1851_v58 = vsel %vm874_vm0, %v1846_v56, 0  ;;  %v1216_v63 = vsel %vm3522_vm7, %v2901_v27, %v1215_v5  ;;  %v1217_v44 = vrot.slane %v1215_v5, 4  ;;  %v3611_v25 = vld [vmem:[%s3189_s30 + $0x30] sm:$0xff] }
  0x67   : > { %2807 = vmatmul.msk.bf16.gmra.mxu0 %vm825_vm3, %v3546_v6  ;;  %1860 = vmatpush.bf16.msra.mxu1 %v1851_v58  ;;  %v1321_v48 = vunpack.c.l.b16 %v1216_v63  ;;  %v1224_v21 = vrot.slane %v1222_v61, 4  ;;  %v1225_v17 = vrot.slane %v3404_v60, 5  ;;  %v1229_v60 = vrot.slane %v3487_v52, 5 }
  0x68   : > { %v1219_v49 = vsel %vm3522_vm7, %v1217_v44, %v1218_v24  ;;  %v2903_v59 = vrot.slane %v3479_v39, 9  ;;  %v1239_v63 = vrot.slane %v3205_v14, 5 }
  0x69   : > { %2884 = vmatmul.msk.bf16.vlgmr.msrb.gmra.mxu1 %vm825_vm3, %v3043_v7  ;;  %v1322_v18 = vunpack.c.l.b16 %v1219_v49  ;;  %v1226_v57 = vsel %vm3522_vm7, %v1224_v21, %v1225_v17  ;;  %v1231_v27 = vrot.slane %v1229_v60, 4  ;;  %v1232_v7 = vrot.slane %v3490_v16, 5  ;;  %v3639_v21 = vld [vmem:[%s3189_s30 + $0x3c] sm:$0xff] }
  0x6a   : > { %v1324_v55 = vunpack.c.l.b16 %v1226_v57  ;;  %v1230_v42 = vsel %vm3522_vm7, %v2903_v59, %v1229_v60  ;;  %v1236_v16 = vrot.slane %v3201_v12, 5  ;;  %v2905_v17 = vrot.slane %v3253_v26, 9 }
  0x6b   : > { %v3557_v34 = vpack.c.b16 %v1322_v18, %v1321_v48  ;;  %v1233_v52 = vsel %vm3522_vm7, %v1231_v27, %v1232_v7  ;;  %v1325_v56 = vunpack.c.l.b16 %v1230_v42  ;;  %v1246_v57 = vrot.slane %v3265_v35, 5 }
  0x6c   : > { %v1326_v5 = vunpack.c.l.b16 %v1233_v52  ;;  %v1238_v58 = vrot.slane %v1236_v16, 4 }
  0x6e   : > { %2916 = vmatmul.msk.bf16.vlgmr.msrb.gmra.mxu2 %vm825_vm3, %v1351_v40  ;;  %v3603_v39 = vpack.c.b16 %v1326_v5, %v1325_v56  ;;  %v2904_v40 = vrot.slane %v3198_v11, 9  ;;  %v1240_v12 = vsel %vm3522_vm7, %v1238_v58, %v1239_v63  ;;  %v1250_v56 = vrot.slane %v3333_v8, 5 }
  0x6f   : > { %v1328_v49 = vunpack.c.l.b16 %v1240_v12  ;;  %v1253_v63 = vrot.slane %v3338_v19, 5 }
  0x70   : > { %v1237_v44 = vsel %vm3522_vm7, %v2904_v40, %v1236_v16  ;;  %v3673_v16 = vld [vmem:[%s3189_s30 + $0x48] sm:$0xff]  ;;  %v2906_v40 = vrot.slane %v3326_v2, 9  ;;  %v1252_v58 = vrot.slane %v1250_v56, 4 }
  0x71   : > { %v1327_v48 = vunpack.c.l.b16 %v1237_v44  ;;  %4444 = vst [vmem:[#allocation18_spill] sm:$0xff] %v3673_v16 }
  0x72   : > { %v1251_v8 = vsel %vm3522_vm7, %v2906_v40, %v1250_v56  ;;  %v1260_v40 = vrot.slane %v3427_v53, 5 }
  0x73   : > { %2936 = vmatmul.msk.bf16.vlgmr.msrb.gmra.mxu3 %vm825_vm3, %v3044_v0  ;;  %v3631_v14 = vpack.c.b16 %v1328_v49, %v1327_v48  ;;  %v1254_v48 = vsel %vm3522_vm7, %v1252_v58, %v1253_v63  ;;  %v1331_v2 = vunpack.c.l.b16 %v1251_v8 }
  0x77   : > { %2952 = vmatmul.msk.bf16.vlgmr.msrb.gmra.mxu0 %vm825_vm3, %v3372_v9  ;;  %v1223_v9 = vsel %vm3522_vm7, %v2902_v4, %v1222_v61  ;;  %v1243_v61 = vrot.slane %v3260_v31, 5 }
  0x78   : > { %v1323_v46 = vunpack.c.l.b16 %v1223_v9 }
  0x79   : > { %2885 = vmatmul.msk.bf16.gmra.mxu1 %vm825_vm3, %v3044_v0  ;;  %v1245_v9 = vrot.slane %v1243_v61, 4  ;;  %v1244_v31 = vsel %vm3522_vm7, %v2905_v17, %v1243_v61  ;;  %v1332_v61 = vunpack.c.l.b16 %v1254_v48 }
  0x7a   : > { %v3583_v36 = vpack.c.b16 %v1324_v55, %v1323_v46  ;;  %v1329_v27 = vunpack.c.l.b16 %v1244_v31 }
  0x7b   : > { %v1247_v60 = vsel %vm3522_vm7, %v1245_v9, %v1246_v57  ;;  %v3697_v9 = vpack.c.b16 %v1332_v61, %v1331_v2  ;;  %v1257_v57 = vrot.slane %v3419_v33, 5 }
  0x7c   : > { %v1330_v35 = vunpack.c.l.b16 %v1247_v60 }
  0x7d   : > { %4447 = vst [vmem:[#allocation21_spill] sm:$0xff] %v3697_v9  ;;  %v1259_v56 = vrot.slane %v1257_v57, 4 }
  0x7e   : > { %2917 = vmatmul.msk.bf16.gmra.mxu2 %vm825_vm3, %v3557_v34  ;;  %v3663_v42 = vpack.c.b16 %v1330_v35, %v1329_v27  ;;  %v3707_v27 = vld [vmem:[%s3189_s30 + $0x54] sm:$0xff]  ;;  %v2907_v35 = vrot.slane %v3410_v13, 9 }
  0x7f   : > { %4448 = vst [vmem:[#allocation22_spill] sm:$0xff] %v3707_v27  ;;  %v1261_v8 = vsel %vm3522_vm7, %v1259_v56, %v1260_v40 }
  0x80   : > { %v1258_v33 = vsel %vm3522_vm7, %v2907_v35, %v1257_v57  ;;  %v1334_v53 = vunpack.c.l.b16 %v1261_v8  ;;  %v3092_v35 = vld [vmem:[%s3189_s30 + $0x64] sm:$0xf]  ;;  %v3093_v8 = vld [vmem:[%s3189_s30 + $0x68] sm:$0x1] }
  0x81   : > { %v1333_v48 = vunpack.c.l.b16 %v1258_v33  ;;  %v1264_v56 = vrot.slane %v3092_v35, 5 }
  0x83   : > { %2937 = vmatmul.msk.bf16.gmra.mxu3 %vm825_vm3, %v3569_v15  ;;  %v3729_v61 = vpack.c.b16 %v1334_v53, %v1333_v48 }
  0x85   : > { %4450 = vst [vmem:[#allocation24_spill] sm:$0xff] %v3729_v61 }
  0x87   : > { %2953 = vmatmul.msk.bf16.gmra.mxu0 %vm825_vm3, %v3460_v23 }
  0x89   : > { %2886 = vmatmul.msk.bf16.gmra.mxu1 %vm825_vm3, %v3569_v15 }
  0x8e   : > { %2918 = vmatmul.msk.bf16.gmra.mxu2 %vm825_vm3, %v3583_v36 }
  0x93   : > { %2938 = vmatmul.msk.bf16.gmra.mxu3 %vm825_vm3, %v3589_v62 }
  0x97   : > { %2954 = vmatmul.msk.bf16.gmra.mxu0 %vm825_vm3, %v3546_v6 }
  0x99   : > { %2887 = vmatmul.msk.bf16.gmra.mxu1 %vm825_vm3, %v3589_v62 }
  0x9e   : > { %v3606_v24 = vpop.f32.mrf.mxu1  ;;  %2919 = vmatmul.msk.bf16.gmra.mxu2 %vm825_vm3, %v3603_v39 }
  0xa3   : > { %2939 = vmatmul.msk.bf16.gmra.mxu3 %vm825_vm3, %v3611_v25 }
  0xa6   : > { %v3623_v0 = vpop.f32.mrf.mxu1 }
  0xa7   : > { %v3621_v18 = vpop.f32.mrf.mxu2  ;;  %2955 = vmatmul.msk.bf16.gmra.mxu0 %vm825_vm3, %v3231_v1 }
  0xa9   : > { %2888 = vmatmul.msk.bf16.gmra.mxu1 %vm825_vm3, %v3611_v25 }
  0xab   : > { %v3629_v11 = vpop.f32.mrf.mxu0  ;;  %v3634_v4 = vpop.f32.mrf.mxu3 }
  0xac   : > { %4442 = vst [vmem:[#allocation16_spill] sm:$0xff] %v3634_v4 }
  0xae   : > { %2920 = vmatmul.msk.bf16.gmra.mxu2 %vm825_vm3, %v3631_v14 }
  0xaf   : > { %v3643_v46 = vpop.f32.mrf.mxu2 }
  0xb0   : > { %v3645_v55 = vpop.f32.mrf.mxu1 }
  0xb3   : > { %2940 = vmatmul.msk.bf16.gmra.mxu3 %vm825_vm3, %v3639_v21  ;;  %v3653_v59 = vpop.f32.mrf.mxu0  ;;  %v3655_v26 = vpop.f32.mrf.mxu3 }
  0xb4   : > { %4443 = vst [vmem:[#allocation17_spill] sm:$0xff] %v3655_v26 }
  0xb7   : > { %2956 = vmatmul.msk.bf16.gmra.mxu0 %vm825_vm3, %v3306_v45 }
  0xb8   : > { %v3659_v7 = vpop.f32.mrf.mxu1 }
  0xb9   : > { %2889 = vmatmul.msk.bf16.gmra.mxu1 %vm825_vm3, %v3639_v21 }
  0xbb   : > { %v3665_v52 = vpop.f32.mrf.mxu2 }
  0xbe   : > { %v3668_v5 = vpop.f32.mrf.mxu0  ;;  %2921 = vmatmul.msk.bf16.gmra.mxu2 %vm825_vm3, %v3663_v42 }
  0xc0   : > { %v3677_v44 = vpop.f32.mrf.mxu3 }
  0xc1   : > { %4445 = vst [vmem:[#allocation19_spill] sm:$0xff] %v3677_v44 }
  0xc2   : > { %v3679_v12 = vpop.f32.mrf.mxu1 }
  0xc3   : > { %2941 = vmatmul.msk.bf16.gmra.mxu3 %vm825_vm3, %v3673_v16  ;;  %v3687_v49 = vpop.f32.mrf.mxu2 }
  0xc6   : > { %v3691_v19 = vpop.f32.mrf.mxu0 }
  0xc7   : > { %2957 = vmatmul.msk.bf16.gmra.mxu0 %vm825_vm3, %v3393_v37 }
  0xc8   : > { %v3693_v17 = vpop.f32.mrf.mxu3 }
  0xc9   : > { %4446 = vst [vmem:[#allocation20_spill] sm:$0xff] %v3693_v17  ;;  %2890 = vmatmul.msk.bf16.gmra.mxu1 %vm825_vm3, %v3673_v16  ;;  %v3742_v17 = vld [vmem:[%s3189_s30 + $0x60] sm:$0xff] }
  0xca   : > { %v3700_v31 = vpop.f32.mrf.mxu1  ;;  %4452 = vst [vmem:[#allocation26_spill] sm:$0xff] %v3742_v17 }
  0xce   : > { %2922 = vmatmul.msk.bf16.gmra.mxu2 %vm825_vm3, %v3697_v9  ;;  %v3704_v60 = vpop.f32.mrf.mxu2 }
  0xd1   : > { %v3711_v58 = vpop.f32.mrf.mxu0 }
  0xd2   : > { %v3713_v63 = vpop.f32.mrf.mxu3 }
  0xd3   : > { %4449 = vst [vmem:[#allocation23_spill] sm:$0xff] %v3713_v63  ;;  %2942 = vmatmul.msk.bf16.gmra.mxu3 %vm825_vm3, %v3707_v27  ;;  %v1267_v63 = vrot.slane %v3093_v8, 5 }
  0xd6   : > { %v3721_v13 = vpop.f32.mrf.mxu1  ;;  %v3723_v2 = vpop.f32.mrf.mxu2 }
  0xd7   : > { %2958 = vmatmul.msk.bf16.gmra.mxu0 %vm825_vm3, %v3481_v32  ;;  %v3094_v32 = vld [vmem:[%s3189_s30 + $0x60] sm:$0xf] }
  0xd8   : > { %v2908_v44 = vrot.slane %v3094_v32, 9 }
  0xd9   : > { %2891 = vmatmul.msk.bf16.gmra.mxu1 %vm825_vm3, %v3707_v27  ;;  %v3731_v57 = vpop.f32.mrf.mxu0  ;;  %v1266_v27 = vrot.slane %v1264_v56, 4 }
  0xda   : > { %v3734_v40 = vpop.f32.mrf.mxu3  ;;  %v1265_v53 = vsel %vm3522_vm7, %v2908_v44, %v1264_v56 }
  0xdb   : > { %4451 = vst [vmem:[#allocation25_spill] sm:$0xff] %v3734_v40  ;;  %v1268_v35 = vsel %vm3522_vm7, %v1266_v27, %v1267_v63  ;;  %v1335_v26 = vunpack.c.l.b16 %v1265_v53  ;;  %v1271_v27 = vrot.slane %v3279_v50, 5  ;;  %v3775_v53 = vld [vmem:[%s3189_s30 + $0x6c] sm:$0xff] }
  0xdc   : > { %v1336_v32 = vunpack.c.l.b16 %v1268_v35 }
  0xde   : > { %2923 = vmatmul.msk.bf16.gmra.mxu2 %vm825_vm3, %v3729_v61  ;;  %v3738_v33 = vpop.f32.mrf.mxu1  ;;  %v3764_v44 = vpack.c.b16 %v1336_v32, %v1335_v26  ;;  %v1273_v26 = vrot.slane %v1271_v27, 4 }
  0xe0   : > { %4454 = vst [vmem:[#allocation28_spill] sm:$0xff] %v3764_v44 }
  0xe1   : > { %v3745_v48 = vpop.f32.mrf.mxu2 }
  0xe3   : > { %2943 = vmatmul.msk.bf16.gmra.mxu3 %vm825_vm3, %v3742_v17 }
  0xe4   : > { %v3753_v40 = vpop.f32.mrf.mxu0 }
  0xe6   : > { %v3755_v8 = vpop.f32.mrf.mxu3  ;;  %v1107_v61 = vpop.f32.mrf.mxu1 }
  0xe7   : > { %4453 = vst [vmem:[#allocation27_spill] sm:$0xff] %v3755_v8  ;;  %v1108_v9 = vadd.f32 %v1107_v61, %v3629_v11  ;;  %2959 = vmatmul.msk.bf16.gmra.mxu0 %vm825_vm3, %v3249_v22  ;;  %v1274_v61 = vrot.slane %v3286_v54, 5  ;;  %v2909_v8 = vrot.slane %v3270_v41, 9 }
  0xe9   : > { %v3760_v37 = vpop.f32.mrf.mxu2  ;;  %2892 = vmatmul.msk.bf16.gmra.mxu1 %vm825_vm3, %v3742_v17  ;;  %v1272_v50 = vsel %vm3522_vm7, %v2909_v8, %v1271_v27 }
  0xea   : > { %v1337_v4 = vunpack.c.l.b16 %v1272_v50 }
  0xec   : > { %v3767_v63 = vpop.f32.mrf.mxu0 }
  0xee   : > { %v3769_v56 = vpop.f32.mrf.mxu3  ;;  %2924 = vmatmul.msk.bf16.gmra.mxu2 %vm825_vm3, %v3764_v44  ;;  %v1109_v11 = vpop.f32.mrf.mxu1 }
  0xef   : > { %4455 = vst [vmem:[#allocation29_spill] sm:$0xff] %v3769_v56  ;;  %v1110_v35 = vadd.f32 %v1109_v11, %v3653_v59  ;;  %v1275_v56 = vsel %vm3522_vm7, %v1273_v26, %v1274_v61  ;;  %v1278_v61 = vrot.slane %v3355_v47, 5 }
  0xf0   : > { %v1338_v16 = vunpack.c.l.b16 %v1275_v56  ;;  %v1281_v56 = vrot.slane %v3358_v51, 5 }
  0xf1   : > { %v1427_v32 = vpop.f32.mrf.mxu2 }
  0xf2   : > { %v1507_v22 = vadd.f32 %v1427_v32, %v1108_v9  ;;  %v3792_v11 = vpack.c.b16 %v1338_v16, %v1337_v4  ;;  %v3799_v32 = vld [vmem:[%s3189_s30 + $0x78] sm:$0xff] }
  0xf3   : > { %2944 = vmatmul.msk.bf16.gmra.mxu3 %vm825_vm3, %v3775_v53 }
  0xf4   : > { %v1719_v44 = vpop.f32.mrf.mxu0 }
  0xf6   : > { %v1564_v54 = vpop.f32.mrf.mxu3  ;;  %v1112_v17 = vpop.f32.mrf.mxu1 }
  0xf7   : > { %v1644_v59 = vadd.f32 %v1564_v54, %v1507_v22  ;;  %v1113_v41 = vadd.f32 %v1112_v17, %v3668_v5  ;;  %2960 = vmatmul.msk.bf16.gmra.mxu0 %vm825_vm3, %v3328_v3 }
  0xf9   : > { %v1429_v9 = vpop.f32.mrf.mxu2  ;;  %2893 = vmatmul.msk.bf16.gmra.mxu1 %vm825_vm3, %v3775_v53  ;;  %v3790_v8 = vadd.f32 %v1719_v44, %v1644_v59  ;;  %v2910_v44 = vrot.slane %v3347_v28, 9 }
  0xfa   : > { %v1508_v27 = vadd.f32 %v1429_v9, %v1110_v35  ;;  %v1280_v35 = vrot.slane %v1278_v61, 4 }
  0xfb   : > { %v1279_v51 = vsel %vm3522_vm7, %v2910_v44, %v1278_v61 }
  0xfc   : > { %v1721_v26 = vpop.f32.mrf.mxu0  ;;  %v1282_v54 = vsel %vm3522_vm7, %v1280_v35, %v1281_v56  ;;  %v1288_v35 = vrot.slane %v3449_v43, 5 }
  0xfe   : > { %v1566_v22 = vpop.f32.mrf.mxu3  ;;  %2925 = vmatmul.msk.bf16.gmra.mxu2 %vm825_vm3, %v3792_v11  ;;  %v1114_v5 = vpop.f32.mrf.mxu1 }
  0xff   : > { %v1645_v17 = vadd.f32 %v1566_v22, %v1508_v27  ;;  %v1115_v50 = vadd.f32 %v1114_v5, %v3691_v19  ;;  %v1339_v19 = vunpack.c.l.b16 %v1279_v51  ;;  %v1340_v22 = vunpack.c.l.b16 %v1282_v54  ;;  %v3825_v51 = vld [vmem:[%s3189_s30 + $0x84] sm:$0xff] }
 0x101   : > { %v1432_v4 = vpop.f32.mrf.mxu2  ;;  %v3803_v16 = vadd.f32 %v1721_v26, %v1645_v17  ;;  %v3818_v56 = vpack.c.b16 %v1340_v22, %v1339_v19  ;;  %v1285_v17 = vrot.slane %v3442_v30, 5 }
 0x102   : > { %v1509_v47 = vadd.f32 %v1432_v4, %v1113_v41 }
 0x103   : > { %2945 = vmatmul.msk.bf16.gmra.mxu3 %vm825_vm3, %v3799_v32 }
 0x104   : > { %v1724_v59 = vpop.f32.mrf.mxu0 }
 0x106   : > { %v1569_v9 = vpop.f32.mrf.mxu3  ;;  %v1117_v27 = vpop.f32.mrf.mxu1 }
 0x107   : > { %v1646_v28 = vadd.f32 %v1569_v9, %v1509_v47  ;;  %v1118_v26 = vadd.f32 %v1117_v27, %v3711_v58  ;;  %2961 = vmatmul.msk.bf16.gmra.mxu0 %vm825_vm3, %v3416_v29 }
 0x109   : > { %v1434_v41 = vpop.f32.mrf.mxu2  ;;  %2894 = vmatmul.msk.bf16.gmra.mxu1 %vm825_vm3, %v3799_v32  ;;  %v3816_v61 = vadd.f32 %v1724_v59, %v1646_v28  ;;  %v4456_v59 = vld [vmem:[#allocation9_spill] sm:$0xff] }
 0x10a   : > { %v1510_v5 = vadd.f32 %v1434_v41, %v1115_v50  ;;  %v2911_v9 = vrot.slane %v4456_v59, 9  ;;  %v1287_v50 = vrot.slane %v1285_v17, 4 }
 0x10c   : > { %v1726_v44 = vpop.f32.mrf.mxu0  ;;  %v1286_v43 = vsel %vm3522_vm7, %v2911_v9, %v1285_v17  ;;  %v1289_v22 = vsel %vm3522_vm7, %v1287_v50, %v1288_v35  ;;  %v3095_v9 = vld [vmem:[%s3189_s30 + $0x94] sm:$0xf] }
 0x10d   : > { %v1292_v50 = vrot.slane %v3095_v9, 5 }
 0x10e   : > { %v1571_v4 = vpop.f32.mrf.mxu3  ;;  %2926 = vmatmul.msk.bf16.gmra.mxu2 %vm825_vm3, %v3818_v56  ;;  %v1119_v58 = vpop.f32.mrf.mxu1 }
 0x10f   : > { %v1647_v47 = vadd.f32 %v1571_v4, %v1510_v5  ;;  %v1120_v54 = vadd.f32 %v1119_v58, %v3731_v57  ;;  %v1341_v5 = vunpack.c.l.b16 %v1286_v43  ;;  %v1342_v4 = vunpack.c.l.b16 %v1289_v22 }
 0x111   : > { %v1437_v27 = vpop.f32.mrf.mxu2  ;;  %v3829_v19 = vadd.f32 %v1726_v44, %v1647_v47  ;;  %v3844_v59 = vpack.c.b16 %v1342_v4, %v1341_v5 }
 0x112   : > { %v1511_v30 = vadd.f32 %v1437_v27, %v1118_v26  ;;  %v4458_v26 = vld [vmem:[#allocation15_spill] sm:$0xff] }
 0x113   : > { %4457 = vst [vmem:[#allocation9_spill] sm:$0xff] %v3829_v19  ;;  %2946 = vmatmul.msk.bf16.gmra.mxu3 %vm825_vm3, %v3825_v51 }
 0x114   : > { %v1729_v28 = vpop.f32.mrf.mxu0  ;;  %4460 = vst [vmem:[#allocation31_spill] sm:$0xff] %v3844_v59 }
 0x116   : > { %v1574_v57 = vpop.f32.mrf.mxu3  ;;  %v1122_v41 = vpop.f32.mrf.mxu1 }
 0x117   : > { %v1648_v58 = vadd.f32 %v1574_v57, %v1511_v30  ;;  %v1123_v44 = vadd.f32 %v1122_v41, %v3753_v40  ;;  %2962 = vmatmul.msk.bf16.gmra.mxu0 %vm825_vm3, %v4458_v26  ;;  %v3096_v30 = vld [vmem:[%s3189_s30 + $0x98] sm:$0x1]  ;;  %v3851_v41 = vld [vmem:[%s3189_s30 + $0x90] sm:$0xff] }
 0x118   : > { %v1295_v43 = vrot.slane %v3096_v30, 5  ;;  %4461 = vst [vmem:[#allocation32_spill] sm:$0xff] %v3851_v41 }
 0x119   : > { %v1439_v47 = vpop.f32.mrf.mxu2  ;;  %2895 = vmatmul.msk.bf16.gmra.mxu1 %vm825_vm3, %v3825_v51  ;;  %v3842_v17 = vadd.f32 %v1729_v28, %v1648_v58  ;;  %v3097_v28 = vld [vmem:[%s3189_s30 + $0x90] sm:$0xf] }
 0x11a   : > { %v1512_v35 = vadd.f32 %v1439_v47, %v1120_v54  ;;  %v2912_v58 = vrot.slane %v3097_v28, 9  ;;  %v1294_v54 = vrot.slane %v1292_v50, 4 }
 0x11b   : > { %4459 = vst [vmem:[#allocation30_spill] sm:$0xff] %v3842_v17 }
 0x11c   : > { %v1731_v27 = vpop.f32.mrf.mxu0  ;;  %v1293_v9 = vsel %vm3522_vm7, %v2912_v58, %v1292_v50  ;;  %v3098_v58 = vld [vmem:[%s3189_s30 + $0xa0] sm:$0xf] }
 0x11e   : > { %v1576_v40 = vpop.f32.mrf.mxu3  ;;  %2927 = vmatmul.msk.bf16.gmra.mxu2 %vm825_vm3, %v3844_v59  ;;  %v1124_v22 = vpop.f32.mrf.mxu1  ;;  %v3100_v59 = vld [vmem:[%s3189_s30 + $0x9c] sm:$0xf] }
 0x11f   : > { %v1649_v57 = vadd.f32 %v1576_v40, %v1512_v35  ;;  %v1125_v19 = vadd.f32 %v1124_v22, %v3767_v63  ;;  %v1296_v35 = vsel %vm3522_vm7, %v1294_v54, %v1295_v43  ;;  %v1343_v22 = vunpack.c.l.b16 %v1293_v9 }
 0x120   : > { %v1344_v28 = vunpack.c.l.b16 %v1296_v35  ;;  %v1299_v54 = vrot.slane %v3098_v58, 5  ;;  %v3099_v35 = vld [vmem:[%s3189_s30 + $0xa4] sm:$0x1] }
 0x121   : > { %v1442_v5 = vpop.f32.mrf.mxu2  ;;  %v3855_v4 = vadd.f32 %v1731_v27, %v1649_v57  ;;  %v4463_v27 = vld [vmem:[#allocation3_spill] sm:$0xff] }
 0x122   : > { %v1513_v47 = vadd.f32 %v1442_v5, %v1123_v44  ;;  %v3869_v43 = vpack.c.b16 %v1344_v28, %v1343_v22 }
 0x123   : > { %4462 = vst [vmem:[#allocation33_spill] sm:$0xff] %v3855_v4  ;;  %2947 = vmatmul.msk.bf16.gmra.mxu3 %vm825_vm3, %v3851_v41 }
 0x124   : > { %v1734_v30 = vpop.f32.mrf.mxu0  ;;  %4465 = vst [vmem:[#allocation35_spill] sm:$0xff] %v3869_v43 }
 0x126   : > { %v1579_v40 = vpop.f32.mrf.mxu3  ;;  %v1127_v63 = vpop.f32.mrf.mxu1 }
 0x127   : > { %v1650_v17 = vadd.f32 %v1579_v40, %v1513_v47  ;;  %2963 = vmatmul.msk.bf16.gmra.mxu0 %vm825_vm3, %v4463_v27  ;;  %v1302_v40 = vrot.slane %v3099_v35, 5  ;;  %v3876_v27 = vld [vmem:[%s3189_s30 + $0x9c] sm:$0xff] }
 0x128   : > { %4466 = vst [vmem:[#allocation36_spill] sm:$0xff] %v3876_v27 }
 0x129   : > { %v1444_v44 = vpop.f32.mrf.mxu2  ;;  %2896 = vmatmul.msk.bf16.gmra.mxu1 %vm825_vm3, %v3851_v41  ;;  %v3867_v50 = vadd.f32 %v1734_v30, %v1650_v17  ;;  %v2913_v41 = vrot.slane %v3100_v59, 9  ;;  %v1301_v17 = vrot.slane %v1299_v54, 4 }
 0x12a   : > { %v1514_v57 = vadd.f32 %v1444_v44, %v1125_v19  ;;  %v1128_v19 = vadd.f32 %v1127_v63, %v3606_v24  ;;  %v4468_v63 = vld [vmem:[#allocation4_spill] sm:$0xff] }
 0x12b   : > { %4464 = vst [vmem:[#allocation34_spill] sm:$0xff] %v3867_v50  ;;  %v1300_v44 = vsel %vm3522_vm7, %v2913_v41, %v1299_v54 }
 0x12c   : > { %v1736_v5 = vpop.f32.mrf.mxu0  ;;  %v1345_v59 = vunpack.c.l.b16 %v1300_v44 }
 0x12e   : > { %v1581_v9 = vpop.f32.mrf.mxu3  ;;  %2928 = vmatmul.msk.bf16.gmra.mxu2 %vm825_vm3, %v3869_v43  ;;  %v1129_v47 = vpop.f32.mrf.mxu1 }
 0x12f   : > { %v1651_v4 = vadd.f32 %v1581_v9, %v1514_v57  ;;  %v1303_v57 = vsel %vm3522_vm7, %v1301_v17, %v1302_v40  ;;  %v4471_v17 = vld [vmem:[#allocation6_spill] sm:$0xff] }
 0x130   : > { %v1346_v50 = vunpack.c.l.b16 %v1303_v57  ;;  %v4472_v57 = vld [vmem:[#allocation7_spill] sm:$0xff] }
 0x131   : > { %v1447_v30 = vpop.f32.mrf.mxu2  ;;  %v3880_v22 = vadd.f32 %v1736_v5, %v1651_v4  ;;  %v1130_v4 = vadd.f32 %v1129_v47, %v3623_v0  ;;  %v1309_v0 = vrot.slane %v4472_v57, 5 }
 0x132   : > { %v1515_v28 = vadd.f32 %v1447_v30, %v1128_v19  ;;  %v3895_v40 = vpack.c.b16 %v1346_v50, %v1345_v59  ;;  %v1306_v19 = vrot.slane %v4471_v17, 5 }
 0x133   : > { %4467 = vst [vmem:[#allocation37_spill] sm:$0xff] %v3880_v22  ;;  %2948 = vmatmul.msk.bf16.gmra.mxu3 %vm825_vm3, %v3876_v27  ;;  %v4474_v22 = vld [vmem:[#allocation5_spill] sm:$0xff] }
 0x134   : > { %v1739_v58 = vpop.f32.mrf.mxu0  ;;  %4470 = vst [vmem:[#allocation39_spill] sm:$0xff] %v3895_v40 }
 0x136   : > { %v1584_v9 = vpop.f32.mrf.mxu3  ;;  %v1132_v35 = vpop.f32.mrf.mxu1 }
 0x137   : > { %v1652_v24 = vadd.f32 %v1584_v9, %v1515_v28  ;;  %2964 = vmatmul.msk.bf16.gmra.mxu0 %vm825_vm3, %v4468_v63  ;;  %v3902_v9 = vld [vmem:[%s3189_s30 + $0xa8] sm:$0xff]  ;;  %v1133_v50 = vadd.f32 %v1132_v35, %v3645_v55 }
 0x138   : > { %4473 = vst [vmem:[#allocation6_spill] sm:$0xff] %v3902_v9 }
 0x139   : > { %v1449_v5 = vpop.f32.mrf.mxu2  ;;  %2897 = vmatmul.msk.bf16.gmra.mxu1 %vm825_vm3, %v3876_v27  ;;  %v3893_v41 = vadd.f32 %v1739_v58, %v1652_v24  ;;  %v2914_v58 = vrot.slane %v4474_v22, 9  ;;  %v1308_v24 = vrot.slane %v1306_v19, 4 }
 0x13a   : > { %v1516_v54 = vadd.f32 %v1449_v5, %v1130_v4 }
 0x13b   : > { %4469 = vst [vmem:[#allocation38_spill] sm:$0xff] %v3893_v41  ;;  %v1307_v17 = vsel %vm3522_vm7, %v2914_v58, %v1306_v19 }
 0x13c   : > { %v1741_v30 = vpop.f32.mrf.mxu0  ;;  %v1347_v41 = vunpack.c.l.b16 %v1307_v17 }
 0x13e   : > { %v1586_v44 = vpop.f32.mrf.mxu3  ;;  %2929 = vmatmul.msk.bf16.gmra.mxu2 %vm825_vm3, %v3895_v40  ;;  %v1134_v28 = vpop.f32.mrf.mxu1 }
 0x13f   : > { %v1653_v47 = vadd.f32 %v1586_v44, %v1516_v54  ;;  %v1310_v54 = vsel %vm3522_vm7, %v1308_v24, %v1309_v0  ;;  %v1135_v19 = vadd.f32 %v1134_v28, %v3659_v7 }
 0x140   : > { %v1348_v55 = vunpack.c.l.b16 %v1310_v54 }
 0x141   : > { %v1452_v59 = vpop.f32.mrf.mxu2  ;;  %v3906_v4 = vadd.f32 %v1741_v30, %v1653_v47  ;;  %v4476_v30 = vld [vmem:[#allocation10_spill] sm:$0xff] }
 0x142   : > { %v1517_v5 = vadd.f32 %v1452_v59, %v1133_v50  ;;  %v3927_v47 = vld [vmem:[%s3919_s22] sm:$0xf]  ;;  %v3931_v50 = vpack.c.b16 %v1348_v55, %v1347_v41  ;;  %v3934_v59 = vld [vmem:[%s3919_s22 + $0x4] sm:$0xf] }
 0x143   : > { %4475 = vst [vmem:[#allocation7_spill] sm:$0xff] %v3906_v4  ;;  %2949 = vmatmul.msk.bf16.gmra.mxu3 %vm825_vm3, %v3902_v9  ;;  %v1677_v54 = vshrl.u32 %v3927_v47, 16  ;;  %v1680_v7 = vshll.u32 %v3927_v47, 16  ;;  %v1686_v28 = vshll.u32 %v3934_v59, 16  ;;  %v1690_v4 = vshrl.u32 %v3934_v59, 16 }
 0x144   : > { %v1744_v44 = vpop.f32.mrf.mxu0  ;;  %4477 = vst [vmem:[#allocation5_spill] sm:$0xff] %v3927_v47 }
 0x145   : > { %4479 = vst [vmem:[#allocation41_spill] sm:$0xff] %v3931_v50  ;;  %v1682_v63 = vrot.slane %v1680_v7, 5  ;;  %v1692_v27 = vrot.slane %v1690_v4, 4 }
 0x146   : > { %v1589_v22 = vpop.f32.mrf.mxu3  ;;  %v1137_v57 = vpop.f32.mrf.mxu1  ;;  %4480 = vst [vmem:[#allocation42_spill] sm:$0xff] %v3934_v59  ;;  %v1688_v59 = vrot.slane %v1686_v28, 5 }
 0x147   : > { %v1654_v35 = vadd.f32 %v1589_v22, %v1517_v5  ;;  %2965 = vmatmul.msk.bf16.gmra.mxu0 %vm825_vm3, %v4476_v30  ;;  %v4481_v5 = vld [vmem:[#allocation12_spill] sm:$0xff]  ;;  %v1138_v47 = vadd.f32 %v1137_v57, %v3679_v12 }
 0x148   : > { %v1313_v17 = vrot.slane %v4481_v5, 5 }
 0x149   : > { %v1454_v0 = vpop.f32.mrf.mxu2  ;;  %2898 = vmatmul.msk.bf16.gmra.mxu1 %vm825_vm3, %v3902_v9  ;;  %v3929_v58 = vadd.f32 %v1744_v44, %v1654_v35  ;;  %v4482_v44 = vld [vmem:[#allocation13_spill] sm:$0xff]  ;;  %v1679_v9 = vrot.slane %v1677_v54, 4  ;;  %v1693_v54 = vor.u32 %v1692_v27, %v1688_v59 }
 0x14a   : > { %v1518_v24 = vadd.f32 %v1454_v0, %v1135_v19  ;;  %v1316_v55 = vrot.slane %v4482_v44, 5  ;;  %v3945_v19 = vld [vmem:[%s3189_s30 + $0xb4] sm:$0xff]  ;;  %v4483_v0 = vld [vmem:[#allocation11_spill] sm:$0xff]  ;;  %s4341_s30 = scalar_lea.vmem %s4383_s4, %s2803_s27 }
 0x14b   : > { %4478 = vst [vmem:[#allocation40_spill] sm:$0xff] %v3929_v58  ;;  %v2915_v5 = vrot.slane %v4483_v0, 9  ;;  %v1315_v58 = vrot.slane %v1313_v17, 4  ;;  %v1683_v57 = vor.u32 %v1682_v63, %v1679_v9  ;;  %v1694_v63 = vrot.slane %v1693_v54, 4 }
 0x14c   : > { %v1746_v22 = vpop.f32.mrf.mxu0 }
 0x14e   : > { %v1591_v30 = vpop.f32.mrf.mxu3  ;;  %2930 = vmatmul.msk.bf16.gmra.mxu2 %vm825_vm3, %v3931_v50  ;;  %v1139_v41 = vpop.f32.mrf.mxu1  ;;  %v3952_v50 = vld [vmem:[%s3919_s22 + $0x8] sm:$0x1] }
 0x14f   : > { %v1655_v35 = vadd.f32 %v1591_v30, %v1518_v24  ;;  %v1314_v30 = vsel %vm3522_vm7, %v2915_v5, %v1313_v17  ;;  %v1317_v24 = vsel %vm3522_vm7, %v1315_v58, %v1316_v55  ;;  %v1696_v7 = vshll.u32 %v3952_v50, 16 }
 0x150   : > { %v1349_v28 = vunpack.c.l.b16 %v1314_v30  ;;  %v1140_v44 = vadd.f32 %v1139_v41, %v3700_v31  ;;  %v1684_v58 = vrot.slane %v1683_v57, 4 }
 0x151   : > { %v1457_v40 = vpop.f32.mrf.mxu2  ;;  %v3949_v43 = vadd.f32 %v1746_v22, %v1655_v35  ;;  %v1698_v27 = vrot.slane %v1696_v7, 5 }
 0x152   : > { %v1519_v26 = vadd.f32 %v1457_v40, %v1138_v47  ;;  %v1350_v40 = vunpack.c.l.b16 %v1317_v24  ;;  %v3977_v24 = vld [vmem:[%s3919_s22] sm:$0xff] }
 0x153   : > { %2950 = vmatmul.msk.bf16.gmra.mxu3 %vm825_vm3, %v3945_v19  ;;  %v1699_v31 = vsel %vm3219_vm4, %v1694_v63, %v1698_v27 }
 0x154   : > { %v1749_v12 = vpop.f32.mrf.mxu0  ;;  %v3968_v35 = vpack.c.b16 %v1350_v40, %v1349_v28  ;;  %v1702_v54 = vunpack.c.l.b16 %v1699_v31 }
 0x156   : > { %v1594_v4 = vpop.f32.mrf.mxu3  ;;  %v1142_v22 = vpop.f32.mrf.mxu1 }
 0x157   : > { %v1656_v47 = vadd.f32 %v1594_v4, %v1519_v26  ;;  %2966 = vmatmul.msk.bf16.gmra.mxu0 %vm825_vm3, %v3529_v10  ;;  %v1689_v26 = vsel %vm3219_vm4, %v1684_v58, %v1688_v59 }
 0x158   : > { %v1701_v57 = vunpack.c.l.b16 %v1689_v26 }
 0x159   : > { %v1459_v17 = vpop.f32.mrf.mxu2  ;;  %2899 = vmatmul.msk.bf16.gmra.mxu1 %vm825_vm3, %v3945_v19  ;;  %v3966_v9 = vadd.f32 %v1749_v12, %v1656_v47  ;;  %v1143_v12 = vadd.f32 %v1142_v22, %v3721_v13 }
 0x15a   : > { %v1520_v55 = vadd.f32 %v1459_v17, %v1140_v44  ;;  %v3984_v59 = vpack.c.b16 %v1702_v54, %v1701_v57 }
 0x15c   : > { %v1751_v0 = vpop.f32.mrf.mxu0 }
 0x15e   : > { %v1596_v41 = vpop.f32.mrf.mxu3  ;;  %2931 = vmatmul.msk.bf16.gmra.mxu2 %vm825_vm3, %v3968_v35  ;;  %v1144_v5 = vpop.f32.mrf.mxu1 }
 0x15f   : > { %v1657_v30 = vadd.f32 %v1596_v41, %v1520_v55  ;;  %v1145_v13 = vadd.f32 %v1144_v5, %v3738_v33 }
 0x161   : > { %v1462_v7 = vpop.f32.mrf.mxu2  ;;  %v3980_v4 = vadd.f32 %v1751_v0, %v1657_v30 }
 0x162   : > { %v1521_v28 = vadd.f32 %v1462_v7, %v1143_v12 }
 0x163   : > { %2951 = vmatmul.msk.bf16.gmra.mxu3 %vm825_vm3, %v3977_v24 }
 0x164   : > { %v1754_v40 = vpop.f32.mrf.mxu0 }
 0x166   : > { %v1599_v47 = vpop.f32.mrf.mxu3  ;;  %v1147_v44 = vpop.f32.mrf.mxu1 }
 0x167   : > { %v1658_v17 = vadd.f32 %v1599_v47, %v1521_v28  ;;  %2967 = vmatmul.msk.bf16.gmra.mxu0 %vm825_vm3, %v3984_v59  ;;  %v1148_v31 = vadd.f32 %v1147_v44, %v3621_v18 }
 0x169   : > { %v1464_v22 = vpop.f32.mrf.mxu2  ;;  %2969 = vmatmul.msk.bf16.vlgmr.msra.gmra.mxu1 %vm825_vm3, %v3557_v34  ;;  %v3991_v58 = vadd.f32 %v1754_v40, %v1658_v17 }
 0x16a   : > { %v1522_v63 = vadd.f32 %v1464_v22, %v1145_v13 }
 0x16c   : > { %v1756_v27 = vpop.f32.mrf.mxu0 }
 0x16e   : > { %v1601_v55 = vpop.f32.mrf.mxu3  ;;  %2989 = vmatmul.msk.bf16.vlgmr.msra.gmra.mxu2 %vm825_vm3, %v3569_v15  ;;  %v1149_v0 = vpop.f32.mrf.mxu1 }
 0x16f   : > { %v1659_v26 = vadd.f32 %v1601_v55, %v1522_v63  ;;  %v1150_v15 = vadd.f32 %v1149_v0, %v3643_v46 }
 0x171   : > { %v1467_v41 = vpop.f32.mrf.mxu2  ;;  %v3996_v30 = vadd.f32 %v1756_v27, %v1659_v26 }
 0x172   : > { %v1523_v33 = vadd.f32 %v1467_v41, %v1148_v31 }
 0x173   : > { %3005 = vmatmul.msk.bf16.vlgmr.msra.gmra.mxu3 %vm825_vm3, %v3460_v23 }
 0x174   : > { %v1759_v34 = vpop.f32.mrf.mxu0 }
 0x176   : > { %v1604_v5 = vpop.f32.mrf.mxu3  ;;  %v1152_v12 = vpop.f32.mrf.mxu1 }
 0x177   : > { %v1660_v57 = vadd.f32 %v1604_v5, %v1523_v33  ;;  %3022 = vmatmul.msk.bf16.vlgmr.msra.gmra.mxu0 %vm825_vm3, %v3583_v36  ;;  %v1153_v44 = vadd.f32 %v1152_v12, %v3665_v52 }
 0x179   : > { %v1469_v54 = vpop.f32.mrf.mxu2  ;;  %2970 = vmatmul.msk.bf16.gmra.mxu1 %vm825_vm3, %v3583_v36  ;;  %v4005_v18 = vadd.f32 %v1759_v34, %v1660_v57 }
 0x17a   : > { %v1524_v7 = vadd.f32 %v1469_v54, %v1150_v15 }
 0x17c   : > { %v1761_v28 = vpop.f32.mrf.mxu0 }
 0x17e   : > { %v1606_v40 = vpop.f32.mrf.mxu3  ;;  %2990 = vmatmul.msk.bf16.gmra.mxu2 %vm825_vm3, %v3589_v62  ;;  %v1154_v23 = vpop.f32.mrf.mxu1 }
 0x17f   : > { %v1661_v47 = vadd.f32 %v1606_v40, %v1524_v7  ;;  %v1155_v62 = vadd.f32 %v1154_v23, %v3687_v49 }
 0x181   : > { %v1472_v17 = vpop.f32.mrf.mxu2  ;;  %v4010_v13 = vadd.f32 %v1761_v28, %v1661_v47 }
 0x182   : > { %v1525_v46 = vadd.f32 %v1472_v17, %v1153_v44 }
 0x183   : > { %3006 = vmatmul.msk.bf16.gmra.mxu3 %vm825_vm3, %v3546_v6 }
 0x184   : > { %v1764_v36 = vpop.f32.mrf.mxu0 }
 0x186   : > { %v1609_v22 = vpop.f32.mrf.mxu3  ;;  %v1157_v63 = vpop.f32.mrf.mxu1 }
 0x187   : > { %v1662_v27 = vadd.f32 %v1609_v22, %v1525_v46  ;;  %3023 = vmatmul.msk.bf16.gmra.mxu0 %vm825_vm3, %v3603_v39  ;;  %v1158_v33 = vadd.f32 %v1157_v63, %v3704_v60 }
 0x189   : > { %v1474_v55 = vpop.f32.mrf.mxu2  ;;  %2971 = vmatmul.msk.bf16.gmra.mxu1 %vm825_vm3, %v3603_v39  ;;  %v4019_v52 = vadd.f32 %v1764_v36, %v1662_v27 }
 0x18a   : > { %v1526_v0 = vadd.f32 %v1474_v55, %v1155_v62 }
 0x18c   : > { %v1766_v26 = vpop.f32.mrf.mxu0 }
 0x18e   : > { %v1611_v31 = vpop.f32.mrf.mxu3  ;;  %2991 = vmatmul.msk.bf16.gmra.mxu2 %vm825_vm3, %v3611_v25  ;;  %v1159_v6 = vpop.f32.mrf.mxu1 }
 0x18f   : > { %v1663_v41 = vadd.f32 %v1611_v31, %v1526_v0  ;;  %v1160_v25 = vadd.f32 %v1159_v6, %v3723_v2  ;;  %v4484_v0 = vld [vmem:[#allocation18_spill] sm:$0xff]  ;;  %v4485_v31 = vld [vmem:[#allocation16_spill] sm:$0xff] }
 0x191   : > { %v1477_v34 = vpop.f32.mrf.mxu2  ;;  %v4024_v5 = vadd.f32 %v1766_v26, %v1663_v41 }
 0x192   : > { %v1527_v49 = vadd.f32 %v1477_v34, %v1158_v33  ;;  %v4486_v34 = vld [vmem:[#allocation8_spill] sm:$0xff] }
 0x193   : > { %3007 = vmatmul.msk.bf16.gmra.mxu3 %vm825_vm3, %v3231_v1 }
 0x194   : > { %v1769_v39 = vpop.f32.mrf.mxu0 }
 0x196   : > { %v1614_v12 = vpop.f32.mrf.mxu3  ;;  %v1162_v57 = vpop.f32.mrf.mxu1 }
 0x197   : > { %v1664_v15 = vadd.f32 %v1614_v12, %v1527_v49  ;;  %3024 = vmatmul.msk.bf16.gmra.mxu0 %vm825_vm3, %v3631_v14  ;;  %v1163_v47 = vadd.f32 %v1162_v57, %v3745_v48  ;;  %v4487_v57 = vld [vmem:[#allocation21_spill] sm:$0xff] }
 0x199   : > { %v1479_v54 = vpop.f32.mrf.mxu2  ;;  %2972 = vmatmul.msk.bf16.gmra.mxu1 %vm825_vm3, %v3631_v14  ;;  %v4033_v60 = vadd.f32 %v1769_v39, %v1664_v15  ;;  %v4488_v15 = vld [vmem:[#allocation17_spill] sm:$0xff] }
 0x19a   : > { %v1528_v7 = vadd.f32 %v1479_v54, %v1160_v25 }
 0x19c   : > { %v1771_v28 = vpop.f32.mrf.mxu0 }
 0x19e   : > { %v1616_v40 = vpop.f32.mrf.mxu3  ;;  %2992 = vmatmul.msk.bf16.gmra.mxu2 %vm825_vm3, %v3639_v21  ;;  %v1164_v1 = vpop.f32.mrf.mxu1 }
 0x19f   : > { %v1665_v23 = vadd.f32 %v1616_v40, %v1528_v7  ;;  %v1165_v21 = vadd.f32 %v1164_v1, %v3760_v37 }
 0x1a1   : > { %v1482_v44 = vpop.f32.mrf.mxu2  ;;  %v4038_v17 = vadd.f32 %v1771_v28, %v1665_v23  ;;  %v4489_v23 = vld [vmem:[#allocation22_spill] sm:$0xff] }
 0x1a2   : > { %v1529_v2 = vadd.f32 %v1482_v44, %v1163_v47 }
 0x1a3   : > { %3008 = vmatmul.msk.bf16.gmra.mxu3 %vm825_vm3, %v3306_v45 }
 0x1a4   : > { %v1774_v14 = vpop.f32.mrf.mxu0 }
 0x1a6   : > { %v1619_v46 = vpop.f32.mrf.mxu3  ;;  %v1167_v36 = vpop.f32.mrf.mxu1 }
 0x1a7   : > { %v1666_v22 = vadd.f32 %v1619_v46, %v1529_v2  ;;  %3025 = vmatmul.msk.bf16.gmra.mxu0 %vm825_vm3, %v3663_v42  ;;  %v1168_v6 = vadd.f32 %v1167_v36, %v4485_v31  ;;  %v4490_v2 = vld [vmem:[#allocation19_spill] sm:$0xff] }
 0x1a9   : > { %v1484_v63 = vpop.f32.mrf.mxu2  ;;  %2973 = vmatmul.msk.bf16.gmra.mxu1 %vm825_vm3, %v3663_v42  ;;  %v4047_v48 = vadd.f32 %v1774_v14, %v1666_v22 }
 0x1aa   : > { %v1530_v27 = vadd.f32 %v1484_v63, %v1165_v21  ;;  %v4491_v21 = vld [vmem:[#allocation14_spill] sm:$0xff] }
 0x1ac   : > { %v1776_v62 = vpop.f32.mrf.mxu0 }
 0x1ae   : > { %v1621_v55 = vpop.f32.mrf.mxu3  ;;  %2993 = vmatmul.msk.bf16.gmra.mxu2 %vm825_vm3, %v4484_v0  ;;  %v1169_v45 = vpop.f32.mrf.mxu1  ;;  %v4492_v0 = vld [vmem:[#allocation24_spill] sm:$0xff] }
 0x1af   : > { %v1667_v26 = vadd.f32 %v1621_v55, %v1530_v27  ;;  %v1170_v25 = vadd.f32 %v1169_v45, %v4488_v15  ;;  %v4493_v45 = vld [vmem:[#allocation20_spill] sm:$0xff] }
 0x1b1   : > { %v1487_v41 = vpop.f32.mrf.mxu2  ;;  %v4052_v33 = vadd.f32 %v1776_v62, %v1667_v26 }
 0x1b2   : > { %v1531_v37 = vadd.f32 %v1487_v41, %v1168_v6 }
 0x1b3   : > { %3009 = vmatmul.msk.bf16.gmra.mxu3 %vm825_vm3, %v4486_v34 }
 0x1b4   : > { %v1779_v42 = vpop.f32.mrf.mxu0 }
 0x1b6   : > { %v1624_v49 = vpop.f32.mrf.mxu3  ;;  %v1172_v39 = vpop.f32.mrf.mxu1 }
 0x1b7   : > { %v1668_v12 = vadd.f32 %v1624_v49, %v1531_v37  ;;  %3026 = vmatmul.msk.bf16.gmra.mxu0 %vm825_vm3, %v4487_v57  ;;  %v1173_v14 = vadd.f32 %v1172_v39, %v4490_v2  ;;  %v4498_v2 = vld [vmem:[#allocation25_spill] sm:$0xff] }
 0x1b9   : > { %v1489_v54 = vpop.f32.mrf.mxu2  ;;  %2974 = vmatmul.msk.bf16.gmra.mxu1 %vm825_vm3, %v4487_v57  ;;  %v4061_v7 = vadd.f32 %v1779_v42, %v1668_v12  ;;  %v4494_v42 = vld [vmem:[#allocation26_spill] sm:$0xff]  ;;  %v4495_v12 = vld [vmem:[#allocation23_spill] sm:$0xff] }
 0x1ba   : > { %v1532_v28 = vadd.f32 %v1489_v54, %v1170_v25 }
 0x1bc   : > { %v1781_v40 = vpop.f32.mrf.mxu0 }
 0x1be   : > { %v1626_v1 = vpop.f32.mrf.mxu3  ;;  %2994 = vmatmul.msk.bf16.gmra.mxu2 %vm825_vm3, %v4489_v23  ;;  %v1174_v47 = vpop.f32.mrf.mxu1 }
 0x1bf   : > { %v1669_v44 = vadd.f32 %v1626_v1, %v1532_v28  ;;  %v1175_v26 = vadd.f32 %v1174_v47, %v4493_v45  ;;  %v4496_v28 = vld [vmem:[#allocation2_spill] sm:$0xff] }
 0x1c1   : > { %v1492_v46 = vpop.f32.mrf.mxu2  ;;  %v4066_v36 = vadd.f32 %v1781_v40, %v1669_v44  ;;  %v4497_v44 = vld [vmem:[#allocation28_spill] sm:$0xff] }
 0x1c2   : > { %v1533_v22 = vadd.f32 %v1492_v46, %v1173_v14 }
 0x1c3   : > { %3010 = vmatmul.msk.bf16.gmra.mxu3 %vm825_vm3, %v4491_v21 }
 0x1c4   : > { %v1784_v63 = vpop.f32.mrf.mxu0 }
 0x1c6   : > { %v1629_v27 = vpop.f32.mrf.mxu3  ;;  %v1177_v62 = vpop.f32.mrf.mxu1 }
 0x1c7   : > { %v1670_v55 = vadd.f32 %v1629_v27, %v1533_v22  ;;  %3027 = vmatmul.msk.bf16.gmra.mxu0 %vm825_vm3, %v4492_v0  ;;  %v1178_v57 = vadd.f32 %v1177_v62, %v4495_v12 }
 0x1c9   : > { %v1494_v31 = vpop.f32.mrf.mxu2  ;;  %2975 = vmatmul.msk.bf16.gmra.mxu1 %vm825_vm3, %v4492_v0  ;;  %v4075_v6 = vadd.f32 %v1784_v63, %v1670_v55  ;;  %v4499_v0 = vld [vmem:[#allocation27_spill] sm:$0xff] }
 0x1ca   : > { %v1534_v41 = vadd.f32 %v1494_v31, %v1175_v26 }
 0x1cc   : > { %v1786_v37 = vpop.f32.mrf.mxu0 }
 0x1ce   : > { %v1631_v34 = vpop.f32.mrf.mxu3  ;;  %2995 = vmatmul.msk.bf16.gmra.mxu2 %vm825_vm3, %v4494_v42  ;;  %v1179_v49 = vpop.f32.mrf.mxu1 }
 0x1cf   : > { %v1671_v39 = vadd.f32 %v1631_v34, %v1534_v41  ;;  %v1180_v14 = vadd.f32 %v1179_v49, %v4498_v2 }
 0x1d1   : > { %v1497_v15 = vpop.f32.mrf.mxu2  ;;  %v4080_v25 = vadd.f32 %v1786_v37, %v1671_v39  ;;  %v4500_v39 = vld [vmem:[#allocation29_spill] sm:$0xff] }
 0x1d2   : > { %v1535_v54 = vadd.f32 %v1497_v15, %v1178_v57 }
 0x1d3   : > { %3011 = vmatmul.msk.bf16.gmra.mxu3 %vm825_vm3, %v4496_v28 }
 0x1d4   : > { %v1789_v40 = vpop.f32.mrf.mxu0 }
 0x1d6   : > { %v1634_v1 = vpop.f32.mrf.mxu3  ;;  %v1182_v23 = vpop.f32.mrf.mxu1 }
 0x1d7   : > { %v1672_v47 = vadd.f32 %v1634_v1, %v1535_v54  ;;  %3028 = vmatmul.msk.bf16.gmra.mxu0 %vm825_vm3, %v4497_v44  ;;  %v1183_v45 = vadd.f32 %v1182_v23, %v4499_v0 }
 0x1d9   : > { %v1499_v46 = vpop.f32.mrf.mxu2  ;;  %2976 = vmatmul.msk.bf16.gmra.mxu1 %vm825_vm3, %v4497_v44  ;;  %v4089_v22 = vadd.f32 %v1789_v40, %v1672_v47 }
 0x1da   : > { %v1536_v21 = vadd.f32 %v1499_v46, %v1180_v14 }
 0x1dc   : > { %v1791_v63 = vpop.f32.mrf.mxu0 }
 0x1de   : > { %v1636_v27 = vpop.f32.mrf.mxu3  ;;  %2996 = vmatmul.msk.bf16.gmra.mxu2 %vm825_vm3, %v3775_v53  ;;  %v1184_v62 = vpop.f32.mrf.mxu1 }
 0x1df   : > { %v1673_v55 = vadd.f32 %v1636_v27, %v1536_v21  ;;  %v1185_v53 = vadd.f32 %v1184_v62, %v4500_v39 }
 0x1e1   : > { %v1502_v26 = vpop.f32.mrf.mxu2  ;;  %v4094_v31 = vadd.f32 %v1791_v63, %v1673_v55 }
 0x1e2   : > { %v1537_v41 = vadd.f32 %v1502_v26, %v1183_v45 }
 0x1e3   : > { %3012 = vmatmul.msk.bf16.gmra.mxu3 %vm825_vm3, %v3328_v3 }
 0x1e4   : > { %v1794_v37 = vpop.f32.mrf.mxu0 }
 0x1e6   : > { %v1639_v34 = vpop.f32.mrf.mxu3  ;;  %v1862_v42 = vpop.f32.mrf.mxu1 }
 0x1e7   : > { %v1674_v49 = vadd.f32 %v1639_v34, %v1537_v41  ;;  %3029 = vmatmul.msk.bf16.gmra.mxu0 %vm825_vm3, %v3792_v11  ;;  %v1942_v1 = vadd.f32 %v1862_v42, %v3790_v8 }
 0x1e9   : > { %v1504_v12 = vpop.f32.mrf.mxu2  ;;  %2977 = vmatmul.msk.bf16.gmra.mxu1 %vm825_vm3, %v3792_v11  ;;  %v4103_v57 = vadd.f32 %v1794_v37, %v1674_v49  ;;  %v4501_v49 = vld [vmem:[#allocation15_spill] sm:$0xff] }
 0x1ea   : > { %v1538_v15 = vadd.f32 %v1504_v12, %v1185_v53 }
 0x1ec   : > { %v1796_v54 = vpop.f32.mrf.mxu0 }
 0x1ee   : > { %v1641_v28 = vpop.f32.mrf.mxu3  ;;  %2997 = vmatmul.msk.bf16.gmra.mxu2 %vm825_vm3, %v3799_v32  ;;  %v1864_v3 = vpop.f32.mrf.mxu1 }
 0x1ef   : > { %v1675_v40 = vadd.f32 %v1641_v28, %v1538_v15  ;;  %v1943_v21 = vadd.f32 %v1864_v3, %v3803_v16 }
 0x1f1   : > { %v1995_v23 = vpop.f32.mrf.mxu2  ;;  %v4108_v47 = vadd.f32 %v1796_v54, %v1675_v40  ;;  %v4502_v40 = vld [vmem:[#allocation31_spill] sm:$0xff] }
 0x1f2   : > { %v2075_v11 = vadd.f32 %v1995_v23, %v1942_v1  ;;  %v4503_v23 = vld [vmem:[#allocation9_spill] sm:$0xff] }
 0x1f3   : > { %3013 = vmatmul.msk.bf16.gmra.mxu3 %vm825_vm3, %v3416_v29 }
 0x1f4   : > { %v2293_v44 = vpop.f32.mrf.mxu0 }
 0x1f6   : > { %v2154_v2 = vpop.f32.mrf.mxu3  ;;  %v1867_v14 = vpop.f32.mrf.mxu1 }
 0x1f7   : > { %v2234_v46 = vadd.f32 %v2154_v2, %v2075_v11  ;;  %3030 = vmatmul.msk.bf16.gmra.mxu0 %vm825_vm3, %v3818_v56  ;;  %v1944_v45 = vadd.f32 %v1867_v14, %v3816_v61 }
 0x1f9   : > { %v2373_v32 = vadd.f32 %v2293_v44, %v2234_v46  ;;  %v1997_v63 = vpop.f32.mrf.mxu2  ;;  %2978 = vmatmul.msk.bf16.gmra.mxu1 %vm825_vm3, %v3818_v56 }
 0x1fa   : > { %v2076_v8 = vadd.f32 %v1997_v63, %v1943_v21 }
 0x1fb   : > { %v2405_v29 = vpack.c.bf16 %v2373_v32, %v2373_v32  ;;  %v2546_v56 = vmul.f32 %v2373_v32, %v2373_v32  ;;  %v2477_v41 = vsel %vm825_vm3, %v2373_v32, 0.0 }
 0x1fc   : > { %v2295_v27 = vpop.f32.mrf.mxu0 }
 0x1fd   : > { %2438 = vst.msk [vmem:[%s4121_s26] sm:$0xf] %vm2437_vm8, %v2405_v29 }
 0x1fe   : > { %v2156_v62 = vpop.f32.mrf.mxu3  ;;  %2998 = vmatmul.msk.bf16.gmra.mxu2 %vm825_vm3, %v3825_v51  ;;  %v1869_v16 = vpop.f32.mrf.mxu1  ;;  %v2578_v51 = vsel %vm825_vm3, %v2546_v56, 0.0 }
 0x1ff   : > { %v2235_v55 = vadd.f32 %v2156_v62, %v2076_v8  ;;  %v1945_v11 = vadd.f32 %v1869_v16, %v4503_v23  ;;  %v4504_v62 = vld [vmem:[#allocation32_spill] sm:$0xff] }
 0x201   : > { %v2374_v0 = vadd.f32 %v2295_v27, %v2235_v55  ;;  %v2000_v26 = vpop.f32.mrf.mxu2 }
 0x202   : > { %v2077_v39 = vadd.f32 %v2000_v26, %v1944_v45 }
 0x203   : > { %v2406_v37 = vpack.c.bf16 %v2374_v0, %v2374_v0  ;;  %v2478_v34 = vsel %vm825_vm3, %v2374_v0, 0.0  ;;  %v2547_v42 = vmul.f32 %v2374_v0, %v2374_v0  ;;  %3014 = vmatmul.msk.bf16.gmra.mxu3 %vm825_vm3, %v4501_v49  ;;  %v4505_v0 = vld [vmem:[#allocation30_spill] sm:$0xff] }
 0x204   : > { %v2479_v53 = vadd.f32 %v2478_v34, %v2477_v41  ;;  %v2298_v61 = vpop.f32.mrf.mxu0 }
 0x205   : > { %2439 = vst.msk [vmem:[%s4121_s26 + $0x4] sm:$0xf] %vm2437_vm8, %v2406_v37  ;;  %v2579_v12 = vsel %vm825_vm3, %v2547_v42, 0.0  ;;  %v4506_v42 = vld [vmem:[#allocation3_spill] sm:$0xff] }
 0x206   : > { %v2580_v15 = vadd.f32 %v2579_v12, %v2578_v51  ;;  %v2159_v54 = vpop.f32.mrf.mxu3  ;;  %v1872_v28 = vpop.f32.mrf.mxu1 }
 0x207   : > { %v2236_v3 = vadd.f32 %v2159_v54, %v2077_v39  ;;  %3031 = vmatmul.msk.bf16.gmra.mxu0 %vm825_vm3, %v4502_v40  ;;  %v1946_v45 = vadd.f32 %v1872_v28, %v4505_v0  ;;  %v4507_v28 = vld [vmem:[#allocation35_spill] sm:$0xff] }
 0x209   : > { %v2375_v1 = vadd.f32 %v2298_v61, %v2236_v3  ;;  %v2002_v44 = vpop.f32.mrf.mxu2  ;;  %2979 = vmatmul.msk.bf16.gmra.mxu1 %vm825_vm3, %v4502_v40  ;;  %v4508_v40 = vld [vmem:[#allocation33_spill] sm:$0xff] }
 0x20a   : > { %v2078_v32 = vadd.f32 %v2002_v44, %v1945_v11 }
 0x20b   : > { %v2407_v2 = vpack.c.bf16 %v2375_v1, %v2375_v1  ;;  %v2480_v14 = vsel %vm825_vm3, %v2375_v1, 0.0  ;;  %v2548_v46 = vmul.f32 %v2375_v1, %v2375_v1 }
 0x20c   : > { %v2481_v21 = vadd.f32 %v2480_v14, %v2479_v53  ;;  %v2300_v29 = vpop.f32.mrf.mxu0 }
 0x20d   : > { %2440 = vst.msk [vmem:[%s4121_s26 + $0x8] sm:$0xf] %vm2437_vm8, %v2407_v2  ;;  %v2581_v63 = vsel %vm825_vm3, %v2548_v46, 0.0 }
 0x20e   : > { %v2582_v8 = vadd.f32 %v2581_v63, %v2580_v15  ;;  %v2161_v27 = vpop.f32.mrf.mxu3  ;;  %2999 = vmatmul.msk.bf16.gmra.mxu2 %vm825_vm3, %v4504_v62  ;;  %v1874_v16 = vpop.f32.mrf.mxu1 }
 0x20f   : > { %v2237_v55 = vadd.f32 %v2161_v27, %v2078_v32  ;;  %v1947_v1 = vadd.f32 %v1874_v16, %v4508_v40 }
 0x211   : > { %v2376_v56 = vadd.f32 %v2300_v29, %v2237_v55  ;;  %v2005_v26 = vpop.f32.mrf.mxu2  ;;  %v4510_v55 = vld [vmem:[#allocation34_spill] sm:$0xff] }
 0x212   : > { %v2079_v49 = vadd.f32 %v2005_v26, %v1946_v45 }
 0x213   : > { %v2408_v41 = vpack.c.bf16 %v2376_v56, %v2376_v56  ;;  %v2482_v37 = vsel %vm825_vm3, %v2376_v56, 0.0  ;;  %v2549_v34 = vmul.f32 %v2376_v56, %v2376_v56  ;;  %3015 = vmatmul.msk.bf16.gmra.mxu3 %vm825_vm3, %v4506_v42 }
 0x214   : > { %v2483_v39 = vadd.f32 %v2482_v37, %v2481_v21  ;;  %v2303_v51 = vpop.f32.mrf.mxu0  ;;  %v4511_v37 = vld [vmem:[#allocation4_spill] sm:$0xff] }
 0x215   : > { %2441 = vst.msk [vmem:[%s4121_s26 + $0xc] sm:$0xf] %vm2437_vm8, %v2408_v41  ;;  %v2583_v53 = vsel %vm825_vm3, %v2549_v34, 0.0 }
 0x216   : > { %v2584_v12 = vadd.f32 %v2583_v53, %v2582_v8  ;;  %v2164_v61 = vpop.f32.mrf.mxu3  ;;  %v1877_v15 = vpop.f32.mrf.mxu1  ;;  %v4509_v8 = vld [vmem:[#allocation36_spill] sm:$0xff] }
 0x217   : > { %v2238_v54 = vadd.f32 %v2164_v61, %v2079_v49  ;;  %3032 = vmatmul.msk.bf16.gmra.mxu0 %vm825_vm3, %v4507_v28  ;;  %v1948_v56 = vadd.f32 %v1877_v15, %v4510_v55  ;;  %v4512_v15 = vld [vmem:[#allocation39_spill] sm:$0xff] }
 0x219   : > { %v2377_v3 = vadd.f32 %v2303_v51, %v2238_v54  ;;  %v2007_v23 = vpop.f32.mrf.mxu2  ;;  %2980 = vmatmul.msk.bf16.gmra.mxu1 %vm825_vm3, %v4507_v28  ;;  %v4513_v28 = vld [vmem:[#allocation37_spill] sm:$0xff] }
 0x21a   : > { %v2080_v14 = vadd.f32 %v2007_v23, %v1947_v1 }
 0x21b   : > { %v2409_v11 = vpack.c.bf16 %v2377_v3, %v2377_v3  ;;  %v2484_v44 = vsel %vm825_vm3, %v2377_v3, 0.0  ;;  %v2550_v2 = vmul.f32 %v2377_v3, %v2377_v3 }
 0x21c   : > { %v2485_v46 = vadd.f32 %v2484_v44, %v2483_v39  ;;  %v2305_v21 = vpop.f32.mrf.mxu0 }
 0x21d   : > { %2442 = vst.msk [vmem:[%s4121_s26 + $0x10] sm:$0xf] %vm2437_vm8, %v2409_v11  ;;  %v2585_v32 = vsel %vm825_vm3, %v2550_v2, 0.0 }
 0x21e   : > { %v2586_v63 = vadd.f32 %v2585_v32, %v2584_v12  ;;  %v2166_v29 = vpop.f32.mrf.mxu3  ;;  %3000 = vmatmul.msk.bf16.gmra.mxu2 %vm825_vm3, %v4509_v8  ;;  %v1879_v27 = vpop.f32.mrf.mxu1 }
 0x21f   : > { %v2239_v62 = vadd.f32 %v2166_v29, %v2080_v14  ;;  %v1949_v3 = vadd.f32 %v1879_v27, %v4513_v28 }
 0x221   : > { %v2378_v16 = vadd.f32 %v2305_v21, %v2239_v62  ;;  %v2010_v0 = vpop.f32.mrf.mxu2  ;;  %v4515_v62 = vld [vmem:[#allocation38_spill] sm:$0xff] }
 0x222   : > { %v2081_v34 = vadd.f32 %v2010_v0, %v1948_v56 }
 0x223   : > { %v2410_v45 = vpack.c.bf16 %v2378_v16, %v2378_v16  ;;  %v2486_v26 = vsel %vm825_vm3, %v2378_v16, 0.0  ;;  %v2551_v41 = vmul.f32 %v2378_v16, %v2378_v16  ;;  %3016 = vmatmul.msk.bf16.gmra.mxu3 %vm825_vm3, %v4511_v37 }
 0x224   : > { %v2487_v42 = vadd.f32 %v2486_v26, %v2485_v46  ;;  %v2308_v39 = vpop.f32.mrf.mxu0  ;;  %v4516_v26 = vld [vmem:[#allocation10_spill] sm:$0xff] }
 0x225   : > { %2443 = vst.msk [vmem:[%s4121_s26 + $0x14] sm:$0xf] %vm2437_vm8, %v2410_v45  ;;  %v2587_v49 = vsel %vm825_vm3, %v2551_v41, 0.0 }
 0x226   : > { %v2588_v53 = vadd.f32 %v2587_v49, %v2586_v63  ;;  %v2169_v51 = vpop.f32.mrf.mxu3  ;;  %v1882_v12 = vpop.f32.mrf.mxu1  ;;  %v4514_v63 = vld [vmem:[#allocation6_spill] sm:$0xff] }
 0x227   : > { %v2240_v61 = vadd.f32 %v2169_v51, %v2081_v34  ;;  %3033 = vmatmul.msk.bf16.gmra.mxu0 %vm825_vm3, %v4512_v15  ;;  %v1950_v16 = vadd.f32 %v1882_v12, %v4515_v62  ;;  %v4517_v12 = vld [vmem:[#allocation41_spill] sm:$0xff]  ;;  %v4203_v62 = vld [vmem:[%s3919_s22 + $0xc] sm:$0xf] }
 0x229   : > { %v2379_v54 = vadd.f32 %v2308_v39, %v2240_v61  ;;  %v2012_v40 = vpop.f32.mrf.mxu2  ;;  %2981 = vmatmul.msk.bf16.gmra.mxu1 %vm825_vm3, %v4512_v15  ;;  %v4518_v15 = vld [vmem:[#allocation7_spill] sm:$0xff] }
 0x22a   : > { %v2082_v44 = vadd.f32 %v2012_v40, %v1949_v3 }
 0x22b   : > { %v2411_v1 = vpack.c.bf16 %v2379_v54, %v2379_v54  ;;  %v2488_v23 = vsel %vm825_vm3, %v2379_v54, 0.0  ;;  %v2552_v11 = vmul.f32 %v2379_v54, %v2379_v54 }
 0x22c   : > { %v2489_v2 = vadd.f32 %v2488_v23, %v2487_v42  ;;  %v2310_v46 = vpop.f32.mrf.mxu0 }
 0x22d   : > { %2444 = vst.msk [vmem:[%s4121_s26 + $0x18] sm:$0xf] %vm2437_vm8, %v2411_v1  ;;  %v2589_v14 = vsel %vm825_vm3, %v2552_v11, 0.0 }
 0x22e   : > { %v2590_v32 = vadd.f32 %v2589_v14, %v2588_v53  ;;  %v2171_v21 = vpop.f32.mrf.mxu3  ;;  %3001 = vmatmul.msk.bf16.gmra.mxu2 %vm825_vm3, %v4514_v63  ;;  %v1884_v29 = vpop.f32.mrf.mxu1 }
 0x22f   : > { %v2241_v8 = vadd.f32 %v2171_v21, %v2082_v44  ;;  %v1951_v54 = vadd.f32 %v1884_v29, %v4518_v15  ;;  %v4519_v29 = vld [vmem:[#allocation40_spill] sm:$0xff]  ;;  %v4521_v15 = vld [vmem:[#allocation5_spill] sm:$0xff] }
 0x231   : > { %v2380_v27 = vadd.f32 %v2310_v46, %v2241_v8  ;;  %v2015_v55 = vpop.f32.mrf.mxu2 }
 0x232   : > { %v2083_v41 = vadd.f32 %v2015_v55, %v1950_v16 }
 0x233   : > { %v2412_v56 = vpack.c.bf16 %v2380_v27, %v2380_v27  ;;  %v2490_v0 = vsel %vm825_vm3, %v2380_v27, 0.0  ;;  %v2553_v45 = vmul.f32 %v2380_v27, %v2380_v27  ;;  %3017 = vmatmul.msk.bf16.gmra.mxu3 %vm825_vm3, %v4516_v26 }
 0x234   : > { %v2491_v37 = vadd.f32 %v2490_v0, %v2489_v2  ;;  %v2313_v42 = vpop.f32.mrf.mxu0 }
 0x235   : > { %2445 = vst.msk [vmem:[%s4121_s26 + $0x1c] sm:$0xf] %vm2437_vm8, %v2412_v56  ;;  %v2591_v34 = vsel %vm825_vm3, %v2553_v45, 0.0  ;;  %v4209_v45 = vld [vmem:[%s3919_s22 + $0x10] sm:$0xf] }
 0x236   : > { %v2592_v49 = vadd.f32 %v2591_v34, %v2590_v32  ;;  %v2174_v39 = vpop.f32.mrf.mxu3  ;;  %v1887_v53 = vpop.f32.mrf.mxu1 }
 0x237   : > { %v2242_v51 = vadd.f32 %v2174_v39, %v2083_v41  ;;  %3034 = vmatmul.msk.bf16.gmra.mxu0 %vm825_vm3, %v4517_v12  ;;  %v1952_v8 = vadd.f32 %v1887_v53, %v4519_v29 }
 0x239   : > { %v2381_v61 = vadd.f32 %v2313_v42, %v2242_v51  ;;  %v2017_v28 = vpop.f32.mrf.mxu2  ;;  %2982 = vmatmul.msk.bf16.gmra.mxu1 %vm825_vm3, %v4517_v12  ;;  %v2108_v42 = vshrl.u32 %v4203_v62, 16  ;;  %v2111_v51 = vshll.u32 %v4203_v62, 16  ;;  %v2121_v12 = vshrl.u32 %v4209_v45, 16 }
 0x23a   : > { %v2084_v23 = vadd.f32 %v2017_v28, %v1951_v54  ;;  %v2968_v54 = vrot.slane %v4521_v15, 9 }
 0x23b   : > { %v2413_v3 = vpack.c.bf16 %v2381_v61, %v2381_v61  ;;  %v2492_v40 = vsel %vm825_vm3, %v2381_v61, 0.0  ;;  %v2554_v1 = vmul.f32 %v2381_v61, %v2381_v61 }
 0x23c   : > { %v2493_v11 = vadd.f32 %v2492_v40, %v2491_v37  ;;  %v2315_v2 = vpop.f32.mrf.mxu0  ;;  %v4520_v37 = vld [vmem:[#allocation42_spill] sm:$0xff] }
 0x23d   : > { %2446 = vst.msk [vmem:[%s4121_s26 + $0x20] sm:$0xf] %vm2437_vm8, %v2413_v3  ;;  %v2593_v44 = vsel %vm825_vm3, %v2554_v1, 0.0  ;;  %v1834_v34 = vrot.slane %v4520_v37, 5 }
 0x23e   : > { %v2594_v14 = vadd.f32 %v2593_v44, %v2592_v49  ;;  %v2176_v46 = vpop.f32.mrf.mxu3  ;;  %3002 = vmatmul.msk.bf16.gmra.mxu2 %vm825_vm3, %v3945_v19  ;;  %v1889_v32 = vpop.f32.mrf.mxu1  ;;  %v2113_v44 = vrot.slane %v2111_v51, 5 }
 0x23f   : > { %v2243_v21 = vadd.f32 %v2176_v46, %v2084_v23  ;;  %v1953_v3 = vadd.f32 %v1889_v32, %v3949_v43  ;;  %v1836_v1 = vrot.slane %v1834_v34, 4  ;;  %v1837_v23 = vrot.slane %v3952_v50, 5 }
 0x241   : > { %v2382_v63 = vadd.f32 %v2315_v2, %v2243_v21  ;;  %v2020_v27 = vpop.f32.mrf.mxu2  ;;  %v1838_v50 = vsel %vm3522_vm7, %v1836_v1, %v1837_v23 }
 0x242   : > { %v2085_v0 = vadd.f32 %v2020_v27, %v1952_v8  ;;  %v383_v8 = vld [vmem:[%s3919_s22 + $0x14] sm:$0x1] }
 0x243   : > { %v2414_v16 = vpack.c.bf16 %v2382_v63, %v2382_v63  ;;  %v2494_v55 = vsel %vm825_vm3, %v2382_v63, 0.0  ;;  %v2555_v56 = vmul.f32 %v2382_v63, %v2382_v63  ;;  %3018 = vmatmul.msk.bf16.gmra.mxu3 %vm825_vm3, %v3529_v10  ;;  %v2117_v10 = vshll.u32 %v4209_v45, 16 }
 0x244   : > { %v2495_v26 = vadd.f32 %v2494_v55, %v2493_v11  ;;  %v2318_v41 = vpop.f32.mrf.mxu0  ;;  %v2110_v11 = vrot.slane %v2108_v42, 4  ;;  %v1841_v42 = vunpack.c.l.b16 %v1838_v50 }
 0x245   : > { %2447 = vst.msk [vmem:[%s4121_s26 + $0x24] sm:$0xf] %vm2437_vm8, %v2414_v16  ;;  %v2595_v19 = vsel %vm825_vm3, %v2555_v56, 0.0  ;;  %v2119_v2 = vrot.slane %v2117_v10, 5 }
 0x246   : > { %v2596_v49 = vadd.f32 %v2595_v19, %v2594_v14  ;;  %v2179_v39 = vpop.f32.mrf.mxu3  ;;  %v1892_v53 = vpop.f32.mrf.mxu1  ;;  %v2123_v14 = vrot.slane %v2121_v12, 4 }
 0x247   : > { %v2244_v61 = vadd.f32 %v2179_v39, %v2085_v0  ;;  %3035 = vmatmul.msk.bf16.gmra.mxu0 %vm825_vm3, %v3968_v35  ;;  %v2114_v0 = vor.u32 %v2113_v44, %v2110_v11  ;;  %v1954_v51 = vadd.f32 %v1892_v53, %v3966_v9  ;;  %v2269_v9 = vrot.slane %v4209_v45, 5 }
 0x248   : > { %v2124_v19 = vor.u32 %v2123_v14, %v2119_v2 }
 0x249   : > { %v2383_v28 = vadd.f32 %v2318_v41, %v2244_v61  ;;  %v2022_v40 = vpop.f32.mrf.mxu2  ;;  %2983 = vmatmul.msk.bf16.gmra.mxu1 %vm825_vm3, %v3968_v35  ;;  %v1835_v35 = vsel %vm3522_vm7, %v2968_v54, %v1834_v34  ;;  %v2115_v10 = vrot.slane %v2114_v0, 4  ;;  %v2271_v45 = vrot.slane %v2269_v9, 4 }
 0x24a   : > { %v2086_v29 = vadd.f32 %v2022_v40, %v1953_v3  ;;  %v1840_v37 = vunpack.c.l.b16 %v1835_v35  ;;  %v2125_v12 = vrot.slane %v2124_v19, 4 }
 0x24b   : > { %v2415_v46 = vpack.c.bf16 %v2383_v28, %v2383_v28  ;;  %v2496_v21 = vsel %vm825_vm3, %v2383_v28, 0.0  ;;  %v2556_v63 = vmul.f32 %v2383_v28, %v2383_v28  ;;  %v2120_v14 = vsel %vm3219_vm4, %v2115_v10, %v2119_v2 }
 0x24c   : > { %v2497_v27 = vadd.f32 %v2496_v21, %v2495_v26  ;;  %v2320_v32 = vpop.f32.mrf.mxu0  ;;  %v2127_v26 = vshll.u32 %v383_v8, 16  ;;  %v1842_v3 = vpack.c.b16 %v1841_v42, %v1840_v37 }
 0x24d   : > { %2448 = vst.msk [vmem:[%s4121_s26 + $0x28] sm:$0xf] %vm2437_vm8, %v2415_v46  ;;  %v2597_v43 = vsel %vm825_vm3, %v2556_v63, 0.0  ;;  %v3021_v46 = vrot.slane %v4203_v62, 9 }
 0x24e   : > { %v2598_v16 = vadd.f32 %v2597_v43, %v2596_v49  ;;  %v2181_v55 = vpop.f32.mrf.mxu3  ;;  %3003 = vmatmul.msk.bf16.gmra.mxu2 %vm825_vm3, %v3977_v24  ;;  %v1894_v56 = vpop.f32.mrf.mxu1  ;;  %v2129_v61 = vrot.slane %v2127_v26, 5  ;;  %v3060_v43 = vld [vmem:[%s3919_s22 + $0xc] sm:$0xff] }
 0x24f   : > { %v2245_v41 = vadd.f32 %v2181_v55, %v2086_v29  ;;  %v1955_v63 = vadd.f32 %v1894_v56, %v3980_v4  ;;  %v2270_v4 = vsel %vm3522_vm7, %v3021_v46, %v2269_v9 }
 0x250   : > { %v2275_v42 = vunpack.c.l.b16 %v2270_v4 }
 0x251   : > { %v2384_v39 = vadd.f32 %v2320_v32, %v2245_v41  ;;  %v2025_v34 = vpop.f32.mrf.mxu2  ;;  %v2132_v32 = vunpack.c.l.b16 %v2120_v14 }
 0x252   : > { %v2087_v24 = vadd.f32 %v2025_v34, %v1954_v51 }
 0x253   : > { %v2416_v49 = vpack.c.bf16 %v2384_v39, %v2384_v39  ;;  %v2498_v15 = vsel %vm825_vm3, %v2384_v39, 0.0  ;;  %v2557_v54 = vmul.f32 %v2384_v39, %v2384_v39  ;;  %3019 = vmatmul.msk.bf16.gmra.mxu3 %vm825_vm3, %v3984_v59  ;;  %v2130_v59 = vsel %vm3219_vm4, %v2125_v12, %v2129_v61 }
 0x254   : > { %v2499_v28 = vadd.f32 %v2498_v15, %v2497_v27  ;;  %v2323_v1 = vpop.f32.mrf.mxu0  ;;  %v2272_v27 = vrot.slane %v383_v8, 5  ;;  %v2133_v35 = vunpack.c.l.b16 %v2130_v59 }
 0x255   : > { %2449 = vst.msk [vmem:[%s4121_s26 + $0x2c] sm:$0xf] %vm2437_vm8, %v2416_v49  ;;  %v2599_v40 = vsel %vm825_vm3, %v2557_v54, 0.0 }
 0x256   : > { %v2600_v53 = vadd.f32 %v2599_v40, %v2598_v16  ;;  %v2184_v23 = vpop.f32.mrf.mxu3  ;;  %v1897_v11 = vpop.f32.mrf.mxu1  ;;  %v2273_v8 = vsel %vm3522_vm7, %v2271_v45, %v2272_v27  ;;  %v2134_v37 = vpack.c.b16 %v2133_v35, %v2132_v32 }
 0x257   : > { %v2246_v44 = vadd.f32 %v2184_v23, %v2087_v24  ;;  %3036 = vmatmul.msk.bf16.gmra.mxu0 %vm825_vm3, %v1842_v3  ;;  %v2276_v39 = vunpack.c.l.b16 %v2273_v8  ;;  %v1956_v34 = vadd.f32 %v1897_v11, %v3991_v58 }
 0x259   : > { %v2385_v21 = vadd.f32 %v2323_v1, %v2246_v44  ;;  %v2027_v29 = vpop.f32.mrf.mxu2  ;;  %2984 = vmatmul.msk.bf16.gmra.mxu1 %vm825_vm3, %v1842_v3  ;;  %v2277_v54 = vpack.c.b16 %v2276_v39, %v2275_v42 }
 0x25a   : > { %v2088_v16 = vadd.f32 %v2027_v29, %v1955_v63 }
 0x25b   : > { %v2417_v2 = vpack.c.bf16 %v2385_v21, %v2385_v21  ;;  %v2500_v38 = vsel %vm825_vm3, %v2385_v21, 0.0  ;;  %v2558_v50 = vmul.f32 %v2385_v21, %v2385_v21 }
 0x25c   : > { %v2501_v55 = vadd.f32 %v2500_v38, %v2499_v28  ;;  %v2325_v0 = vpop.f32.mrf.mxu0 }
 0x25d   : > { %2450 = vst.msk [vmem:[%s4121_s26 + $0x30] sm:$0xf] %vm2437_vm8, %v2417_v2  ;;  %v2601_v62 = vsel %vm825_vm3, %v2558_v50, 0.0 }
 0x25e   : > { %v2602_v56 = vadd.f32 %v2601_v62, %v2600_v53  ;;  %v2186_v19 = vpop.f32.mrf.mxu3  ;;  %3004 = vmatmul.msk.bf16.gmra.mxu2 %vm825_vm3, %v3060_v43  ;;  %v1899_v26 = vpop.f32.mrf.mxu1 }
 0x25f   : > { %v2247_v41 = vadd.f32 %v2186_v19, %v2088_v16  ;;  %v1957_v53 = vadd.f32 %v1899_v26, %v3996_v30 }
 0x261   : > { %v2386_v51 = vadd.f32 %v2325_v0, %v2247_v41  ;;  %v2030_v10 = vpop.f32.mrf.mxu2 }
 0x262   : > { %v2089_v20 = vadd.f32 %v2030_v10, %v1956_v34 }
 0x263   : > { %v2418_v12 = vpack.c.bf16 %v2386_v51, %v2386_v51  ;;  %v2502_v61 = vsel %vm825_vm3, %v2386_v51, 0.0  ;;  %v2559_v49 = vmul.f32 %v2386_v51, %v2386_v51  ;;  %3020 = vmatmul.msk.bf16.gmra.mxu3 %vm825_vm3, %v2134_v37 }
 0x264   : > { %v2503_v15 = vadd.f32 %v2502_v61, %v2501_v55  ;;  %v2328_v28 = vpop.f32.mrf.mxu0 }
 0x265   : > { %2451 = vst.msk [vmem:[%s4121_s26 + $0x34] sm:$0xf] %vm2437_vm8, %v2418_v12  ;;  %v2603_v24 = vsel %vm825_vm3, %v2559_v49, 0.0 }
 0x266   : > { %v2604_v3 = vadd.f32 %v2603_v24, %v2602_v56  ;;  %v2189_v40 = vpop.f32.mrf.mxu3  ;;  %v1902_v1 = vpop.f32.mrf.mxu1 }
 0x267   : > { %v2248_v58 = vadd.f32 %v2189_v40, %v2089_v20  ;;  %3037 = vmatmul.msk.bf16.gmra.mxu0 %vm825_vm3, %v2277_v54  ;;  %v1958_v30 = vadd.f32 %v1902_v1, %v4005_v18 }
 0x269   : > { %v2387_v9 = vadd.f32 %v2328_v28, %v2248_v58  ;;  %v2032_v23 = vpop.f32.mrf.mxu2 }
 0x26a   : > { %v2090_v59 = vadd.f32 %v2032_v23, %v1957_v53 }
 0x26b   : > { %v2419_v11 = vpack.c.bf16 %v2387_v9, %v2387_v9  ;;  %v2504_v44 = vsel %vm825_vm3, %v2387_v9, 0.0  ;;  %v2560_v14 = vmul.f32 %v2387_v9, %v2387_v9 }
 0x26c   : > { %v2505_v46 = vadd.f32 %v2504_v44, %v2503_v15  ;;  %v2330_v63 = vpop.f32.mrf.mxu0 }
 0x26d   : > { %2452 = vst.msk [vmem:[%s4121_s26 + $0x38] sm:$0xf] %vm2437_vm8, %v2419_v11  ;;  %v2605_v21 = vsel %vm825_vm3, %v2560_v14, 0.0 }
 0x26e   : > { %v2606_v29 = vadd.f32 %v2605_v21, %v2604_v3  ;;  %v2191_v45 = vpop.f32.mrf.mxu3  ;;  %v1904_v27 = vpop.f32.mrf.mxu1 }
 0x26f   : > { %v2249_v43 = vadd.f32 %v2191_v45, %v2090_v59  ;;  %v1959_v18 = vadd.f32 %v1904_v27, %v4010_v13 }
 0x271   : > { %v2388_v32 = vadd.f32 %v2330_v63, %v2249_v43  ;;  %v2035_v35 = vpop.f32.mrf.mxu2 }
 0x272   : > { %v2091_v16 = vadd.f32 %v2035_v35, %v1958_v30 }
 0x273   : > { %v2420_v2 = vpack.c.bf16 %v2388_v32, %v2388_v32  ;;  %v2506_v38 = vsel %vm825_vm3, %v2388_v32, 0.0  ;;  %v2561_v50 = vmul.f32 %v2388_v32, %v2388_v32 }
 0x274   : > { %v2507_v55 = vadd.f32 %v2506_v38, %v2505_v46  ;;  %v2333_v0 = vpop.f32.mrf.mxu0 }
 0x275   : > { %2453 = vst.msk [vmem:[%s4121_s26 + $0x3c] sm:$0xf] %vm2437_vm8, %v2420_v2  ;;  %v2607_v62 = vsel %vm825_vm3, %v2561_v50, 0.0 }
 0x276   : > { %v2608_v4 = vadd.f32 %v2607_v62, %v2606_v29  ;;  %v2194_v8 = vpop.f32.mrf.mxu3  ;;  %v1907_v56 = vpop.f32.mrf.mxu1 }
 0x277   : > { %v2250_v19 = vadd.f32 %v2194_v8, %v2091_v16  ;;  %v1960_v13 = vadd.f32 %v1907_v56, %v4019_v52 }
 0x279   : > { %v2389_v26 = vadd.f32 %v2333_v0, %v2250_v19  ;;  %v2037_v41 = vpop.f32.mrf.mxu2 }
 0x27a   : > { %v2092_v51 = vadd.f32 %v2037_v41, %v1959_v18 }
 0x27b   : > { %v2421_v37 = vpack.c.bf16 %v2389_v26, %v2389_v26  ;;  %v2508_v42 = vsel %vm825_vm3, %v2389_v26, 0.0  ;;  %v2562_v39 = vmul.f32 %v2389_v26, %v2389_v26 }
 0x27c   : > { %v2509_v34 = vadd.f32 %v2508_v42, %v2507_v55  ;;  %v2335_v12 = vpop.f32.mrf.mxu0 }
 0x27d   : > { %2454 = vst.msk [vmem:[%s4121_s26 + $0x40] sm:$0xf] %vm2437_vm8, %v2421_v37  ;;  %v2609_v10 = vsel %vm825_vm3, %v2562_v39, 0.0 }
 0x27e   : > { %v2610_v61 = vadd.f32 %v2609_v10, %v2608_v4  ;;  %v2196_v49 = vpop.f32.mrf.mxu3  ;;  %v1909_v20 = vpop.f32.mrf.mxu1 }
 0x27f   : > { %v2251_v15 = vadd.f32 %v2196_v49, %v2092_v51  ;;  %v1961_v52 = vadd.f32 %v1909_v20, %v4024_v5 }
 0x281   : > { %v2390_v54 = vadd.f32 %v2335_v12, %v2251_v15  ;;  %v2040_v24 = vpop.f32.mrf.mxu2 }
 0x282   : > { %v2093_v1 = vadd.f32 %v2040_v24, %v1960_v13 }
 0x283   : > { %v2422_v28 = vpack.c.bf16 %v2390_v54, %v2390_v54  ;;  %v2510_v3 = vsel %vm825_vm3, %v2390_v54, 0.0  ;;  %v2563_v40 = vmul.f32 %v2390_v54, %v2390_v54 }
 0x284   : > { %v2511_v58 = vadd.f32 %v2510_v3, %v2509_v34  ;;  %v2338_v53 = vpop.f32.mrf.mxu0 }
 0x285   : > { %2455 = vst.msk [vmem:[%s4121_s26 + $0x44] sm:$0xf] %vm2437_vm8, %v2422_v28  ;;  %v2611_v9 = vsel %vm825_vm3, %v2563_v40, 0.0 }
 0x286   : > { %v2612_v23 = vadd.f32 %v2611_v9, %v2610_v61  ;;  %v2199_v11 = vpop.f32.mrf.mxu3  ;;  %v1912_v44 = vpop.f32.mrf.mxu1 }
 0x287   : > { %v2252_v14 = vadd.f32 %v2199_v11, %v2093_v1  ;;  %v1962_v5 = vadd.f32 %v1912_v44, %v4033_v60 }
 0x289   : > { %v2391_v59 = vadd.f32 %v2338_v53, %v2252_v14  ;;  %v2042_v46 = vpop.f32.mrf.mxu2 }
 0x28a   : > { %v2094_v45 = vadd.f32 %v2042_v46, %v1961_v52 }
 0x28b   : > { %v2423_v21 = vpack.c.bf16 %v2391_v59, %v2391_v59  ;;  %v2512_v63 = vsel %vm825_vm3, %v2391_v59, 0.0  ;;  %v2564_v29 = vmul.f32 %v2391_v59, %v2391_v59 }
 0x28c   : > { %v2513_v27 = vadd.f32 %v2512_v63, %v2511_v58  ;;  %v2340_v32 = vpop.f32.mrf.mxu0 }
 0x28d   : > { %2456 = vst.msk [vmem:[%s4121_s26 + $0x48] sm:$0xf] %vm2437_vm8, %v2423_v21  ;;  %v2613_v43 = vsel %vm825_vm3, %v2564_v29, 0.0 }
 0x28e   : > { %v2614_v30 = vadd.f32 %v2613_v43, %v2612_v23  ;;  %v2201_v35 = vpop.f32.mrf.mxu3  ;;  %v1914_v2 = vpop.f32.mrf.mxu1 }
 0x28f   : > { %v2253_v38 = vadd.f32 %v2201_v35, %v2094_v45  ;;  %v1963_v60 = vadd.f32 %v1914_v2, %v4038_v17 }
 0x291   : > { %v2392_v50 = vadd.f32 %v2340_v32, %v2253_v38  ;;  %v2045_v16 = vpop.f32.mrf.mxu2 }
 0x292   : > { %v2095_v4 = vadd.f32 %v2045_v16, %v1962_v5 }
 0x293   : > { %v2424_v55 = vpack.c.bf16 %v2392_v50, %v2392_v50  ;;  %v2514_v62 = vsel %vm825_vm3, %v2392_v50, 0.0  ;;  %v2565_v0 = vmul.f32 %v2392_v50, %v2392_v50 }
 0x294   : > { %v2515_v8 = vadd.f32 %v2514_v62, %v2513_v27  ;;  %v2343_v19 = vpop.f32.mrf.mxu0 }
 0x295   : > { %2457 = vst.msk [vmem:[%s4121_s26 + $0x4c] sm:$0xf] %vm2437_vm8, %v2424_v55  ;;  %v2615_v56 = vsel %vm825_vm3, %v2565_v0, 0.0 }
 0x296   : > { %v2616_v26 = vadd.f32 %v2615_v56, %v2614_v30  ;;  %v2204_v18 = vpop.f32.mrf.mxu3  ;;  %v1917_v41 = vpop.f32.mrf.mxu1 }
 0x297   : > { %v2254_v37 = vadd.f32 %v2204_v18, %v2095_v4  ;;  %v1964_v17 = vadd.f32 %v1917_v41, %v4047_v48 }
 0x299   : > { %v2393_v42 = vadd.f32 %v2343_v19, %v2254_v37  ;;  %v2047_v39 = vpop.f32.mrf.mxu2 }
 0x29a   : > { %v2096_v12 = vadd.f32 %v2047_v39, %v1963_v60 }
 0x29b   : > { %v2425_v51 = vpack.c.bf16 %v2393_v42, %v2393_v42  ;;  %v2516_v34 = vsel %vm825_vm3, %v2393_v42, 0.0  ;;  %v2566_v10 = vmul.f32 %v2393_v42, %v2393_v42 }
 0x29c   : > { %v2517_v61 = vadd.f32 %v2516_v34, %v2515_v8  ;;  %v2345_v20 = vpop.f32.mrf.mxu0 }
 0x29d   : > { %2458 = vst.msk [vmem:[%s4121_s26 + $0x50] sm:$0xf] %vm2437_vm8, %v2425_v51  ;;  %v2617_v49 = vsel %vm825_vm3, %v2566_v10, 0.0 }
 0x29e   : > { %v2618_v15 = vadd.f32 %v2617_v49, %v2616_v26  ;;  %v2206_v54 = vpop.f32.mrf.mxu3  ;;  %v1919_v13 = vpop.f32.mrf.mxu1 }
 0x29f   : > { %v2255_v24 = vadd.f32 %v2206_v54, %v2096_v12  ;;  %v1965_v48 = vadd.f32 %v1919_v13, %v4052_v33 }
 0x2a1   : > { %v2394_v28 = vadd.f32 %v2345_v20, %v2255_v24  ;;  %v2050_v3 = vpop.f32.mrf.mxu2 }
 0x2a2   : > { %v2097_v9 = vadd.f32 %v2050_v3, %v1964_v17 }
 0x2a3   : > { %v2426_v40 = vpack.c.bf16 %v2394_v28, %v2394_v28  ;;  %v2518_v1 = vsel %vm825_vm3, %v2394_v28, 0.0  ;;  %v2567_v58 = vmul.f32 %v2394_v28, %v2394_v28 }
 0x2a4   : > { %v2519_v53 = vadd.f32 %v2518_v1, %v2517_v61  ;;  %v2348_v11 = vpop.f32.mrf.mxu0 }
 0x2a5   : > { %2459 = vst.msk [vmem:[%s4121_s26 + $0x54] sm:$0xf] %vm2437_vm8, %v2426_v40  ;;  %v2619_v23 = vsel %vm825_vm3, %v2567_v58, 0.0 }
 0x2a6   : > { %v2620_v44 = vadd.f32 %v2619_v23, %v2618_v15  ;;  %v2209_v14 = vpop.f32.mrf.mxu3  ;;  %v1922_v59 = vpop.f32.mrf.mxu1 }
 0x2a7   : > { %v2256_v52 = vadd.f32 %v2209_v14, %v2097_v9  ;;  %v1966_v33 = vadd.f32 %v1922_v59, %v4061_v7 }
 0x2a9   : > { %v2395_v46 = vadd.f32 %v2348_v11, %v2256_v52  ;;  %v2052_v21 = vpop.f32.mrf.mxu2 }
 0x2aa   : > { %v2098_v27 = vadd.f32 %v2052_v21, %v1965_v48 }
 0x2ab   : > { %v2427_v63 = vpack.c.bf16 %v2395_v46, %v2395_v46  ;;  %v2520_v29 = vsel %vm825_vm3, %v2395_v46, 0.0  ;;  %v2568_v45 = vmul.f32 %v2395_v46, %v2395_v46 }
 0x2ac   : > { %v2521_v43 = vadd.f32 %v2520_v29, %v2519_v53  ;;  %v2350_v30 = vpop.f32.mrf.mxu0 }
 0x2ad   : > { %2460 = vst.msk [vmem:[%s4121_s26 + $0x58] sm:$0xf] %vm2437_vm8, %v2427_v63  ;;  %v2621_v32 = vsel %vm825_vm3, %v2568_v45, 0.0 }
 0x2ae   : > { %v2622_v35 = vadd.f32 %v2621_v32, %v2620_v44  ;;  %v2211_v2 = vpop.f32.mrf.mxu3  ;;  %v1924_v38 = vpop.f32.mrf.mxu1 }
 0x2af   : > { %v2257_v50 = vadd.f32 %v2211_v2, %v2098_v27  ;;  %v1967_v7 = vadd.f32 %v1924_v38, %v4066_v36 }
 0x2b1   : > { %v2396_v5 = vadd.f32 %v2350_v30, %v2257_v50  ;;  %v2055_v16 = vpop.f32.mrf.mxu2 }
 0x2b2   : > { %v2099_v4 = vadd.f32 %v2055_v16, %v1966_v33 }
 0x2b3   : > { %v2428_v55 = vpack.c.bf16 %v2396_v5, %v2396_v5  ;;  %v2522_v62 = vsel %vm825_vm3, %v2396_v5, 0.0  ;;  %v2569_v0 = vmul.f32 %v2396_v5, %v2396_v5 }
 0x2b4   : > { %v2523_v8 = vadd.f32 %v2522_v62, %v2521_v43  ;;  %v2353_v19 = vpop.f32.mrf.mxu0 }
 0x2b5   : > { %2461 = vst.msk [vmem:[%s4121_s26 + $0x5c] sm:$0xf] %vm2437_vm8, %v2428_v55  ;;  %v2623_v56 = vsel %vm825_vm3, %v2569_v0, 0.0 }
 0x2b6   : > { %v2624_v26 = vadd.f32 %v2623_v56, %v2622_v35  ;;  %v2214_v18 = vpop.f32.mrf.mxu3  ;;  %v1927_v41 = vpop.f32.mrf.mxu1 }
 0x2b7   : > { %v2258_v37 = vadd.f32 %v2214_v18, %v2099_v4  ;;  %v1968_v36 = vadd.f32 %v1927_v41, %v4075_v6 }
 0x2b9   : > { %v2397_v42 = vadd.f32 %v2353_v19, %v2258_v37  ;;  %v2057_v60 = vpop.f32.mrf.mxu2 }
 0x2ba   : > { %v2100_v10 = vadd.f32 %v2057_v60, %v1967_v7 }
 0x2bb   : > { %v2429_v39 = vpack.c.bf16 %v2397_v42, %v2397_v42  ;;  %v2524_v51 = vsel %vm825_vm3, %v2397_v42, 0.0  ;;  %v2570_v34 = vmul.f32 %v2397_v42, %v2397_v42 }
 0x2bc   : > { %v2525_v12 = vadd.f32 %v2524_v51, %v2523_v8  ;;  %v2355_v49 = vpop.f32.mrf.mxu0  ;;  %v3125_v8 = vmov 0.0  }
 0x2bd   : > { %2462 = vst.msk [vmem:[%s4121_s26 + $0x60] sm:$0xf] %vm2437_vm8, %v2429_v39  ;;  %v2625_v61 = vsel %vm825_vm3, %v2570_v34, 0.0 }
 0x2be   : > { %v2626_v20 = vadd.f32 %v2625_v61, %v2624_v26  ;;  %v2216_v15 = vpop.f32.mrf.mxu3  ;;  %v1929_v54 = vpop.f32.mrf.mxu1  ;;  %2475 = vst.msk [vmem:[%s4341_s30] sm:$0x3] %vm2474_vm9, %v3125_v8 }
 0x2bf   : > { %v2259_v13 = vadd.f32 %v2216_v15, %v2100_v10  ;;  %v1969_v6 = vadd.f32 %v1929_v54, %v4080_v25 }
 0x2c1   : > { %v2398_v24 = vadd.f32 %v2355_v49, %v2259_v13  ;;  %v2060_v28 = vpop.f32.mrf.mxu2 }
 0x2c2   : > { %v2101_v1 = vadd.f32 %v2060_v28, %v1968_v36 }
 0x2c3   : > { %v2430_v17 = vpack.c.bf16 %v2398_v24, %v2398_v24  ;;  %v2526_v3 = vsel %vm825_vm3, %v2398_v24, 0.0  ;;  %v2571_v40 = vmul.f32 %v2398_v24, %v2398_v24 }
 0x2c4   : > { %v2527_v58 = vadd.f32 %v2526_v3, %v2525_v12  ;;  %v2358_v53 = vpop.f32.mrf.mxu0 }
 0x2c5   : > { %2463 = vst.msk [vmem:[%s4121_s26 + $0x64] sm:$0xf] %vm2437_vm8, %v2430_v17  ;;  %v2627_v9 = vsel %vm825_vm3, %v2571_v40, 0.0 }
 0x2c6   : > { %v2628_v23 = vadd.f32 %v2627_v9, %v2626_v20  ;;  %v2219_v11 = vpop.f32.mrf.mxu3  ;;  %v1932_v14 = vpop.f32.mrf.mxu1 }
 0x2c7   : > { %v2260_v44 = vadd.f32 %v2219_v11, %v2101_v1  ;;  %v1970_v25 = vadd.f32 %v1932_v14, %v4089_v22 }
 0x2c9   : > { %v2399_v59 = vadd.f32 %v2358_v53, %v2260_v44  ;;  %v2062_v52 = vpop.f32.mrf.mxu2 }
 0x2ca   : > { %v2102_v63 = vadd.f32 %v2062_v52, %v1969_v6 }
 0x2cb   : > { %v2431_v46 = vpack.c.bf16 %v2399_v59, %v2399_v59  ;;  %v2528_v48 = vsel %vm825_vm3, %v2399_v59, 0.0  ;;  %v2572_v21 = vmul.f32 %v2399_v59, %v2399_v59 }
 0x2cc   : > { %v2529_v29 = vadd.f32 %v2528_v48, %v2527_v58  ;;  %v2360_v27 = vpop.f32.mrf.mxu0 }
 0x2cd   : > { %2464 = vst.msk [vmem:[%s4121_s26 + $0x68] sm:$0xf] %vm2437_vm8, %v2431_v46  ;;  %v2629_v45 = vsel %vm825_vm3, %v2572_v21, 0.0 }
 0x2ce   : > { %v2630_v43 = vadd.f32 %v2629_v45, %v2628_v23  ;;  %v2221_v32 = vpop.f32.mrf.mxu3  ;;  %v1934_v38 = vpop.f32.mrf.mxu1 }
 0x2cf   : > { %v2261_v30 = vadd.f32 %v2221_v32, %v2102_v63  ;;  %v1971_v26 = vadd.f32 %v1934_v38, %v4094_v31 }
 0x2d1   : > { %v2400_v35 = vadd.f32 %v2360_v27, %v2261_v30  ;;  %v2065_v2 = vpop.f32.mrf.mxu2 }
 0x2d2   : > { %v2103_v16 = vadd.f32 %v2065_v2, %v1970_v25 }
 0x2d3   : > { %v2432_v50 = vpack.c.bf16 %v2400_v35, %v2400_v35  ;;  %v2530_v5 = vsel %vm825_vm3, %v2400_v35, 0.0  ;;  %v2573_v33 = vmul.f32 %v2400_v35, %v2400_v35 }
 0x2d4   : > { %v2531_v55 = vadd.f32 %v2530_v5, %v2529_v29  ;;  %v2363_v0 = vpop.f32.mrf.mxu0 }
 0x2d5   : > { %2465 = vst.msk [vmem:[%s4121_s26 + $0x6c] sm:$0xf] %vm2437_vm8, %v2432_v50  ;;  %v2631_v62 = vsel %vm825_vm3, %v2573_v33, 0.0 }
 0x2d6   : > { %v2632_v22 = vadd.f32 %v2631_v62, %v2630_v43  ;;  %v2224_v4 = vpop.f32.mrf.mxu3  ;;  %v1937_v60 = vpop.f32.mrf.mxu1  ;;  %v2476_v62 = vld [vmem:[%s4341_s30] sm:$0x3] }
 0x2d7   : > { %v2262_v56 = vadd.f32 %v2224_v4, %v2103_v16  ;;  %v1972_v31 = vadd.f32 %v1937_v60, %v4103_v57 }
 0x2d9   : > { %v2401_v19 = vadd.f32 %v2363_v0, %v2262_v56  ;;  %v2067_v18 = vpop.f32.mrf.mxu2 }
 0x2da   : > { %v2104_v7 = vadd.f32 %v2067_v18, %v1971_v26 }
 0x2db   : > { %v2433_v41 = vpack.c.bf16 %v2401_v19, %v2401_v19  ;;  %v2532_v37 = vsel %vm825_vm3, %v2401_v19, 0.0  ;;  %v2574_v42 = vmul.f32 %v2401_v19, %v2401_v19 }
 0x2dc   : > { %v2533_v39 = vadd.f32 %v2532_v37, %v2531_v55  ;;  %v2365_v34 = vpop.f32.mrf.mxu0 }
 0x2dd   : > { %2466 = vst.msk [vmem:[%s4121_s26 + $0x70] sm:$0xf] %vm2437_vm8, %v2433_v41  ;;  %v2633_v51 = vsel %vm825_vm3, %v2574_v42, 0.0 }
 0x2de   : > { %v2634_v10 = vadd.f32 %v2633_v51, %v2632_v22  ;;  %v2226_v12 = vpop.f32.mrf.mxu3  ;;  %v1939_v17 = vpop.f32.mrf.mxu1 }
 0x2df   : > { %v2263_v61 = vadd.f32 %v2226_v12, %v2104_v7  ;;  %v1973_v57 = vadd.f32 %v1939_v17, %v4108_v47 }
 0x2e1   : > { %v2402_v49 = vadd.f32 %v2365_v34, %v2263_v61  ;;  %v2070_v20 = vpop.f32.mrf.mxu2 }
 0x2e2   : > { %v2105_v24 = vadd.f32 %v2070_v20, %v1972_v31 }
 0x2e3   : > { %v2434_v15 = vpack.c.bf16 %v2402_v49, %v2402_v49  ;;  %v2534_v54 = vsel %vm825_vm3, %v2402_v49, 0.0  ;;  %v2575_v13 = vmul.f32 %v2402_v49, %v2402_v49 }
 0x2e4   : > { %v2535_v36 = vadd.f32 %v2534_v54, %v2533_v39  ;;  %v2368_v40 = vpop.f32.mrf.mxu0 }
 0x2e5   : > { %2467 = vst.msk [vmem:[%s4121_s26 + $0x74] sm:$0xf] %vm2437_vm8, %v2434_v15  ;;  %v2635_v28 = vsel %vm825_vm3, %v2575_v13, 0.0 }
 0x2e6   : > { %v2636_v3 = vadd.f32 %v2635_v28, %v2634_v10  ;;  %v2229_v1 = vpop.f32.mrf.mxu3 }
 0x2e7   : > { %v2264_v58 = vadd.f32 %v2229_v1, %v2105_v24 }
 0x2e9   : > { %v2403_v9 = vadd.f32 %v2368_v40, %v2264_v58  ;;  %v2072_v53 = vpop.f32.mrf.mxu2 }
 0x2ea   : > { %v2106_v14 = vadd.f32 %v2072_v53, %v1973_v57 }
 0x2eb   : > { %v2435_v23 = vpack.c.bf16 %v2403_v9, %v2403_v9  ;;  %v2536_v11 = vsel %vm825_vm3, %v2403_v9, 0.0  ;;  %v2576_v44 = vmul.f32 %v2403_v9, %v2403_v9 }
 0x2ec   : > { %v2537_v59 = vadd.f32 %v2536_v11, %v2535_v36  ;;  %v2370_v21 = vpop.f32.mrf.mxu0 }
 0x2ed   : > { %2468 = vst.msk [vmem:[%s4121_s26 + $0x78] sm:$0xf] %vm2437_vm8, %v2435_v23  ;;  %v2637_v6 = vsel %vm825_vm3, %v2576_v44, 0.0 }
 0x2ee   : > { %v2638_v52 = vadd.f32 %v2637_v6, %v2636_v3  ;;  %v2231_v46 = vpop.f32.mrf.mxu3 }
 0x2ef   : > { %v2265_v48 = vadd.f32 %v2231_v46, %v2106_v14 }
 0x2f1   : > { %v2404_v63 = vadd.f32 %v2370_v21, %v2265_v48 }
 0x2f3   : > { %v2436_v29 = vpack.c.bf16 %v2404_v63, %v2404_v63  ;;  %v2538_v47 = vsel %vm825_vm3, %v2404_v63, 0.0  ;;  %v2577_v45 = vmul.f32 %v2404_v63, %v2404_v63 }
 0x2f4   : > { %v2539_v27 = vadd.f32 %v2538_v47, %v2537_v59 }
 0x2f5   : > { %2469 = vst.msk [vmem:[%s4121_s26 + $0x7c] sm:$0xf] %vm2437_vm8, %v2436_v29  ;;  %v2639_v43 = vsel %vm825_vm3, %v2577_v45, 0.0 }
 0x2f6   : > { %v2540_v32 = vrot.slane %v2539_v27, 4  ;;  %v2640_v30 = vadd.f32 %v2639_v43, %v2638_v52 }
 0x2f8   : > { %v2541_v35 = vadd.f32 %v2540_v32, %v2539_v27  ;;  %v2641_v25 = vrot.slane %v2640_v30, 4 }
 0x2fa   : > { %v2542_v2 = vrot.slane %v2541_v35, 2  ;;  %v2642_v38 = vadd.f32 %v2641_v25, %v2640_v30 }
 0x2fc   : > { %v2543_v50 = vadd.f32 %v2542_v2, %v2541_v35  ;;  %v2643_v5 = vrot.slane %v2642_v38, 2 }
 0x2fe   : > { %v2544_v33 = vrot.slane %v2543_v50, 1  ;;  %v2644_v16 = vadd.f32 %v2643_v5, %v2642_v38 }
 0x300   : > { %v2645_v55 = vrot.slane %v2644_v16, 1  ;;  %v2545_v0 = vadd.f32 %v2544_v33, %v2543_v50 }
 0x302   : > { %v2646_v22 = vadd.f32 %v2645_v55, %v2644_v16 }
 0x304   : > { %v2648_v4 = vsel %vm2647_vm10, %v2545_v0, %v2646_v22 }
 0x305   : > { %v2649_v8 = vadd.f32 %v2648_v4, %v2476_v62 }
 0x307   : > { %2651 = vst.msk [vmem:[%s4341_s30] sm:$0x3] %vm2474_vm9, %v2649_v8 }
 0x308 PF: > { %s15_s17 = sadd.s32 1, %s3123_s17   ;;  %s4522_s15 = smov %s3119_s16 }
 0x309   : > { %p12_p5 = scmp.ge.s32.totalorder %s15_s17, 4   ;;  %s4523_s16 = smov %s4525_s18 }
 0x30b   :  { %14 = sbr.rel (!%p12_p5) target bundleno = 2 (0x2), region = 81 }

// kernel: resblock_forward.4
= control target key start
LH: loop header
LB: loop body
LE: loop exit
PB: predicated region body
PF: predicated region fallthrough
CT: control target
= control target key end

     0   :  { %s3443_s21 = smov 0   ;;  %s3445_s22 = smov 0   ;;  %s4839_s0 = inlined_call_operand.vmem [shape: bf16[2,18,18,4], index: 0, kind: input, shape index: {}, may-alias: {0,1}]   ;;  %s4840_s1 = inlined_call_operand.vmem [shape: bf16[2,18,18,4], index: 1, kind: input, shape index: {}, may-alias: {0,1}]   ;;  %s4841_s2 = inlined_call_operand.vmem [shape: bf16[36,4], index: 2, kind: input, shape index: {}]   ;;  %s4842_s3 = inlined_call_operand.vmem [shape: f32[1,4], index: 3, kind: input, shape index: {}]   ;;  %s4843_s4 = inlined_call_operand.vmem [shape: f32[1,4], index: 4, kind: input, shape index: {}]   ;;  %s4844_s5 = inlined_call_operand.vmem [shape: bf16[2,256,4], index: 5, kind: output, shape index: {0}]   ;;  %s4845_s6 = inlined_call_operand.vmem [shape: f32[2,2,4], index: 6, kind: output, shape index: {1}]  }
   0x1   :  { %s3447_s23 = smov 0  }
   0x2 LB: > { %s29_s24 = sadd.s32 1, %s3401_s22  ;;  %p3130_p0 = scmp.ge.s32.totalorder %s3405_s23, 1  ;;  %s3405_s23 = sphi %s3447_s23, %s17_s23   ;;  %s3401_s22 = sphi %s3445_s22, %s5034_s22   ;;  %s3397_s21 = sphi %s3443_s21, %s5033_s21  }
   0x3   : > { %p31_p1 = scmp.ge.s32.totalorder %s29_s24, 2  ;;  %p273_p2 = scmp.lt.s32.totalorder %s3405_s23, 3 }
   0x5   : > { %s5036_s24 = smov (%p31_p1, %s29_s24), 0  ;;  %p274_p3 = pnand %p3130_p0, %p273_p2 }
   0x7   : > { %277 = sbr.rel (%p274_p3) target bundleno = 836 (0x344), region = 40 }
   0xc   : > { %v1104_v0 = vld [vmem:[%s4841_s2] sm:$0xc]  ;;  %p339_p4 = scmp.lt.s32.totalorder %s3397_s21, 1  ;;  %vm1206_vm0 = vcmask 1041408   ;;  %v3477_v4 = vld [vmem:[%s4842_s3] ss:$0 sm:$0xff] }
   0xd   : > { %v1154_v1 = vunpack.c.l.b16 %v1104_v0  ;;  %v3482_v5 = vld [vmem:[%s4843_s4] ss:$0 sm:$0xff]  ;;  %vm717_vm1 = vsmask.f32 3328  ;;  %vm718_vm2 = vsmask.f32 7440 }
   0xe   : > { %s5038_s21 = smov (!%p339_p4, %s3397_s21), 1  ;;  %vm1157_vm3 = vcmask 31744   ;;  %vm3533_vm4 = vmor %vm717_vm1, %vm718_vm2  ;;  %vm1535_vm5 = vcmask 1042432   ;;  %vm1536_vm6 = vcmask 1046532   ;;  %vm2769_vm8 = vcmask 27648  }
   0xf   : > { %v1155_v2 = vpack.c.b16 %v1154_v1, %v1154_v1  ;;  %s3349_s27 = smul.u32 216, %s5038_s21  ;;  %vm3927_vm7 = vmor %vm1535_vm5, %vm1536_vm6  ;;  %s3135_s28 = sshll.u32 %s5038_s21, 1  ;;  %vm2806_vm9 = vcmask 25600   ;;  %vm2979_vm10 = vcmask 1040384  }
  0x10   : > { %s4801_s7 = scalar_lea.vmem %s4845_s6, %s3135_s28 }
  0x11   : > { %v1156_v3 = vrot.slane %v1155_v2, 2  ;;  %s3472_s30 = scalar_lea.vmem %s4839_s0, %s3349_s27  ;;  %s3301_s12 = sadd.s32 192, %s3349_s27 }
  0x12   : > { %v3340_v7 = vld [vmem:[%s3472_s30 + $0x30] sm:$0xff]   ;;  %v398_v8 = vld [vmem:[%s3472_s30 + $0x38] sm:$0x1]  ;;  %v3342_v9 = vld [vmem:[%s3472_s30 + $0x60] sm:$0xff]   ;;  %s4335_s15 = scalar_lea.vmem %s4840_s1, %s3301_s12  ;;  %s3302_s27 = sshll.u32 %s5038_s21, 7 }
  0x13   : > { %v1208_v6 = vsel %vm1206_vm0, %v1156_v3, 0  ;;  %v3313_v10 = vunpack.c.l.bf16 %v3340_v7  ;;  %v3314_v11 = vunpack.c.h.bf16 %v3340_v7  ;;  %v452_v12 = vunpack.c.l.bf16 %v398_v8  ;;  %v410_v14 = vld [vmem:[%s3472_s30 + $0x68] sm:$0x1]  ;;  %v3344_v15 = vld [vmem:[%s3472_s30 + $0x90] sm:$0xff]   ;;  %v422_v16 = vld [vmem:[%s3472_s30 + $0x98] sm:$0x1]  ;;  %s4566_s18 = scalar_lea.vmem %s4844_s5, %s3302_s27 }
  0x14   : > { %3346 = vmatpush.bf16.msra.mxu1 %v1208_v6  ;;  %3347 = vmatpush.bf16.msra.mxu2 %v1208_v6  ;;  %v3321_v13 = vunpack.c.l.bf16 %v3342_v9  ;;  %v3322_v17 = vunpack.c.h.bf16 %v3342_v9  ;;  %v464_v18 = vunpack.c.l.bf16 %v410_v14  ;;  %v3329_v19 = vunpack.c.l.bf16 %v3344_v15 }
  0x15   : > { %3348 = vmatpush.bf16.msra.mxu3 %v1208_v6  ;;  %1217 = vmatpush.bf16.msra.mxu0 %v1208_v6  ;;  %v3330_v20 = vunpack.c.h.bf16 %v3344_v15  ;;  %v509_v21 = vmul.f32 %v3477_v4, %v3313_v10  ;;  %v510_v22 = vmul.f32 %v3477_v4, %v3314_v11  ;;  %v511_v23 = vmul.f32 %v3477_v4, %v452_v12 }
  0x16   : > { %v521_v24 = vmul.f32 %v3477_v4, %v3321_v13  ;;  %v522_v25 = vmul.f32 %v3477_v4, %v3322_v17  ;;  %v523_v26 = vmul.f32 %v3477_v4, %v464_v18  ;;  %v476_v27 = vunpack.c.l.bf16 %v422_v16 }
  0x17   : > { %v533_v28 = vmul.f32 %v3477_v4, %v3329_v19  ;;  %v566_v29 = vadd.f32 %v3482_v5, %v509_v21  ;;  %v567_v30 = vadd.f32 %v3482_v5, %v510_v22  ;;  %v568_v31 = vadd.f32 %v3482_v5, %v511_v23 }
  0x18   : > { %v578_v32 = vadd.f32 %v3482_v5, %v521_v24  ;;  %v579_v33 = vadd.f32 %v3482_v5, %v522_v25  ;;  %v580_v34 = vadd.f32 %v3482_v5, %v523_v26  ;;  %v534_v35 = vmul.f32 %v3477_v4, %v3330_v20 }
  0x19   : > { %v535_v36 = vmul.f32 %v3477_v4, %v476_v27  ;;  %v620_v37 = vmax.f32 %v566_v29, 0.0  ;;  %v621_v38 = vmax.f32 %v567_v30, 0.0  ;;  %v622_v39 = vmax.f32 %v568_v31, 0.0 }
  0x1a   : > { %v632_v40 = vmax.f32 %v578_v32, 0.0  ;;  %v633_v41 = vmax.f32 %v579_v33, 0.0  ;;  %v634_v42 = vmax.f32 %v580_v34, 0.0  ;;  %v590_v43 = vadd.f32 %v3482_v5, %v533_v28  ;;  %v1650_v28 = vld [vmem:[%s4841_s2 + $0x4] sm:$0x3] }
  0x1b   : > { %v591_v44 = vadd.f32 %v3482_v5, %v534_v35  ;;  %v3508_v45 = vpack.c.bf16 %v620_v37, %v620_v37  ;;  %v3510_v46 = vpack.c.bf16 %v621_v38, %v621_v38  ;;  %v3512_v47 = vpack.c.bf16 %v622_v39, %v622_v39  ;;  %v3304_v33 = vld [vmem:[%s3472_s30] sm:$0xff]   ;;  %v386_v38 = vld [vmem:[%s3472_s30 + $0x8] sm:$0x1] }
  0x1c   : > { %v3514_v48 = vpack.c.bf16 %v632_v40, %v632_v40  ;;  %v3516_v49 = vpack.c.bf16 %v633_v41, %v633_v41  ;;  %v3518_v50 = vpack.c.bf16 %v634_v42, %v634_v42  ;;  %v592_v51 = vadd.f32 %v3482_v5, %v535_v36 }
  0x1d   : > { %v644_v52 = vmax.f32 %v590_v43, 0.0  ;;  %v817_v53 = vshrl.u32 %v3508_v45, 16  ;;  %v820_v54 = vshll.u32 %v3508_v45, 16  ;;  %v826_v55 = vshll.u32 %v3510_v46, 16  ;;  %v1871_v43 = vld [vmem:[%s4841_s2 + $0x4] sm:$0xc] }
  0x1e   : > { %v830_v56 = vshrl.u32 %v3510_v46, 16  ;;  %v836_v57 = vshll.u32 %v3512_v47, 16  ;;  %v913_v58 = vshrl.u32 %v3514_v48, 16  ;;  %v916_v59 = vshll.u32 %v3514_v48, 16 }
  0x1f   : > { %v922_v60 = vshll.u32 %v3516_v49, 16  ;;  %v819_v61 = vrot.slane %v817_v53, 4  ;;  %v822_v62 = vrot.slane %v820_v54, 5  ;;  %v828_v63 = vrot.slane %v826_v55, 5  ;;  %v716_v54 = vld [vmem:[%s4841_s2] sm:$0x3] }
  0x20   : > { %v832_v0 = vrot.slane %v830_v56, 4  ;;  %v838_v1 = vrot.slane %v836_v57, 5  ;;  %v915_v2 = vrot.slane %v913_v58, 4  ;;  %v918_v3 = vrot.slane %v916_v59, 5 }
  0x21   : > { %v924_v6 = vrot.slane %v922_v60, 5  ;;  %v823_v7 = vor.u32 %v822_v62, %v819_v61  ;;  %v926_v9 = vshrl.u32 %v3516_v49, 16  ;;  %v932_v10 = vshll.u32 %v3518_v50, 16 }
  0x22   : > { %v833_v8 = vor.u32 %v832_v0, %v828_v63  ;;  %v919_v12 = vor.u32 %v918_v3, %v915_v2  ;;  %v645_v13 = vmax.f32 %v591_v44, 0.0  ;;  %v646_v14 = vmax.f32 %v592_v51, 0.0 }
  0x23   : > { %v3537_v15 = vpack.c.bf16 %v644_v52, %v644_v52  ;;  %v824_v16 = vrot.slane %v823_v7, 4  ;;  %v928_v18 = vrot.slane %v926_v9, 4  ;;  %v934_v19 = vrot.slane %v932_v10, 5 }
  0x24   : > { %v834_v17 = vrot.slane %v833_v8, 4  ;;  %v920_v20 = vrot.slane %v919_v12, 4  ;;  %v3539_v21 = vpack.c.bf16 %v645_v13, %v645_v13  ;;  %v3541_v22 = vpack.c.bf16 %v646_v14, %v646_v14  ;;  %v401_v12 = vld [vmem:[%s3472_s30 + $0x44] sm:$0x1] }
  0x25   : > { %4911 = vst [vmem:[#allocation2_spill] sm:$0xff] %v3537_v15  ;;  %v1009_v23 = vshrl.u32 %v3537_v15, 16  ;;  %v829_v24 = vsel %vm3533_vm4, %v824_v16, %v828_v63  ;;  %v929_v26 = vor.u32 %v928_v18, %v924_v6  ;;  %v1012_v27 = vshll.u32 %v3537_v15, 16  ;;  %v2032_v63 = vld [vmem:[%s4841_s2 + $0x8] sm:$0x3] }
  0x26   : > { %4912 = vst [vmem:[#allocation3_spill] sm:$0xff] %v3539_v21  ;;  %v839_v25 = vsel %vm3533_vm4, %v834_v17, %v838_v1  ;;  %v1113_v29 = vunpack.c.l.b16 %v829_v24  ;;  %v925_v31 = vsel %vm3533_vm4, %v920_v20, %v924_v6  ;;  %v1018_v37 = vshll.u32 %v3539_v21, 16  ;;  %v399_v6 = vld [vmem:[%s3472_s30 + $0x3c] sm:$0xff]  }
  0x27   : > { %4913 = vst [vmem:[#allocation4_spill] sm:$0xff] %v3541_v22  ;;  %v1114_v30 = vunpack.c.l.b16 %v839_v25  ;;  %v1011_v32 = vrot.slane %v1009_v23, 4  ;;  %v930_v34 = vrot.slane %v929_v26, 4  ;;  %v1121_v35 = vunpack.c.l.b16 %v925_v31 }
  0x28   : > { %v1014_v36 = vrot.slane %v1012_v27, 5  ;;  %v1022_v40 = vshrl.u32 %v3539_v21, 16  ;;  %v1028_v41 = vshll.u32 %v3541_v22, 16  ;;  %v1748_v42 = vsel %vm1206_vm0, %v1650_v28, 0 }
  0x29   : > { %v3557_v39 = vpack.c.b16 %v1114_v30, %v1113_v29  ;;  %v935_v44 = vsel %vm3533_vm4, %v930_v34, %v934_v19  ;;  %v1020_v52 = vrot.slane %v1018_v37, 5  ;;  %1757 = vmatpush.bf16.msrb.mxu2 %v1748_v42  ;;  %v3305_v53 = vunpack.c.l.bf16 %v3304_v33 }
  0x2a   : > { %v1015_v51 = vor.u32 %v1014_v36, %v1011_v32  ;;  %v1122_v55 = vunpack.c.l.b16 %v935_v44  ;;  %v1024_v56 = vrot.slane %v1022_v40, 4  ;;  %v1030_v57 = vrot.slane %v1028_v41, 5 }
  0x2b   : > { %3140 = vmatmul.msk.bf16.vlgmr.msra.gmra.mxu1 %vm1157_vm3, %v3557_v39  ;;  %v3306_v58 = vunpack.c.h.bf16 %v3304_v33  ;;  %v440_v60 = vunpack.c.l.bf16 %v386_v38  ;;  %v497_v61 = vmul.f32 %v3477_v4, %v3305_v53  ;;  %v1878_v62 = vunpack.c.l.b16 %v1871_v43 }
  0x2c   : > { %v1016_v59 = vrot.slane %v1015_v51, 4  ;;  %v3576_v0 = vpack.c.b16 %v1122_v55, %v1121_v35  ;;  %v1025_v1 = vor.u32 %v1024_v56, %v1020_v52  ;;  %v1428_v3 = vsel %vm1206_vm0, %v716_v54, 0  ;;  %v411_v51 = vld [vmem:[%s3472_s30 + $0x6c] sm:$0xff]  }
  0x2d   : > { %v498_v2 = vmul.f32 %v3477_v4, %v3306_v58  ;;  %v499_v8 = vmul.f32 %v3477_v4, %v440_v60  ;;  %v554_v9 = vadd.f32 %v3482_v5, %v497_v61  ;;  %v1879_v10 = vpack.c.b16 %v1878_v62, %v1878_v62  ;;  %1437 = vmatpush.bf16.msrb.mxu1 %v1428_v3  ;;  %v413_v60 = vld [vmem:[%s3472_s30 + $0x74] sm:$0x1] }
  0x2e   : > { %4914 = vst [vmem:[#allocation5_spill] sm:$0xff] %v3576_v0  ;;  %v1021_v7 = vsel %vm3533_vm4, %v1016_v59, %v1020_v52  ;;  %3144 = vmatmul.msk.bf16.vlgmr.msra.gmra.mxu2 %vm1157_vm3, %v3576_v0  ;;  %v1026_v13 = vrot.slane %v1025_v1, 4  ;;  %v2040_v17 = vsel %vm1206_vm0, %v2032_v63, 0  ;;  %v453_v23 = vunpack.c.l.bf16 %v399_v6 }
  0x2f   : > { %v1129_v14 = vunpack.c.l.b16 %v1021_v7  ;;  %v555_v16 = vadd.f32 %v3482_v5, %v498_v2  ;;  %v556_v18 = vadd.f32 %v3482_v5, %v499_v8  ;;  %v608_v19 = vmax.f32 %v554_v9, 0.0  ;;  %2049 = vmatpush.bf16.msrb.mxu0 %v2040_v17 }
  0x30   : > { %v1880_v20 = vrot.slane %v1879_v10, 2  ;;  %v1031_v24 = vsel %vm3533_vm4, %v1026_v13, %v1030_v57  ;;  %v454_v26 = vunpack.c.h.bf16 %v399_v6  ;;  %v455_v27 = vunpack.c.l.bf16 %v401_v12 }
  0x31   : > { %v609_v25 = vmax.f32 %v555_v16, 0.0  ;;  %v1130_v28 = vunpack.c.l.b16 %v1031_v24  ;;  %v610_v29 = vmax.f32 %v556_v18, 0.0  ;;  %v3593_v30 = vpack.c.bf16 %v608_v19, %v608_v19 }
  0x32   : > { %v1885_v31 = vsel %vm1206_vm0, %v1880_v20, 0  ;;  %v512_v33 = vmul.f32 %v3477_v4, %v453_v23  ;;  %v513_v34 = vmul.f32 %v3477_v4, %v454_v26  ;;  %v514_v35 = vmul.f32 %v3477_v4, %v455_v27 }
  0x33   : > { %v3596_v32 = vpack.c.bf16 %v609_v25, %v609_v25  ;;  %1894 = vmatpush.bf16.msrb.mxu3 %v1885_v31  ;;  %v3601_v36 = vpack.c.b16 %v1130_v28, %v1129_v14  ;;  %v3603_v37 = vpack.c.bf16 %v610_v29, %v610_v29  ;;  %v721_v38 = vshrl.u32 %v3593_v30, 16  ;;  %v423_v28 = vld [vmem:[%s3472_s30 + $0x9c] sm:$0xff]  }
  0x34   : > { %v724_v40 = vshll.u32 %v3593_v30, 16  ;;  %v569_v43 = vadd.f32 %v3482_v5, %v512_v33  ;;  %v570_v44 = vadd.f32 %v3482_v5, %v513_v34  ;;  %v571_v55 = vadd.f32 %v3482_v5, %v514_v35 }
  0x35   : > { %4915 = vst [vmem:[#allocation6_spill] sm:$0xff] %v3601_v36  ;;  %v730_v41 = vshll.u32 %v3596_v32, 16  ;;  %v734_v42 = vshrl.u32 %v3596_v32, 16  ;;  %3148 = vmatmul.msk.bf16.vlgmr.msra.gmra.mxu3 %vm1157_vm3, %v3601_v36  ;;  %v723_v52 = vrot.slane %v721_v38, 4  ;;  %v740_v54 = vshll.u32 %v3603_v37, 16 }
  0x36   : > { %v726_v53 = vrot.slane %v724_v40, 5  ;;  %v623_v58 = vmax.f32 %v569_v43, 0.0  ;;  %v624_v59 = vmax.f32 %v570_v44, 0.0  ;;  %v625_v63 = vmax.f32 %v571_v55, 0.0 }
  0x37   : > { %v732_v56 = vrot.slane %v730_v41, 5  ;;  %v736_v57 = vrot.slane %v734_v42, 4  ;;  %v742_v62 = vrot.slane %v740_v54, 5  ;;  %v465_v1 = vunpack.c.l.bf16 %v411_v51  ;;  %v425_v42 = vld [vmem:[%s3472_s30 + $0xa4] sm:$0x1] }
  0x38   : > { %v727_v61 = vor.u32 %v726_v53, %v723_v52  ;;  %v3617_v3 = vpack.c.bf16 %v623_v58, %v623_v58  ;;  %v3619_v6 = vpack.c.bf16 %v624_v59, %v624_v59  ;;  %v466_v7 = vunpack.c.h.bf16 %v411_v51 }
  0x39   : > { %v737_v2 = vor.u32 %v736_v57, %v732_v56  ;;  %v3621_v9 = vpack.c.bf16 %v625_v63, %v625_v63  ;;  %v467_v10 = vunpack.c.l.bf16 %v413_v60  ;;  %v524_v12 = vmul.f32 %v3477_v4, %v465_v1 }
  0x3a   : > { %v728_v8 = vrot.slane %v727_v61, 4  ;;  %v841_v14 = vshrl.u32 %v3617_v3, 16  ;;  %v844_v16 = vshll.u32 %v3617_v3, 16  ;;  %v850_v17 = vshll.u32 %v3619_v6, 16 }
  0x3b   : > { %v738_v13 = vrot.slane %v737_v2, 4  ;;  %v854_v19 = vshrl.u32 %v3619_v6, 16  ;;  %v860_v20 = vshll.u32 %v3621_v9, 16  ;;  %v525_v23 = vmul.f32 %v3477_v4, %v466_v7 }
  0x3c   : > { %v733_v18 = vsel %vm3533_vm4, %v728_v8, %v732_v56  ;;  %v843_v26 = vrot.slane %v841_v14, 4  ;;  %v846_v27 = vrot.slane %v844_v16, 5  ;;  %v852_v31 = vrot.slane %v850_v17, 5 }
  0x3d   : > { %v743_v24 = vsel %vm3533_vm4, %v738_v13, %v742_v62  ;;  %v1105_v25 = vunpack.c.l.b16 %v733_v18  ;;  %v856_v33 = vrot.slane %v854_v19, 4  ;;  %v862_v34 = vrot.slane %v860_v20, 5 }
  0x3e   : > { %v1106_v29 = vunpack.c.l.b16 %v743_v24  ;;  %v847_v35 = vor.u32 %v846_v27, %v843_v26  ;;  %v526_v38 = vmul.f32 %v3477_v4, %v467_v10  ;;  %v581_v40 = vadd.f32 %v3482_v5, %v524_v12 }
  0x3f   : > { %v582_v41 = vadd.f32 %v3482_v5, %v525_v23  ;;  %v857_v44 = vor.u32 %v856_v33, %v852_v31  ;;  %v477_v51 = vunpack.c.l.bf16 %v423_v28  ;;  %v478_v52 = vunpack.c.h.bf16 %v423_v28  ;;  %v387_v23 = vld [vmem:[%s3472_s30 + $0xc] sm:$0xff]  }
  0x40   : > { %v1137_v43 = vpack.c.b16 %v1106_v29, %v1105_v25  ;;  %v848_v53 = vrot.slane %v847_v35, 4  ;;  %v583_v54 = vadd.f32 %v3482_v5, %v526_v38  ;;  %v635_v55 = vmax.f32 %v581_v40, 0.0 }
  0x41   : > { %v636_v56 = vmax.f32 %v582_v41, 0.0  ;;  %v858_v57 = vrot.slane %v857_v44, 4  ;;  %v479_v58 = vunpack.c.l.bf16 %v425_v42  ;;  %v536_v59 = vmul.f32 %v3477_v4, %v477_v51 }
  0x42   : > { %3136 = vmatmul.msk.bf16.vlgmr.msra.gmra.mxu0 %vm1157_vm3, %v1137_v43  ;;  %v537_v60 = vmul.f32 %v3477_v4, %v478_v52  ;;  %v853_v61 = vsel %vm3533_vm4, %v848_v53, %v852_v31  ;;  %v637_v62 = vmax.f32 %v583_v54, 0.0  ;;  %v3645_v63 = vpack.c.bf16 %v635_v55, %v635_v55 }
  0x43   : > { %v3647_v1 = vpack.c.bf16 %v636_v56, %v636_v56  ;;  %v863_v2 = vsel %vm3533_vm4, %v858_v57, %v862_v34  ;;  %v1115_v7 = vunpack.c.l.b16 %v853_v61  ;;  %v538_v8 = vmul.f32 %v3477_v4, %v479_v58  ;;  %v389_v34 = vld [vmem:[%s3472_s30 + $0x14] sm:$0x1] }
  0x44   : > { %v593_v10 = vadd.f32 %v3482_v5, %v536_v59  ;;  %v1116_v12 = vunpack.c.l.b16 %v863_v2  ;;  %v3653_v13 = vpack.c.bf16 %v637_v62, %v637_v62  ;;  %v937_v14 = vshrl.u32 %v3645_v63, 16 }
  0x45   : > { %v940_v16 = vshll.u32 %v3645_v63, 16  ;;  %v946_v17 = vshll.u32 %v3647_v1, 16  ;;  %v950_v18 = vshrl.u32 %v3647_v1, 16  ;;  %v594_v19 = vadd.f32 %v3482_v5, %v537_v60 }
  0x46   : > { %v595_v20 = vadd.f32 %v3482_v5, %v538_v8  ;;  %v3662_v24 = vpack.c.b16 %v1116_v12, %v1115_v7  ;;  %v939_v25 = vrot.slane %v937_v14, 4  ;;  %v956_v27 = vshll.u32 %v3653_v13, 16  ;;  %v3341_v14 = vld [vmem:[%s3472_s30 + $0x48] sm:$0xff]  }
  0x47   : > { %v942_v26 = vrot.slane %v940_v16, 5  ;;  %v948_v28 = vrot.slane %v946_v17, 5  ;;  %v952_v29 = vrot.slane %v950_v18, 4  ;;  %v647_v31 = vmax.f32 %v593_v10, 0.0 }
  0x48   : > { %v648_v33 = vmax.f32 %v594_v19, 0.0  ;;  %3141 = vmatmul.msk.bf16.gmra.mxu1 %vm1157_vm3, %v3662_v24  ;;  %v958_v38 = vrot.slane %v956_v27, 5  ;;  %v649_v40 = vmax.f32 %v595_v20, 0.0  ;;  %v441_v41 = vunpack.c.l.bf16 %v387_v23  ;;  %v404_v27 = vld [vmem:[%s3472_s30 + $0x50] sm:$0x1] }
  0x49   : > { %v943_v35 = vor.u32 %v942_v26, %v939_v25  ;;  %v953_v42 = vor.u32 %v952_v29, %v948_v28  ;;  %v3668_v43 = vpack.c.bf16 %v647_v31, %v647_v31  ;;  %v442_v51 = vunpack.c.h.bf16 %v387_v23 }
  0x4a   : > { %v3670_v44 = vpack.c.bf16 %v648_v33, %v648_v33  ;;  %v3672_v53 = vpack.c.bf16 %v649_v40, %v649_v40  ;;  %v443_v54 = vunpack.c.l.bf16 %v389_v34  ;;  %v500_v55 = vmul.f32 %v3477_v4, %v441_v41 }
  0x4b   : > { %4916 = vst [vmem:[#allocation7_spill] sm:$0xff] %v3668_v43  ;;  %v944_v52 = vrot.slane %v943_v35, 4  ;;  %v954_v56 = vrot.slane %v953_v42, 4  ;;  %v1033_v57 = vshrl.u32 %v3668_v43, 16  ;;  %v1036_v58 = vshll.u32 %v3668_v43, 16 }
  0x4c   : > { %4917 = vst [vmem:[#allocation8_spill] sm:$0xff] %v3670_v44  ;;  %v1042_v59 = vshll.u32 %v3670_v44, 16  ;;  %v1046_v61 = vshrl.u32 %v3670_v44, 16  ;;  %v1052_v62 = vshll.u32 %v3672_v53, 16  ;;  %v501_v2 = vmul.f32 %v3477_v4, %v442_v51 }
  0x4d   : > { %4918 = vst [vmem:[#allocation9_spill] sm:$0xff] %v3672_v53  ;;  %v949_v60 = vsel %vm3533_vm4, %v944_v52, %v948_v28  ;;  %v959_v7 = vsel %vm3533_vm4, %v954_v56, %v958_v38  ;;  %v1035_v10 = vrot.slane %v1033_v57, 4  ;;  %v1038_v12 = vrot.slane %v1036_v58, 5 }
  0x4e   : > { %v1123_v8 = vunpack.c.l.b16 %v949_v60  ;;  %v1124_v16 = vunpack.c.l.b16 %v959_v7  ;;  %v1044_v17 = vrot.slane %v1042_v59, 5  ;;  %v1048_v18 = vrot.slane %v1046_v61, 4 }
  0x4f   : > { %v1054_v19 = vrot.slane %v1052_v62, 5  ;;  %v1039_v20 = vor.u32 %v1038_v12, %v1035_v10  ;;  %v502_v23 = vmul.f32 %v3477_v4, %v443_v54  ;;  %v557_v25 = vadd.f32 %v3482_v5, %v500_v55 }
  0x50   : > { %v558_v26 = vadd.f32 %v3482_v5, %v501_v2  ;;  %v3690_v28 = vpack.c.b16 %v1124_v16, %v1123_v8  ;;  %v1049_v29 = vor.u32 %v1048_v18, %v1044_v17  ;;  %v3317_v31 = vunpack.c.l.bf16 %v3341_v14 }
  0x51   : > { %v3318_v33 = vunpack.c.h.bf16 %v3341_v14  ;;  %v1040_v34 = vrot.slane %v1039_v20, 4  ;;  %v559_v35 = vadd.f32 %v3482_v5, %v502_v23  ;;  %v611_v38 = vmax.f32 %v557_v25, 0.0 }
  0x52   : > { %4919 = vst [vmem:[#allocation10_spill] sm:$0xff] %v3690_v28  ;;  %v612_v40 = vmax.f32 %v558_v26, 0.0  ;;  %3145 = vmatmul.msk.bf16.gmra.mxu2 %vm1157_vm3, %v3690_v28  ;;  %v1050_v41 = vrot.slane %v1049_v29, 4  ;;  %v458_v42 = vunpack.c.l.bf16 %v404_v27  ;;  %v515_v51 = vmul.f32 %v3477_v4, %v3317_v31  ;;  %v416_v31 = vld [vmem:[%s3472_s30 + $0x80] sm:$0x1] }
  0x53   : > { %v516_v52 = vmul.f32 %v3477_v4, %v3318_v33  ;;  %v1045_v54 = vsel %vm3533_vm4, %v1040_v34, %v1044_v17  ;;  %v613_v55 = vmax.f32 %v559_v35, 0.0  ;;  %v3699_v56 = vpack.c.bf16 %v611_v38, %v611_v38  ;;  %v3343_v17 = vld [vmem:[%s3472_s30 + $0x78] sm:$0xff]  }
  0x54   : > { %v3701_v57 = vpack.c.bf16 %v612_v40, %v612_v40  ;;  %v1055_v58 = vsel %vm3533_vm4, %v1050_v41, %v1054_v19  ;;  %v1131_v59 = vunpack.c.l.b16 %v1045_v54  ;;  %v517_v60 = vmul.f32 %v3477_v4, %v458_v42 }
  0x55   : > { %v572_v61 = vadd.f32 %v3482_v5, %v515_v51  ;;  %v1132_v62 = vunpack.c.l.b16 %v1055_v58  ;;  %v3707_v2 = vpack.c.bf16 %v613_v55, %v613_v55  ;;  %v745_v7 = vshrl.u32 %v3699_v56, 16 }
  0x56   : > { %v748_v8 = vshll.u32 %v3699_v56, 16  ;;  %v754_v10 = vshll.u32 %v3701_v57, 16  ;;  %v758_v12 = vshrl.u32 %v3701_v57, 16  ;;  %v573_v14 = vadd.f32 %v3482_v5, %v516_v52 }
  0x57   : > { %v574_v16 = vadd.f32 %v3482_v5, %v517_v60  ;;  %v3716_v18 = vpack.c.b16 %v1132_v62, %v1131_v59  ;;  %v747_v19 = vrot.slane %v745_v7, 4  ;;  %v764_v23 = vshll.u32 %v3707_v2, 16 }
  0x58   : > { %v750_v20 = vrot.slane %v748_v8, 5  ;;  %v756_v25 = vrot.slane %v754_v10, 5  ;;  %v760_v26 = vrot.slane %v758_v12, 4  ;;  %v626_v27 = vmax.f32 %v572_v61, 0.0 }
  0x59   : > { %4920 = vst [vmem:[#allocation11_spill] sm:$0xff] %v3716_v18  ;;  %v627_v29 = vmax.f32 %v573_v14, 0.0  ;;  %3149 = vmatmul.msk.bf16.gmra.mxu3 %vm1157_vm3, %v3716_v18  ;;  %v766_v34 = vrot.slane %v764_v23, 5  ;;  %v628_v35 = vmax.f32 %v574_v16, 0.0  ;;  %v3325_v38 = vunpack.c.l.bf16 %v3343_v17 }
  0x5a   : > { %v751_v33 = vor.u32 %v750_v20, %v747_v19  ;;  %v761_v40 = vor.u32 %v760_v26, %v756_v25  ;;  %v3722_v41 = vpack.c.bf16 %v626_v27, %v626_v27  ;;  %v3326_v51 = vunpack.c.h.bf16 %v3343_v17  ;;  %v3345_v20 = vld [vmem:[%s3472_s30 + $0xa8] sm:$0xff]  }
  0x5b   : > { %v3724_v42 = vpack.c.bf16 %v627_v29, %v627_v29  ;;  %v3726_v54 = vpack.c.bf16 %v628_v35, %v628_v35  ;;  %v470_v55 = vunpack.c.l.bf16 %v416_v31  ;;  %v527_v58 = vmul.f32 %v3477_v4, %v3325_v38  ;;  %v428_v38 = vld [vmem:[%s3472_s30 + $0xb0] sm:$0x1] }
  0x5c   : > { %v752_v52 = vrot.slane %v751_v33, 4  ;;  %v762_v59 = vrot.slane %v761_v40, 4  ;;  %v865_v60 = vshrl.u32 %v3722_v41, 16  ;;  %v868_v61 = vshll.u32 %v3722_v41, 16 }
  0x5d   : > { %v874_v62 = vshll.u32 %v3724_v42, 16  ;;  %v878_v8 = vshrl.u32 %v3724_v42, 16  ;;  %v884_v10 = vshll.u32 %v3726_v54, 16  ;;  %v528_v12 = vmul.f32 %v3477_v4, %v3326_v51 }
  0x5e   : > { %v757_v7 = vsel %vm3533_vm4, %v752_v52, %v756_v25  ;;  %v767_v14 = vsel %vm3533_vm4, %v762_v59, %v766_v34  ;;  %v867_v17 = vrot.slane %v865_v60, 4  ;;  %v870_v19 = vrot.slane %v868_v61, 5 }
  0x5f   : > { %v1107_v16 = vunpack.c.l.b16 %v757_v7  ;;  %v1108_v23 = vunpack.c.l.b16 %v767_v14  ;;  %v876_v26 = vrot.slane %v874_v62, 5  ;;  %v880_v27 = vrot.slane %v878_v8, 4 }
  0x60   : > { %v886_v29 = vrot.slane %v884_v10, 5  ;;  %v871_v31 = vor.u32 %v870_v19, %v867_v17  ;;  %v529_v25 = vmul.f32 %v3477_v4, %v470_v55  ;;  %v584_v33 = vadd.f32 %v3482_v5, %v527_v58 }
  0x61   : > { %v585_v35 = vadd.f32 %v3482_v5, %v528_v12  ;;  %v3744_v40 = vpack.c.b16 %v1108_v23, %v1107_v16  ;;  %v881_v51 = vor.u32 %v880_v27, %v876_v26  ;;  %v3333_v34 = vunpack.c.l.bf16 %v3345_v20 }
  0x62   : > { %v3334_v52 = vunpack.c.h.bf16 %v3345_v20  ;;  %v872_v59 = vrot.slane %v871_v31, 4  ;;  %v586_v60 = vadd.f32 %v3482_v5, %v529_v25  ;;  %v638_v61 = vmax.f32 %v584_v33, 0.0 }
  0x63   : > { %v639_v62 = vmax.f32 %v585_v35, 0.0  ;;  %3137 = vmatmul.msk.bf16.gmra.mxu0 %vm1157_vm3, %v3744_v40  ;;  %v882_v7 = vrot.slane %v881_v51, 4  ;;  %v482_v55 = vunpack.c.l.bf16 %v428_v38  ;;  %v539_v58 = vmul.f32 %v3477_v4, %v3333_v34  ;;  %v3339_v51 = vld [vmem:[%s3472_s30 + $0x18] sm:$0xff]  }
  0x64   : > { %v540_v8 = vmul.f32 %v3477_v4, %v3334_v52  ;;  %v877_v10 = vsel %vm3533_vm4, %v872_v59, %v876_v26  ;;  %v640_v12 = vmax.f32 %v586_v60, 0.0  ;;  %v3753_v14 = vpack.c.bf16 %v638_v61, %v638_v61 }
  0x65   : > { %v3755_v16 = vpack.c.bf16 %v639_v62, %v639_v62  ;;  %v887_v17 = vsel %vm3533_vm4, %v882_v7, %v886_v29  ;;  %v1117_v19 = vunpack.c.l.b16 %v877_v10  ;;  %v541_v20 = vmul.f32 %v3477_v4, %v482_v55 }
  0x66   : > { %4921 = vst [vmem:[#allocation12_spill] sm:$0xff] %v3753_v14  ;;  %v596_v23 = vadd.f32 %v3482_v5, %v539_v58  ;;  %v1118_v27 = vunpack.c.l.b16 %v887_v17  ;;  %v3761_v31 = vpack.c.bf16 %v640_v12, %v640_v12  ;;  %v961_v26 = vshrl.u32 %v3753_v14, 16  ;;  %v392_v58 = vld [vmem:[%s3472_s30 + $0x20] sm:$0x1] }
  0x67   : > { %v964_v25 = vshll.u32 %v3753_v14, 16  ;;  %v970_v33 = vshll.u32 %v3755_v16, 16  ;;  %v974_v35 = vshrl.u32 %v3755_v16, 16  ;;  %v597_v38 = vadd.f32 %v3482_v5, %v540_v8 }
  0x68   : > { %4922 = vst [vmem:[#allocation13_spill] sm:$0xff] %v3761_v31  ;;  %v598_v29 = vadd.f32 %v3482_v5, %v541_v20  ;;  %v3770_v34 = vpack.c.b16 %v1118_v27, %v1117_v19  ;;  %v963_v52 = vrot.slane %v961_v26, 4  ;;  %v980_v60 = vshll.u32 %v3761_v31, 16  ;;  %v431_v31 = vld [vmem:[%s3472_s30 + $0xbc] sm:$0x1] }
  0x69   : > { %v966_v59 = vrot.slane %v964_v25, 5  ;;  %v972_v61 = vrot.slane %v970_v33, 5  ;;  %v976_v62 = vrot.slane %v974_v35, 4  ;;  %v650_v7 = vmax.f32 %v596_v23, 0.0 }
  0x6a   : > { %4923 = vst [vmem:[#allocation14_spill] sm:$0xff] %v3770_v34  ;;  %v651_v55 = vmax.f32 %v597_v38, 0.0  ;;  %3142 = vmatmul.msk.bf16.gmra.mxu1 %vm1157_vm3, %v3770_v34  ;;  %v982_v12 = vrot.slane %v980_v60, 5  ;;  %v652_v8 = vmax.f32 %v598_v29, 0.0  ;;  %v3309_v17 = vunpack.c.l.bf16 %v3339_v51 }
  0x6b   : > { %v967_v10 = vor.u32 %v966_v59, %v963_v52  ;;  %v977_v20 = vor.u32 %v976_v62, %v972_v61  ;;  %v3776_v18 = vpack.c.bf16 %v650_v7, %v650_v7  ;;  %v3310_v27 = vunpack.c.h.bf16 %v3339_v51 }
  0x6c   : > { %v3778_v19 = vpack.c.bf16 %v651_v55, %v651_v55  ;;  %v3780_v25 = vpack.c.bf16 %v652_v8, %v652_v8  ;;  %v446_v23 = vunpack.c.l.bf16 %v392_v58  ;;  %v503_v33 = vmul.f32 %v3477_v4, %v3309_v17  ;;  %v405_v8 = vld [vmem:[%s3472_s30 + $0x54] sm:$0xff]  }
  0x6d   : > { %4924 = vst [vmem:[#allocation15_spill] sm:$0xff] %v3776_v18  ;;  %v968_v26 = vrot.slane %v967_v10, 4  ;;  %v978_v35 = vrot.slane %v977_v20, 4  ;;  %v1057_v38 = vshrl.u32 %v3776_v18, 16  ;;  %v1060_v52 = vshll.u32 %v3776_v18, 16 }
  0x6e   : > { %4925 = vst [vmem:[#allocation16_spill] sm:$0xff] %v3778_v19  ;;  %v1066_v29 = vshll.u32 %v3778_v19, 16  ;;  %v1070_v60 = vshrl.u32 %v3778_v19, 16  ;;  %v1076_v51 = vshll.u32 %v3780_v25, 16  ;;  %v504_v62 = vmul.f32 %v3477_v4, %v3310_v27  ;;  %v407_v19 = vld [vmem:[%s3472_s30 + $0x5c] sm:$0x1] }
  0x6f   : > { %4926 = vst [vmem:[#allocation17_spill] sm:$0xff] %v3780_v25  ;;  %v973_v59 = vsel %vm3533_vm4, %v968_v26, %v972_v61  ;;  %v983_v7 = vsel %vm3533_vm4, %v978_v35, %v982_v12  ;;  %v1059_v58 = vrot.slane %v1057_v38, 4  ;;  %v1062_v10 = vrot.slane %v1060_v52, 5 }
  0x70   : > { %v1125_v55 = vunpack.c.l.b16 %v973_v59  ;;  %v1126_v17 = vunpack.c.l.b16 %v983_v7  ;;  %v1068_v20 = vrot.slane %v1066_v29, 5  ;;  %v1072_v18 = vrot.slane %v1070_v60, 4 }
  0x71   : > { %v1078_v53 = vrot.slane %v1076_v51, 5  ;;  %v1063_v36 = vor.u32 %v1062_v10, %v1059_v58  ;;  %v505_v61 = vmul.f32 %v3477_v4, %v446_v23  ;;  %v560_v26 = vadd.f32 %v3482_v5, %v503_v33 }
  0x72   : > { %v561_v25 = vadd.f32 %v3482_v5, %v504_v62  ;;  %v3798_v27 = vpack.c.b16 %v1126_v17, %v1125_v55  ;;  %v1073_v43 = vor.u32 %v1072_v18, %v1068_v20  ;;  %v459_v12 = vunpack.c.l.bf16 %v405_v8 }
  0x73   : > { %v460_v35 = vunpack.c.h.bf16 %v405_v8  ;;  %v1064_v38 = vrot.slane %v1063_v36, 4  ;;  %v562_v52 = vadd.f32 %v3482_v5, %v505_v61  ;;  %v614_v59 = vmax.f32 %v560_v26, 0.0 }
  0x74   : > { %4927 = vst [vmem:[#allocation18_spill] sm:$0xff] %v3798_v27  ;;  %v615_v29 = vmax.f32 %v561_v25, 0.0  ;;  %3146 = vmatmul.msk.bf16.gmra.mxu2 %vm1157_vm3, %v3798_v27  ;;  %v1074_v60 = vrot.slane %v1073_v43, 4  ;;  %v461_v23 = vunpack.c.l.bf16 %v407_v19  ;;  %v518_v33 = vmul.f32 %v3477_v4, %v459_v12  ;;  %v417_v12 = vld [vmem:[%s3472_s30 + $0x84] sm:$0xff]  }
  0x75   : > { %v519_v51 = vmul.f32 %v3477_v4, %v460_v35  ;;  %v1069_v62 = vsel %vm3533_vm4, %v1064_v38, %v1068_v20  ;;  %v616_v18 = vmax.f32 %v562_v52, 0.0  ;;  %v3807_v7 = vpack.c.bf16 %v614_v59, %v614_v59 }
  0x76   : > { %v3809_v36 = vpack.c.bf16 %v615_v29, %v615_v29  ;;  %v1079_v25 = vsel %vm3533_vm4, %v1074_v60, %v1078_v53  ;;  %v1133_v55 = vunpack.c.l.b16 %v1069_v62  ;;  %v520_v43 = vmul.f32 %v3477_v4, %v461_v23  ;;  %v419_v62 = vld [vmem:[%s3472_s30 + $0x8c] sm:$0x1] }
  0x77   : > { %v575_v19 = vadd.f32 %v3482_v5, %v518_v33  ;;  %v1134_v58 = vunpack.c.l.b16 %v1079_v25  ;;  %v3815_v10 = vpack.c.bf16 %v616_v18, %v616_v18  ;;  %v769_v8 = vshrl.u32 %v3807_v7, 16 }
  0x78   : > { %v772_v17 = vshll.u32 %v3807_v7, 16  ;;  %v778_v20 = vshll.u32 %v3809_v36, 16  ;;  %v782_v61 = vshrl.u32 %v3809_v36, 16  ;;  %v576_v26 = vadd.f32 %v3482_v5, %v519_v51 }
  0x79   : > { %v577_v53 = vadd.f32 %v3482_v5, %v520_v43  ;;  %v3824_v35 = vpack.c.b16 %v1134_v58, %v1133_v55  ;;  %v771_v38 = vrot.slane %v769_v8, 4  ;;  %v788_v59 = vshll.u32 %v3815_v10, 16 }
  0x7a   : > { %v774_v52 = vrot.slane %v772_v17, 5  ;;  %v780_v29 = vrot.slane %v778_v20, 5  ;;  %v784_v60 = vrot.slane %v782_v61, 4  ;;  %v629_v23 = vmax.f32 %v575_v19, 0.0 }
  0x7b   : > { %4928 = vst [vmem:[#allocation19_spill] sm:$0xff] %v3824_v35  ;;  %v630_v33 = vmax.f32 %v576_v26, 0.0  ;;  %3150 = vmatmul.msk.bf16.gmra.mxu3 %vm1157_vm3, %v3824_v35  ;;  %v790_v25 = vrot.slane %v788_v59, 5  ;;  %v631_v51 = vmax.f32 %v577_v53, 0.0  ;;  %v471_v44 = vunpack.c.l.bf16 %v417_v12 }
  0x7c   : > { %v775_v18 = vor.u32 %v774_v52, %v771_v38  ;;  %v785_v43 = vor.u32 %v784_v60, %v780_v29  ;;  %v3830_v22 = vpack.c.bf16 %v629_v23, %v629_v23  ;;  %v472_v58 = vunpack.c.h.bf16 %v417_v12 }
  0x7d   : > { %v3832_v55 = vpack.c.bf16 %v630_v33, %v630_v33  ;;  %v3834_v17 = vpack.c.bf16 %v631_v51, %v631_v51  ;;  %v473_v19 = vunpack.c.l.bf16 %v419_v62  ;;  %v530_v20 = vmul.f32 %v3477_v4, %v471_v44 }
  0x7e   : > { %v776_v8 = vrot.slane %v775_v18, 4  ;;  %v786_v61 = vrot.slane %v785_v43, 4  ;;  %v889_v26 = vshrl.u32 %v3830_v22, 16  ;;  %v892_v38 = vshll.u32 %v3830_v22, 16  ;;  %v429_v18 = vld [vmem:[%s3472_s30 + $0xb4] sm:$0xff]  }
  0x7f   : > { %v898_v53 = vshll.u32 %v3832_v55, 16  ;;  %v902_v59 = vshrl.u32 %v3832_v55, 16  ;;  %v908_v12 = vshll.u32 %v3834_v17, 16  ;;  %v531_v60 = vmul.f32 %v3477_v4, %v472_v58 }
  0x80   : > { %v781_v52 = vsel %vm3533_vm4, %v776_v8, %v780_v29  ;;  %v791_v44 = vsel %vm3533_vm4, %v786_v61, %v790_v25  ;;  %v891_v33 = vrot.slane %v889_v26, 4  ;;  %v894_v62 = vrot.slane %v892_v38, 5  ;;  %v3857_v38 = vld [vmem:[%s4843_s4] ss:$0 sm:$0xff] }
  0x81   : > { %v1109_v23 = vunpack.c.l.b16 %v781_v52  ;;  %v1110_v51 = vunpack.c.l.b16 %v791_v44  ;;  %v900_v43 = vrot.slane %v898_v53, 5  ;;  %v904_v35 = vrot.slane %v902_v59, 4 }
  0x82   : > { %v910_v15 = vrot.slane %v908_v12, 5  ;;  %v895_v21 = vor.u32 %v894_v62, %v891_v33  ;;  %v532_v29 = vmul.f32 %v3477_v4, %v473_v19  ;;  %v587_v8 = vadd.f32 %v3482_v5, %v530_v20 }
  0x83   : > { %v588_v27 = vadd.f32 %v3482_v5, %v531_v60  ;;  %v3852_v58 = vpack.c.b16 %v1110_v51, %v1109_v23  ;;  %v905_v28 = vor.u32 %v904_v35, %v900_v43  ;;  %v483_v25 = vunpack.c.l.bf16 %v429_v18  ;;  %v3865_v35 = vld [vmem:[%s4842_s3] ss:$0 sm:$0xff] }
  0x84   : > { %v484_v61 = vunpack.c.h.bf16 %v429_v18  ;;  %v896_v26 = vrot.slane %v895_v21, 4  ;;  %v589_v53 = vadd.f32 %v3857_v38, %v532_v29  ;;  %v641_v52 = vmax.f32 %v587_v8, 0.0 }
  0x85   : > { %v642_v4 = vmax.f32 %v588_v27, 0.0  ;;  %3138 = vmatmul.msk.bf16.gmra.mxu0 %vm1157_vm3, %v3852_v58  ;;  %v906_v5 = vrot.slane %v905_v28, 4  ;;  %v485_v19 = vunpack.c.l.bf16 %v431_v31  ;;  %v542_v21 = vmul.f32 %v3865_v35, %v483_v25  ;;  %v393_v25 = vld [vmem:[%s3472_s30 + $0x24] sm:$0xff]  }
  0x86   : > { %v543_v20 = vmul.f32 %v3865_v35, %v484_v61  ;;  %v901_v59 = vsel %vm3533_vm4, %v896_v26, %v900_v43  ;;  %v643_v12 = vmax.f32 %v589_v53, 0.0  ;;  %v3871_v27 = vpack.c.bf16 %v641_v52, %v641_v52 }
  0x87   : > { %v3873_v60 = vpack.c.bf16 %v642_v4, %v642_v4  ;;  %v911_v28 = vsel %vm3533_vm4, %v906_v5, %v910_v15  ;;  %v1119_v31 = vunpack.c.l.b16 %v901_v59  ;;  %v544_v44 = vmul.f32 %v3865_v35, %v485_v19  ;;  %v395_v59 = vld [vmem:[%s3472_s30 + $0x2c] sm:$0x1] }
  0x88   : > { %4929 = vst [vmem:[#allocation20_spill] sm:$0xff] %v3871_v27  ;;  %v599_v23 = vadd.f32 %v3857_v38, %v542_v21  ;;  %v1120_v33 = vunpack.c.l.b16 %v911_v28  ;;  %v3879_v62 = vpack.c.bf16 %v643_v12, %v643_v12  ;;  %v985_v18 = vshrl.u32 %v3871_v27, 16 }
  0x89   : > { %4930 = vst [vmem:[#allocation21_spill] sm:$0xff] %v3873_v60  ;;  %v988_v51 = vshll.u32 %v3871_v27, 16  ;;  %v994_v43 = vshll.u32 %v3873_v60, 16  ;;  %v998_v29 = vshrl.u32 %v3873_v60, 16  ;;  %v600_v8 = vadd.f32 %v3857_v38, %v543_v20 }
  0x8a   : > { %4931 = vst [vmem:[#allocation22_spill] sm:$0xff] %v3879_v62  ;;  %v601_v15 = vadd.f32 %v3857_v38, %v544_v44  ;;  %v3888_v61 = vpack.c.b16 %v1120_v33, %v1119_v31  ;;  %v987_v26 = vrot.slane %v985_v18, 4  ;;  %v1004_v52 = vshll.u32 %v3879_v62, 16 }
  0x8b   : > { %v990_v53 = vrot.slane %v988_v51, 5  ;;  %v996_v4 = vrot.slane %v994_v43, 5  ;;  %v1000_v5 = vrot.slane %v998_v29, 4  ;;  %v653_v19 = vmax.f32 %v599_v23, 0.0 }
  0x8c   : > { %4932 = vst [vmem:[#allocation23_spill] sm:$0xff] %v3888_v61  ;;  %v654_v21 = vmax.f32 %v600_v8, 0.0  ;;  %3143 = vmatmul.msk.bf16.gmra.mxu1 %vm1157_vm3, %v3888_v61  ;;  %v1006_v28 = vrot.slane %v1004_v52, 5  ;;  %v655_v20 = vmax.f32 %v601_v15, 0.0  ;;  %v447_v27 = vunpack.c.l.bf16 %v393_v25 }
  0x8d   : > { %v991_v12 = vor.u32 %v990_v53, %v987_v26  ;;  %v1001_v44 = vor.u32 %v1000_v5, %v996_v4  ;;  %v3894_v60 = vpack.c.bf16 %v653_v19, %v653_v19  ;;  %v448_v33 = vunpack.c.h.bf16 %v393_v25 }
  0x8e   : > { %v3896_v31 = vpack.c.bf16 %v654_v21, %v654_v21  ;;  %v3898_v51 = vpack.c.bf16 %v655_v20, %v655_v20  ;;  %v449_v43 = vunpack.c.l.bf16 %v395_v59  ;;  %v506_v23 = vmul.f32 %v3865_v35, %v447_v27 }
  0x8f   : > { %4933 = vst [vmem:[#allocation24_spill] sm:$0xff] %v3894_v60  ;;  %v992_v18 = vrot.slane %v991_v12, 4  ;;  %v1002_v29 = vrot.slane %v1001_v44, 4  ;;  %v1081_v8 = vshrl.u32 %v3894_v60, 16  ;;  %v1084_v26 = vshll.u32 %v3894_v60, 16 }
  0x90   : > { %4934 = vst [vmem:[#allocation25_spill] sm:$0xff] %v3896_v31  ;;  %v1090_v15 = vshll.u32 %v3896_v31, 16  ;;  %v1094_v52 = vshrl.u32 %v3896_v31, 16  ;;  %v1100_v25 = vshll.u32 %v3898_v51, 16  ;;  %v507_v5 = vmul.f32 %v3865_v35, %v448_v33 }
  0x91   : > { %4935 = vst [vmem:[#allocation26_spill] sm:$0xff] %v3898_v51  ;;  %v997_v53 = vsel %vm3533_vm4, %v992_v18, %v996_v4  ;;  %v1007_v19 = vsel %vm3533_vm4, %v1002_v29, %v1006_v28  ;;  %v1083_v21 = vrot.slane %v1081_v8, 4  ;;  %v1086_v59 = vrot.slane %v1084_v26, 5 }
  0x92   : > { %v1127_v27 = vunpack.c.l.b16 %v997_v53  ;;  %v1128_v12 = vunpack.c.l.b16 %v1007_v19  ;;  %v1092_v20 = vrot.slane %v1090_v15, 5  ;;  %v1096_v44 = vrot.slane %v1094_v52, 4 }
  0x93   : > { %v1102_v60 = vrot.slane %v1100_v25, 5  ;;  %v1087_v62 = vor.u32 %v1086_v59, %v1083_v21  ;;  %v508_v14 = vmul.f32 %v3865_v35, %v449_v43  ;;  %v563_v4 = vadd.f32 %v3857_v38, %v506_v23 }
  0x94   : > { %v564_v18 = vadd.f32 %v3857_v38, %v507_v5  ;;  %v3914_v51 = vpack.c.b16 %v1128_v12, %v1127_v27  ;;  %v1097_v33 = vor.u32 %v1096_v44, %v1092_v20  ;;  %v1331_v31 = vunpack.c.l.b16 %v3593_v30 }
  0x95   : > { %v1332_v28 = vunpack.c.l.b16 %v3596_v32  ;;  %v1088_v29 = vrot.slane %v1087_v62, 4  ;;  %v565_v8 = vadd.f32 %v3857_v38, %v508_v14  ;;  %v617_v26 = vmax.f32 %v563_v4, 0.0 }
  0x96   : > { %4936 = vst [vmem:[#allocation27_spill] sm:$0xff] %v3914_v51  ;;  %v618_v15 = vmax.f32 %v564_v18, 0.0  ;;  %3147 = vmatmul.msk.bf16.gmra.mxu2 %vm1157_vm3, %v3914_v51  ;;  %v1098_v43 = vrot.slane %v1097_v33, 4  ;;  %v4937_v62 = vmov 0  ;;  %v1540_v27 = vrot.slane %v3596_v32, 5 }
  0x97   : > { %v1363_v53 = vpack.c.b16 %v1332_v28, %v1331_v31  ;;  %v1093_v23 = vsel %vm3533_vm4, %v1088_v29, %v1092_v20  ;;  %v619_v52 = vmax.f32 %v565_v8, 0.0  ;;  %v3923_v25 = vpack.c.bf16 %v617_v26, %v617_v26  ;;  %v2463_v8 = vld [vmem:[%s4841_s2 + $0xc] sm:$0xc] }
  0x98   : > { %v3925_v5 = vpack.c.bf16 %v618_v15, %v618_v15  ;;  %v4938_v62 = vsel %vm3927_vm7, 4294967295, %v4937_v62  ;;  %v1103_v14 = vsel %vm3533_vm4, %v1098_v43, %v1102_v60  ;;  %v1135_v19 = vunpack.c.l.b16 %v1093_v23  ;;  %v2171_v23 = vld [vmem:[%s4841_s2 + $0x8] sm:$0xc] }
  0x99   : > { %4939 = vst [vmem:[#allocation28_spill] sm:$0xff] %v4938_v62  ;;  %v3168_v31 = vrot.slane %v3593_v30, 9  ;;  %v1136_v21 = vunpack.c.l.b16 %v1103_v14  ;;  %v3935_v59 = vpack.c.bf16 %v619_v52, %v619_v52  ;;  %v793_v12 = vshrl.u32 %v3923_v25, 16  ;;  %v2306_v30 = vld [vmem:[%s4841_s2 + $0xc] sm:$0x3] }
  0x9a   : > { %v796_v20 = vshll.u32 %v3923_v25, 16  ;;  %v802_v44 = vshll.u32 %v3925_v5, 16  ;;  %v806_v4 = vshrl.u32 %v3925_v5, 16  ;;  %v1542_v60 = vrot.slane %v1540_v27, 4 }
  0x9b   : > { %v1541_v18 = vsel %vm3927_vm7, %v3168_v31, %v1540_v27  ;;  %v3946_v32 = vpack.c.b16 %v1136_v21, %v1135_v19  ;;  %v795_v33 = vrot.slane %v793_v12, 4  ;;  %v812_v29 = vshll.u32 %v3935_v59, 16  ;;  %v2606_v31 = vld [vmem:[%s4841_s2 + $0x10] sm:$0x3] }
  0x9c   : > { %v798_v28 = vrot.slane %v796_v20, 5  ;;  %v804_v26 = vrot.slane %v802_v44, 5  ;;  %v808_v15 = vrot.slane %v806_v4, 4  ;;  %3152 = vmatmul.msk.bf16.vlgmr.msrb.gmra.mxu1 %vm1157_vm3, %v1363_v53  ;;  %v1543_v43 = vrot.slane %v3603_v37, 5 }
  0x9d   : > { %4940 = vst [vmem:[#allocation29_spill] sm:$0xff] %v3946_v32  ;;  %3151 = vmatmul.msk.bf16.gmra.mxu3 %vm1157_vm3, %v3946_v32  ;;  %v814_v14 = vrot.slane %v812_v29, 5  ;;  %v1651_v19 = vunpack.c.l.b16 %v1541_v18  ;;  %v2316_v37 = vsel %vm1206_vm0, %v2306_v30, 0  ;;  %v2468_v21 = vunpack.c.l.b16 %v2463_v8 }
  0x9e   : > { %v799_v52 = vor.u32 %v798_v28, %v795_v33  ;;  %v809_v27 = vor.u32 %v808_v15, %v804_v26  ;;  %v1544_v53 = vsel %vm3927_vm7, %v1542_v60, %v1543_v43  ;;  %2325 = vmatpush.bf16.msra.mxu2 %v2316_v37  ;;  %v2176_v44 = vunpack.c.l.b16 %v2171_v23 }
  0x9f   : > { %v1652_v20 = vunpack.c.l.b16 %v1544_v53  ;;  %v2469_v32 = vpack.c.b16 %v2468_v21, %v2468_v21  ;;  %v2614_v33 = vsel %vm1206_vm0, %v2606_v31, 0  ;;  %v1336_v31 = vunpack.c.l.b16 %v3809_v36 }
  0xa0   : > { %v800_v12 = vrot.slane %v799_v52, 4  ;;  %v810_v4 = vrot.slane %v809_v27, 4  ;;  %v2177_v28 = vpack.c.b16 %v2176_v44, %v2176_v44  ;;  %2623 = vmatpush.bf16.msra.mxu0 %v2614_v33  ;;  %v1547_v52 = vrot.slane %v3701_v57, 5 }
  0xa1   : > { %v1683_v15 = vpack.c.b16 %v1652_v20, %v1651_v19  ;;  %v2470_v30 = vrot.slane %v2469_v32, 2  ;;  %v1335_v27 = vunpack.c.l.b16 %v3807_v7  ;;  %v1334_v37 = vunpack.c.l.b16 %v3701_v57 }
  0xa2   : > { %v805_v18 = vsel %vm3533_vm4, %v800_v12, %v804_v26  ;;  %v815_v29 = vsel %vm3533_vm4, %v810_v4, %v814_v14  ;;  %v2178_v43 = vrot.slane %v2177_v28, 2  ;;  %v1333_v26 = vunpack.c.l.b16 %v3699_v56 }
  0xa3   : > { %v1111_v60 = vunpack.c.l.b16 %v805_v18  ;;  %v1112_v8 = vunpack.c.l.b16 %v815_v29  ;;  %v2475_v23 = vsel %vm1206_vm0, %v2470_v30, 0  ;;  %v3169_v32 = vrot.slane %v3699_v56, 9 }
  0xa4   : > { %2484 = vmatpush.bf16.msra.mxu3 %v2475_v23  ;;  %v2183_v14 = vsel %vm1206_vm0, %v2178_v43, 0  ;;  %v1550_v19 = vrot.slane %v3707_v2, 5  ;;  %v3982_v21 = vpack.c.b16 %v1336_v31, %v1335_v27  ;;  %v1549_v12 = vrot.slane %v1547_v52, 4 }
  0xa5   : > { %v3974_v53 = vpack.c.b16 %v1112_v8, %v1111_v60  ;;  %2192 = vmatpush.bf16.msra.mxu1 %v2183_v14  ;;  %v3170_v20 = vrot.slane %v3807_v7, 9  ;;  %v1554_v57 = vrot.slane %v3809_v36, 5  ;;  %v1557_v44 = vrot.slane %v3815_v10, 5 }
  0xa6   : > { %3184 = vmatmul.msk.bf16.vlgmr.msrb.gmra.mxu2 %vm1157_vm3, %v1683_v15  ;;  %v1364_v4 = vpack.c.b16 %v1334_v37, %v1333_v26  ;;  %v1548_v2 = vsel %vm3927_vm7, %v3169_v32, %v1547_v52  ;;  %v1551_v28 = vsel %vm3927_vm7, %v1549_v12, %v1550_v19  ;;  %v1561_v30 = vrot.slane %v3925_v5, 5 }
  0xa7   : > { %3139 = vmatmul.msk.bf16.gmra.mxu0 %vm1157_vm3, %v3974_v53  ;;  %v1555_v33 = vsel %vm3927_vm7, %v3170_v20, %v1554_v57  ;;  %v1556_v18 = vrot.slane %v1554_v57, 4  ;;  %v1653_v36 = vunpack.c.l.b16 %v1548_v2  ;;  %v1654_v10 = vunpack.c.l.b16 %v1551_v28 }
  0xa8   : > { %v1655_v56 = vunpack.c.l.b16 %v1555_v33  ;;  %v1337_v8 = vunpack.c.l.b16 %v3923_v25  ;;  %v1338_v43 = vunpack.c.l.b16 %v3925_v5  ;;  %v1563_v52 = vrot.slane %v1561_v30, 4 }
  0xa9   : > { %v1558_v29 = vsel %vm3927_vm7, %v1556_v18, %v1557_v44  ;;  %v4001_v15 = vpack.c.b16 %v1654_v10, %v1653_v36  ;;  %v1564_v23 = vrot.slane %v3935_v59, 5  ;;  %v1568_v59 = vrot.slane %v3510_v46, 5 }
  0xaa   : > { %v1656_v7 = vunpack.c.l.b16 %v1558_v29  ;;  %v4020_v27 = vpack.c.b16 %v1338_v43, %v1337_v8  ;;  %v1339_v32 = vunpack.c.l.b16 %v3508_v45  ;;  %v1340_v19 = vunpack.c.l.b16 %v3510_v46 }
  0xab   : > { %v1565_v26 = vsel %vm3927_vm7, %v1563_v52, %v1564_v23  ;;  %v3172_v12 = vrot.slane %v3508_v45, 9  ;;  %v1570_v20 = vrot.slane %v1568_v59, 4  ;;  %v1571_v57 = vrot.slane %v3512_v47, 5 }
  0xac   : > { %3153 = vmatmul.msk.bf16.gmra.mxu1 %vm1157_vm3, %v1364_v4  ;;  %v3999_v60 = vpack.c.b16 %v1656_v7, %v1655_v56  ;;  %v1658_v37 = vunpack.c.l.b16 %v1565_v26  ;;  %v1575_v28 = vrot.slane %v3619_v6, 5  ;;  %v1341_v7 = vunpack.c.l.b16 %v3617_v3 }
  0xad   : > { %3200 = vmatmul.msk.bf16.vlgmr.msrb.gmra.mxu3 %vm1157_vm3, %v1364_v4  ;;  %v4045_v4 = vpack.c.b16 %v1340_v19, %v1339_v32  ;;  %v1569_v33 = vsel %vm3927_vm7, %v3172_v12, %v1568_v59  ;;  %v1572_v46 = vsel %vm3927_vm7, %v1570_v20, %v1571_v57  ;;  %v1342_v36 = vunpack.c.l.b16 %v3619_v6 }
  0xae   : > { %v1659_v18 = vunpack.c.l.b16 %v1569_v33  ;;  %v1660_v47 = vunpack.c.l.b16 %v1572_v46  ;;  %v1577_v8 = vrot.slane %v1575_v28, 4  ;;  %v1578_v43 = vrot.slane %v3621_v9, 5 }
  0xaf   : > { %v4076_v52 = vpack.c.b16 %v1342_v36, %v1341_v7  ;;  %v1582_v32 = vrot.slane %v3724_v42, 5  ;;  %v1343_v19 = vunpack.c.l.b16 %v3722_v41  ;;  %v1344_v12 = vunpack.c.l.b16 %v3724_v42 }
  0xb0   : > { %v4059_v2 = vpack.c.b16 %v1660_v47, %v1659_v18  ;;  %v1579_v23 = vsel %vm3927_vm7, %v1577_v8, %v1578_v43  ;;  %v3174_v57 = vrot.slane %v3722_v41, 9  ;;  %v1585_v46 = vrot.slane %v3726_v54, 5 }
  0xb1   : > { %v4055_v45 = vpop.f32.mrf.mxu2  ;;  %v1662_v26 = vunpack.c.l.b16 %v1579_v23  ;;  %v1584_v33 = vrot.slane %v1582_v32, 4  ;;  %v4109_v47 = vpack.c.b16 %v1344_v12, %v1343_v19  ;;  %v1345_v23 = vunpack.c.l.b16 %v3830_v22 }
  0xb2   : > { %v1583_v42 = vsel %vm3927_vm7, %v3174_v57, %v1582_v32  ;;  %v3175_v19 = vrot.slane %v3830_v22, 9  ;;  %v1592_v57 = vrot.slane %v3834_v17, 5 }
  0xb3   : > { %v1586_v7 = vsel %vm3927_vm7, %v1584_v33, %v1585_v46  ;;  %v1663_v41 = vunpack.c.l.b16 %v1583_v42 }
  0xb4   : > { %v1664_v54 = vunpack.c.l.b16 %v1586_v7 }
  0xb6   : > { %3185 = vmatmul.msk.bf16.gmra.mxu2 %vm1157_vm3, %v4001_v15  ;;  %v4127_v43 = vpack.c.b16 %v1664_v54, %v1663_v41 }
  0xb7   : > { %3216 = vmatmul.msk.bf16.vlgmr.msrb.gmra.mxu0 %vm1157_vm3, %v3744_v40  ;;  %v3171_v40 = vrot.slane %v3923_v25, 9  ;;  %v4030_v25 = vpop.f32.mrf.mxu1 }
  0xb8   : > { %v4062_v29 = vpop.f32.mrf.mxu3  ;;  %4945 = vst [vmem:[#allocation34_spill] sm:$0xff] %v4127_v43 }
  0xb9   : > { %v1562_v31 = vsel %vm3927_vm7, %v3171_v40, %v1561_v30  ;;  %4941 = vst [vmem:[#allocation30_spill] sm:$0xff] %v4062_v29  ;;  %v4070_v10 = vpop.f32.mrf.mxu2  ;;  %v3173_v30 = vrot.slane %v3617_v3, 9 }
  0xba   : > { %v1657_v5 = vunpack.c.l.b16 %v1562_v31 }
  0xbb   : > { %v1576_v6 = vsel %vm3927_vm7, %v3173_v30, %v1575_v28 }
  0xbc   : > { %3154 = vmatmul.msk.bf16.gmra.mxu1 %vm1157_vm3, %v3982_v21  ;;  %v4032_v14 = vpack.c.b16 %v1658_v37, %v1657_v5  ;;  %v1661_v9 = vunpack.c.l.b16 %v1576_v6  ;;  %v1589_v6 = vrot.slane %v3832_v55, 5 }
  0xbd   : > { %3201 = vmatmul.msk.bf16.gmra.mxu3 %vm1157_vm3, %v3982_v21 }
  0xbe   : > { %v4094_v59 = vpack.c.b16 %v1662_v26, %v1661_v9  ;;  %v1346_v9 = vunpack.c.l.b16 %v3832_v55  ;;  %v1591_v12 = vrot.slane %v1589_v6, 4  ;;  %v1590_v55 = vsel %vm3927_vm7, %v3175_v19, %v1589_v6 }
  0xbf   : > { %v4043_v44 = vpop.f32.mrf.mxu1  ;;  %v4074_v40 = vpop.f32.mrf.mxu0  ;;  %v1665_v22 = vunpack.c.l.b16 %v1590_v55  ;;  %v1347_v19 = vunpack.c.l.b16 %v3514_v48  ;;  %v3176_v55 = vrot.slane %v3514_v48, 9 }
  0xc0   : > { %v4088_v3 = vpop.f32.mrf.mxu3  ;;  %v4142_v33 = vpack.c.b16 %v1346_v9, %v1345_v23  ;;  %v1593_v42 = vsel %vm3927_vm7, %v1591_v12, %v1592_v57  ;;  %v1596_v9 = vrot.slane %v3516_v49, 5  ;;  %v1348_v12 = vunpack.c.l.b16 %v3516_v49 }
  0xc1   : > { %4942 = vst [vmem:[#allocation31_spill] sm:$0xff] %v4088_v3  ;;  %v1666_v17 = vunpack.c.l.b16 %v1593_v42 }
  0xc2   : > { %4946 = vst [vmem:[#allocation35_spill] sm:$0xff] %v4142_v33  ;;  %v1598_v42 = vrot.slane %v1596_v9, 4  ;;  %v1597_v49 = vsel %vm3927_vm7, %v3176_v55, %v1596_v9  ;;  %v1603_v9 = vrot.slane %v3647_v1, 5 }
  0xc3   : > { %v4162_v6 = vpack.c.b16 %v1666_v17, %v1665_v22  ;;  %v1599_v22 = vrot.slane %v3518_v50, 5  ;;  %v4175_v17 = vpack.c.b16 %v1348_v12, %v1347_v19  ;;  %v1667_v48 = vunpack.c.l.b16 %v1597_v49 }
  0xc4   : > { %v1605_v49 = vrot.slane %v1603_v9, 4 }
  0xc5   : > { %4948 = vst [vmem:[#allocation37_spill] sm:$0xff] %v4162_v6 }
  0xc6   : > { %3186 = vmatmul.msk.bf16.gmra.mxu2 %vm1157_vm3, %v3999_v60  ;;  %4950 = vst [vmem:[#allocation39_spill] sm:$0xff] %v4175_v17 }
  0xc7   : > { %3217 = vmatmul.msk.bf16.gmra.mxu0 %vm1157_vm3, %v3852_v58  ;;  %v4057_v56 = vpop.f32.mrf.mxu1  ;;  %v4092_v37 = vpop.f32.mrf.mxu0 }
  0xcc   : > { %3155 = vmatmul.msk.bf16.gmra.mxu1 %vm1157_vm3, %v4020_v27 }
  0xcd   : > { %3202 = vmatmul.msk.bf16.gmra.mxu3 %vm1157_vm3, %v4020_v27 }
  0xcf   : > { %v4082_v31 = vpop.f32.mrf.mxu1 }
  0xd5   : > { %v4090_v5 = vpop.f32.mrf.mxu2 }
  0xd6   : > { %3187 = vmatmul.msk.bf16.gmra.mxu2 %vm1157_vm3, %v4032_v14 }
  0xd7   : > { %3218 = vmatmul.msk.bf16.gmra.mxu0 %vm1157_vm3, %v3974_v53 }
  0xdc   : > { %3156 = vmatmul.msk.bf16.gmra.mxu1 %vm1157_vm3, %v4045_v4  ;;  %v4107_v18 = vpop.f32.mrf.mxu3 }
  0xdd   : > { %3203 = vmatmul.msk.bf16.gmra.mxu3 %vm1157_vm3, %v4045_v4  ;;  %4943 = vst [vmem:[#allocation32_spill] sm:$0xff] %v4107_v18  ;;  %v4111_v28 = vpop.f32.mrf.mxu2 }
  0xe0   : > { %v4117_v36 = vpop.f32.mrf.mxu0 }
  0xe4   : > { %v4125_v8 = vpop.f32.mrf.mxu3 }
  0xe5   : > { %4944 = vst [vmem:[#allocation33_spill] sm:$0xff] %v4125_v8 }
  0xe6   : > { %3188 = vmatmul.msk.bf16.gmra.mxu2 %vm1157_vm3, %v4059_v2 }
  0xe7   : > { %3219 = vmatmul.msk.bf16.gmra.mxu0 %vm1157_vm3, %v3557_v39  ;;  %v4099_v20 = vpop.f32.mrf.mxu1 }
  0xe8   : > { %v4134_v32 = vpop.f32.mrf.mxu0 }
  0xec   : > { %3157 = vmatmul.msk.bf16.gmra.mxu1 %vm1157_vm3, %v4076_v52 }
  0xed   : > { %3204 = vmatmul.msk.bf16.gmra.mxu3 %vm1157_vm3, %v4076_v52 }
  0xef   : > { %v4123_v30 = vpop.f32.mrf.mxu1 }
  0xf6   : > { %3189 = vmatmul.msk.bf16.gmra.mxu2 %vm1157_vm3, %v4094_v59 }
  0xf7   : > { %3220 = vmatmul.msk.bf16.gmra.mxu0 %vm1157_vm3, %v3662_v24  ;;  %v4132_v26 = vpop.f32.mrf.mxu2 }
  0xfc   : > { %3158 = vmatmul.msk.bf16.gmra.mxu1 %vm1157_vm3, %v4109_v47 }
  0xfd   : > { %3205 = vmatmul.msk.bf16.gmra.mxu3 %vm1157_vm3, %v4109_v47 }
  0xfe   : > { %v4150_v7 = vpop.f32.mrf.mxu3 }
  0xff   : > { %4947 = vst [vmem:[#allocation36_spill] sm:$0xff] %v4150_v7  ;;  %v4156_v41 = vpop.f32.mrf.mxu2 }
 0x102   : > { %v4158_v54 = vpop.f32.mrf.mxu0 }
 0x106   : > { %3190 = vmatmul.msk.bf16.gmra.mxu2 %vm1157_vm3, %v4127_v43  ;;  %v4167_v57 = vpop.f32.mrf.mxu3  ;;  %v1352_v43 = vunpack.c.l.b16 %v3755_v16 }
 0x107   : > { %3221 = vmatmul.msk.bf16.gmra.mxu0 %vm1157_vm3, %v3770_v34  ;;  %4949 = vst [vmem:[#allocation38_spill] sm:$0xff] %v4167_v57  ;;  %v1600_v57 = vsel %vm3927_vm7, %v1598_v42, %v1599_v22  ;;  %v1349_v42 = vunpack.c.l.b16 %v3645_v63  ;;  %v1350_v22 = vunpack.c.l.b16 %v3647_v1 }
 0x108   : > { %v1668_v50 = vunpack.c.l.b16 %v1600_v57  ;;  %v3177_v57 = vrot.slane %v3645_v63, 9 }
 0x109   : > { %v4144_v46 = vpop.f32.mrf.mxu1 }
 0x10a   : > { %v4179_v18 = vpop.f32.mrf.mxu0 }
 0x10c   : > { %3159 = vmatmul.msk.bf16.gmra.mxu1 %vm1157_vm3, %v4142_v33 }
 0x10d   : > { %3206 = vmatmul.msk.bf16.gmra.mxu3 %vm1157_vm3, %v4142_v33 }
 0x111   : > { %v4160_v23 = vpop.f32.mrf.mxu1 }
 0x116   : > { %3191 = vmatmul.msk.bf16.gmra.mxu2 %vm1157_vm3, %v4162_v6  ;;  %v4193_v6 = vpack.c.b16 %v1668_v50, %v1667_v48  ;;  %v1606_v48 = vrot.slane %v3653_v13, 5 }
 0x117   : > { %3222 = vmatmul.msk.bf16.gmra.mxu0 %vm1157_vm3, %v3888_v61 }
 0x118   : > { %4952 = vst [vmem:[#allocation41_spill] sm:$0xff] %v4193_v6 }
 0x119   : > { %v4177_v7 = vpop.f32.mrf.mxu2  ;;  %v1439_v8 = vpop.f32.mrf.mxu1 }
 0x11c   : > { %3160 = vmatmul.msk.bf16.gmra.mxu1 %vm1157_vm3, %v4175_v17 }
 0x11d   : > { %3207 = vmatmul.msk.bf16.gmra.mxu3 %vm1157_vm3, %v4175_v17  ;;  %v4209_v17 = vpack.c.b16 %v1350_v22, %v1349_v42 }
 0x120   : > { %v4189_v19 = vpop.f32.mrf.mxu3 }
 0x121   : > { %4951 = vst [vmem:[#allocation40_spill] sm:$0xff] %v4189_v19  ;;  %v4191_v12 = vpop.f32.mrf.mxu2  ;;  %v1441_v61 = vpop.f32.mrf.mxu1  ;;  %v1440_v19 = vadd.f32 %v1439_v8, %v4074_v40 }
 0x122   : > { %v1442_v8 = vadd.f32 %v1441_v61, %v4092_v37 }
 0x124   : > { %v4196_v55 = vpop.f32.mrf.mxu0 }
 0x126   : > { %3192 = vmatmul.msk.bf16.gmra.mxu2 %vm1157_vm3, %v4193_v6  ;;  %v1604_v6 = vsel %vm3927_vm7, %v3177_v57, %v1603_v9  ;;  %v1610_v57 = vrot.slane %v3755_v16, 5 }
 0x127   : > { %3223 = vmatmul.msk.bf16.gmra.mxu0 %vm1157_vm3, %v3576_v0  ;;  %v1607_v0 = vsel %vm3927_vm7, %v1605_v49, %v1606_v48  ;;  %v1669_v63 = vunpack.c.l.b16 %v1604_v6  ;;  %v4954_v48 = vld [vmem:[#allocation12_spill] sm:$0xff]  ;;  %v4957_v6 = vld [vmem:[#allocation13_spill] sm:$0xff] }
 0x128   : > { %v4206_v50 = vpop.f32.mrf.mxu3  ;;  %v1670_v13 = vunpack.c.l.b16 %v1607_v0  ;;  %v4956_v0 = vld [vmem:[#allocation10_spill] sm:$0xff]  ;;  %v3178_v61 = vrot.slane %v4954_v48, 9  ;;  %v1612_v37 = vrot.slane %v1610_v57, 4 }
 0x129   : > { %4953 = vst [vmem:[#allocation42_spill] sm:$0xff] %v4206_v50  ;;  %v1759_v33 = vpop.f32.mrf.mxu2  ;;  %v1444_v3 = vpop.f32.mrf.mxu1  ;;  %v1351_v50 = vunpack.c.l.b16 %v4954_v48 }
 0x12a   : > { %v1839_v1 = vadd.f32 %v1759_v33, %v1440_v19  ;;  %v4222_v22 = vpack.c.b16 %v1670_v13, %v1669_v63  ;;  %v1445_v13 = vadd.f32 %v1444_v3, %v4117_v36 }
 0x12c   : > { %v4215_v34 = vpop.f32.mrf.mxu0  ;;  %3161 = vmatmul.msk.bf16.gmra.mxu1 %vm1157_vm3, %v4209_v17 }
 0x12d   : > { %3208 = vmatmul.msk.bf16.gmra.mxu3 %vm1157_vm3, %v4209_v17 }
 0x130   : > { %v1896_v40 = vpop.f32.mrf.mxu3 }
 0x131   : > { %v1976_v33 = vadd.f32 %v1896_v40, %v1839_v1  ;;  %v1761_v19 = vpop.f32.mrf.mxu2  ;;  %v1446_v42 = vpop.f32.mrf.mxu1  ;;  %v1613_v1 = vrot.slane %v4957_v6, 5 }
 0x132   : > { %v1840_v9 = vadd.f32 %v1761_v19, %v1442_v8  ;;  %v4236_v8 = vpack.c.b16 %v1352_v43, %v1351_v50 }
 0x133   : > { %v1614_v48 = vsel %vm3927_vm7, %v1612_v37, %v1613_v1  ;;  %v4959_v1 = vld [vmem:[#allocation21_spill] sm:$0xff] }
 0x134   : > { %v2051_v49 = vpop.f32.mrf.mxu0  ;;  %4958 = vst [vmem:[#allocation13_spill] sm:$0xff] %v4236_v8  ;;  %v1672_v43 = vunpack.c.l.b16 %v1614_v48 }
 0x135   : > { %v4227_v29 = vadd.f32 %v2051_v49, %v1976_v33 }
 0x136   : > { %3193 = vmatmul.msk.bf16.gmra.mxu2 %vm1157_vm3, %v4222_v22 }
 0x137   : > { %4955 = vst [vmem:[#allocation12_spill] sm:$0xff] %v4227_v29  ;;  %3224 = vmatmul.msk.bf16.gmra.mxu0 %vm1157_vm3, %v4956_v0  ;;  %v1611_v29 = vsel %vm3927_vm7, %v3178_v61, %v1610_v57 }
 0x138   : > { %v1898_v63 = vpop.f32.mrf.mxu3  ;;  %v1671_v36 = vunpack.c.l.b16 %v1611_v29 }
 0x139   : > { %v1977_v40 = vadd.f32 %v1898_v63, %v1840_v9  ;;  %v1764_v16 = vpop.f32.mrf.mxu2  ;;  %v1449_v33 = vpop.f32.mrf.mxu1 }
 0x13a   : > { %v1841_v19 = vadd.f32 %v1764_v16, %v1445_v13  ;;  %v1450_v49 = vadd.f32 %v1449_v33, %v4158_v54  ;;  %v1447_v54 = vadd.f32 %v1446_v42, %v4134_v32  ;;  %v4250_v63 = vpack.c.b16 %v1672_v43, %v1671_v36  ;;  %v4960_v33 = vld [vmem:[#allocation20_spill] sm:$0xff]  ;;  %v4962_v32 = vld [vmem:[#allocation18_spill] sm:$0xff] }
 0x13b   : > { %v1617_v13 = vrot.slane %v4959_v1, 5  ;;  %v3179_v42 = vrot.slane %v4960_v33, 9 }
 0x13c   : > { %v2053_v0 = vpop.f32.mrf.mxu0  ;;  %3162 = vmatmul.msk.bf16.gmra.mxu1 %vm1157_vm3, %v4236_v8 }
 0x13d   : > { %3209 = vmatmul.msk.bf16.gmra.mxu3 %vm1157_vm3, %v4236_v8  ;;  %v4247_v3 = vadd.f32 %v2053_v0, %v1977_v40  ;;  %v1353_v8 = vunpack.c.l.b16 %v4960_v33  ;;  %v1354_v0 = vunpack.c.l.b16 %v4959_v1  ;;  %v1619_v40 = vrot.slane %v1617_v13, 4 }
 0x13f   : > { %v4264_v43 = vpack.c.b16 %v1354_v0, %v1353_v8 }
 0x140   : > { %v1901_v50 = vpop.f32.mrf.mxu3 }
 0x141   : > { %v1978_v9 = vadd.f32 %v1901_v50, %v1841_v19  ;;  %v1766_v6 = vpop.f32.mrf.mxu2  ;;  %v1451_v57 = vpop.f32.mrf.mxu1  ;;  %v4963_v19 = vld [vmem:[#allocation22_spill] sm:$0xff]  ;;  %4964 = vst [vmem:[#allocation20_spill] sm:$0xff] %v4264_v43 }
 0x142   : > { %v1842_v61 = vadd.f32 %v1766_v6, %v1447_v54  ;;  %v1452_v37 = vadd.f32 %v1451_v57, %v4179_v18  ;;  %v1620_v18 = vrot.slane %v4963_v19, 5  ;;  %v1618_v57 = vsel %vm3927_vm7, %v3179_v42, %v1617_v13 }
 0x144   : > { %v2056_v16 = vpop.f32.mrf.mxu0  ;;  %v1621_v1 = vsel %vm3927_vm7, %v1619_v40, %v1620_v18  ;;  %v4966_v40 = vld [vmem:[#allocation3_spill] sm:$0xff] }
 0x145   : > { %v4256_v29 = vadd.f32 %v2056_v16, %v1978_v9  ;;  %v1674_v33 = vunpack.c.l.b16 %v1621_v1  ;;  %v1624_v18 = vrot.slane %v4966_v40, 5 }
 0x146   : > { %3194 = vmatmul.msk.bf16.gmra.mxu2 %vm1157_vm3, %v4250_v63 }
 0x147   : > { %4961 = vst [vmem:[#allocation21_spill] sm:$0xff] %v4256_v29  ;;  %3225 = vmatmul.msk.bf16.gmra.mxu0 %vm1157_vm3, %v4962_v32 }
 0x148   : > { %v1903_v48 = vpop.f32.mrf.mxu3 }
 0x149   : > { %v1979_v36 = vadd.f32 %v1903_v48, %v1842_v61  ;;  %v1769_v50 = vpop.f32.mrf.mxu2  ;;  %v1454_v54 = vpop.f32.mrf.mxu1  ;;  %v1673_v61 = vunpack.c.l.b16 %v1618_v57  ;;  %v4969_v57 = vld [vmem:[#allocation4_spill] sm:$0xff] }
 0x14a   : > { %v1843_v6 = vadd.f32 %v1769_v50, %v1450_v49  ;;  %v1455_v9 = vadd.f32 %v1454_v54, %v4196_v55  ;;  %v4967_v54 = vld [vmem:[#allocation2_spill] sm:$0xff] }
 0x14b   : > { %v4277_v13 = vpack.c.b16 %v1674_v33, %v1673_v61  ;;  %v1355_v29 = vunpack.c.l.b16 %v4967_v54 }
 0x14c   : > { %v2058_v16 = vpop.f32.mrf.mxu0  ;;  %3163 = vmatmul.msk.bf16.gmra.mxu1 %vm1157_vm3, %v4264_v43 }
 0x14d   : > { %3210 = vmatmul.msk.bf16.gmra.mxu3 %vm1157_vm3, %v4264_v43  ;;  %v4275_v8 = vadd.f32 %v2058_v16, %v1979_v36  ;;  %v1356_v43 = vunpack.c.l.b16 %v4966_v40 }
 0x14f   : > { %4965 = vst [vmem:[#allocation18_spill] sm:$0xff] %v4275_v8  ;;  %v4291_v61 = vpack.c.b16 %v1356_v43, %v1355_v29 }
 0x150   : > { %v1906_v49 = vpop.f32.mrf.mxu3 }
 0x151   : > { %v1980_v0 = vadd.f32 %v1906_v49, %v1843_v6  ;;  %v1771_v55 = vpop.f32.mrf.mxu2  ;;  %v1456_v19 = vpop.f32.mrf.mxu1  ;;  %v1626_v6 = vrot.slane %v1624_v18, 4 }
 0x152   : > { %v1844_v48 = vadd.f32 %v1771_v55, %v1452_v37  ;;  %v1457_v42 = vadd.f32 %v1456_v19, %v4215_v34  ;;  %v3180_v37 = vrot.slane %v4967_v54, 9  ;;  %v1627_v34 = vrot.slane %v4969_v57, 5 }
 0x154   : > { %v2061_v50 = vpop.f32.mrf.mxu0  ;;  %v1628_v19 = vsel %vm3927_vm7, %v1626_v6, %v1627_v34 }
 0x155   : > { %v4283_v36 = vadd.f32 %v2061_v50, %v1980_v0  ;;  %v1625_v0 = vsel %vm3927_vm7, %v3180_v37, %v1624_v18  ;;  %v1676_v43 = vunpack.c.l.b16 %v1628_v19  ;;  %v4971_v37 = vld [vmem:[#allocation8_spill] sm:$0xff] }
 0x156   : > { %3195 = vmatmul.msk.bf16.gmra.mxu2 %vm1157_vm3, %v4277_v13  ;;  %v1675_v29 = vunpack.c.l.b16 %v1625_v0  ;;  %v1631_v6 = vrot.slane %v4971_v37, 5  ;;  %v1358_v8 = vunpack.c.l.b16 %v4971_v37  ;;  %v4975_v0 = vld [vmem:[#allocation9_spill] sm:$0xff] }
 0x157   : > { %4968 = vst [vmem:[#allocation22_spill] sm:$0xff] %v4283_v36  ;;  %3226 = vmatmul.msk.bf16.gmra.mxu0 %vm1157_vm3, %v3914_v51  ;;  %v1634_v19 = vrot.slane %v4975_v0, 5 }
 0x158   : > { %v1908_v1 = vpop.f32.mrf.mxu3  ;;  %v4303_v18 = vpack.c.b16 %v1676_v43, %v1675_v29 }
 0x159   : > { %v1981_v16 = vadd.f32 %v1908_v1, %v1844_v48  ;;  %v1774_v33 = vpop.f32.mrf.mxu2  ;;  %v1459_v49 = vpop.f32.mrf.mxu1 }
 0x15a   : > { %v1845_v55 = vadd.f32 %v1774_v33, %v1455_v9  ;;  %v4972_v33 = vld [vmem:[#allocation7_spill] sm:$0xff]  ;;  %v1460_v29 = vadd.f32 %v1459_v49, %v4030_v25 }
 0x15b   : > { %v1357_v36 = vunpack.c.l.b16 %v4972_v33 }
 0x15c   : > { %v2063_v40 = vpop.f32.mrf.mxu0  ;;  %3164 = vmatmul.msk.bf16.gmra.mxu1 %vm1157_vm3, %v4291_v61 }
 0x15d   : > { %3211 = vmatmul.msk.bf16.gmra.mxu3 %vm1157_vm3, %v4291_v61  ;;  %v4301_v50 = vadd.f32 %v2063_v40, %v1981_v16  ;;  %v4974_v16 = vld [vmem:[#allocation6_spill] sm:$0xff] }
 0x15f   : > { %4970 = vst [vmem:[#allocation3_spill] sm:$0xff] %v4301_v50 }
 0x160   : > { %v1911_v48 = vpop.f32.mrf.mxu3 }
 0x161   : > { %v1982_v54 = vadd.f32 %v1911_v48, %v1845_v55  ;;  %v1776_v9 = vpop.f32.mrf.mxu2  ;;  %v1461_v57 = vpop.f32.mrf.mxu1  ;;  %v1633_v55 = vrot.slane %v1631_v6, 4  ;;  %v4317_v48 = vpack.c.b16 %v1358_v8, %v1357_v36 }
 0x162   : > { %v1846_v1 = vadd.f32 %v1776_v9, %v1457_v42  ;;  %v3181_v42 = vrot.slane %v4972_v33, 9 }
 0x163   : > { %4976 = vst [vmem:[#allocation4_spill] sm:$0xff] %v4317_v48 }
 0x164   : > { %v2066_v34 = vpop.f32.mrf.mxu0 }
 0x165   : > { %v4308_v51 = vadd.f32 %v2066_v34, %v1982_v54  ;;  %v1632_v34 = vsel %vm3927_vm7, %v3181_v42, %v1631_v6 }
 0x166   : > { %3196 = vmatmul.msk.bf16.gmra.mxu2 %vm1157_vm3, %v4303_v18  ;;  %v1677_v8 = vunpack.c.l.b16 %v1632_v34 }
 0x167   : > { %4973 = vst [vmem:[#allocation2_spill] sm:$0xff] %v4308_v51  ;;  %3227 = vmatmul.msk.bf16.gmra.mxu0 %vm1157_vm3, %v4974_v16  ;;  %v1635_v51 = vsel %vm3927_vm7, %v1633_v55, %v1634_v19  ;;  %v4979_v19 = vld [vmem:[#allocation16_spill] sm:$0xff] }
 0x168   : > { %v1913_v40 = vpop.f32.mrf.mxu3  ;;  %v1678_v36 = vunpack.c.l.b16 %v1635_v51  ;;  %v4980_v51 = vld [vmem:[#allocation15_spill] sm:$0xff] }
 0x169   : > { %v1983_v43 = vadd.f32 %v1913_v40, %v1846_v1  ;;  %v1779_v54 = vpop.f32.mrf.mxu2  ;;  %v1464_v9 = vpop.f32.mrf.mxu1  ;;  %v1462_v1 = vadd.f32 %v1461_v57, %v4043_v44  ;;  %v3336_v40 = vld [vmem:[%s4335_s15] sm:$0xff]   ;;  %v1360_v44 = vunpack.c.l.b16 %v4979_v19  ;;  %v3182_v34 = vrot.slane %v4980_v51, 9 }
 0x16a   : > { %v1847_v37 = vadd.f32 %v1779_v54, %v1460_v29  ;;  %v4337_v0 = vpack.c.b16 %v1678_v36, %v1677_v8  ;;  %v3337_v54 = vunpack.c.l.bf16 %v3336_v40  ;;  %v4983_v36 = vld [vmem:[#allocation17_spill] sm:$0xff] }
 0x16c   : > { %v2068_v50 = vpop.f32.mrf.mxu0  ;;  %3165 = vmatmul.msk.bf16.gmra.mxu1 %vm1157_vm3, %v4317_v48  ;;  %4978 = vst [vmem:[#allocation7_spill] sm:$0xff] %v4337_v0 }
 0x16d   : > { %3212 = vmatmul.msk.bf16.gmra.mxu3 %vm1157_vm3, %v4317_v48  ;;  %v4329_v25 = vadd.f32 %v2068_v50, %v1983_v43  ;;  %v1638_v50 = vrot.slane %v4979_v19, 5  ;;  %v1359_v43 = vunpack.c.l.b16 %v4980_v51  ;;  %v545_v48 = vmul.f32 %v3865_v35, %v3337_v54 }
 0x16f   : > { %4977 = vst [vmem:[#allocation8_spill] sm:$0xff] %v4329_v25  ;;  %v1640_v8 = vrot.slane %v1638_v50, 4  ;;  %v3338_v25 = vunpack.c.h.bf16 %v3336_v40 }
 0x170   : > { %v1916_v49 = vpop.f32.mrf.mxu3 }
 0x171   : > { %v1984_v6 = vadd.f32 %v1916_v49, %v1847_v37  ;;  %v1781_v33 = vpop.f32.mrf.mxu2  ;;  %v1466_v42 = vpop.f32.mrf.mxu1  ;;  %v4982_v37 = vld [vmem:[#allocation11_spill] sm:$0xff]  ;;  %v1641_v49 = vrot.slane %v4983_v36, 5 }
 0x172   : > { %v1848_v55 = vadd.f32 %v1781_v33, %v1462_v1  ;;  %v1465_v33 = vadd.f32 %v1464_v9, %v4057_v56  ;;  %v546_v56 = vmul.f32 %v3865_v35, %v3338_v25  ;;  %v434_v9 = vld [vmem:[%s4335_s15 + $0x8] sm:$0x1] }
 0x173   : > { %v1642_v51 = vsel %vm3927_vm7, %v1640_v8, %v1641_v49 }
 0x174   : > { %v2071_v29 = vpop.f32.mrf.mxu0  ;;  %v603_v8 = vadd.f32 %v3857_v38, %v546_v56 }
 0x175   : > { %v4343_v57 = vadd.f32 %v2071_v29, %v1984_v6  ;;  %v4352_v6 = vpack.c.b16 %v1360_v44, %v1359_v43  ;;  %v1680_v43 = vunpack.c.l.b16 %v1642_v51  ;;  %v602_v44 = vadd.f32 %v3857_v38, %v545_v48  ;;  %v4988_v48 = vld [vmem:[#allocation24_spill] sm:$0xff] }
 0x176   : > { %3197 = vmatmul.msk.bf16.gmra.mxu2 %vm1157_vm3, %v4337_v0  ;;  %v657_v51 = vmax.f32 %v603_v8, 0.0  ;;  %v3183_v56 = vrot.slane %v4988_v48, 9 }
 0x177   : > { %4981 = vst [vmem:[#allocation9_spill] sm:$0xff] %v4343_v57  ;;  %3228 = vmatmul.msk.bf16.gmra.mxu0 %vm1157_vm3, %v4982_v37  ;;  %v1639_v37 = vsel %vm3927_vm7, %v3182_v34, %v1638_v50  ;;  %v488_v50 = vunpack.c.l.bf16 %v434_v9  ;;  %v1467_v34 = vadd.f32 %v1466_v42, %v4082_v31  ;;  %v1361_v9 = vunpack.c.l.b16 %v4988_v48 }
 0x178   : > { %v1918_v1 = vpop.f32.mrf.mxu3  ;;  %4984 = vst [vmem:[#allocation16_spill] sm:$0xff] %v4352_v6  ;;  %v1679_v40 = vunpack.c.l.b16 %v1639_v37 }
 0x179   : > { %v1985_v19 = vadd.f32 %v1918_v1, %v1848_v55  ;;  %v1784_v29 = vpop.f32.mrf.mxu2  ;;  %v1469_v57 = vpop.f32.mrf.mxu1  ;;  %v547_v37 = vmul.f32 %v3865_v35, %v488_v50  ;;  %v4991_v35 = vld [vmem:[#allocation26_spill] sm:$0xff] }
 0x17a   : > { %v1849_v0 = vadd.f32 %v1784_v29, %v1465_v33  ;;  %v4370_v33 = vpack.c.b16 %v1680_v43, %v1679_v40  ;;  %v656_v29 = vmax.f32 %v602_v44, 0.0  ;;  %v1648_v43 = vrot.slane %v4991_v35, 5 }
 0x17b   : > { %v604_v44 = vadd.f32 %v3857_v38, %v547_v37 }
 0x17c   : > { %v2073_v16 = vpop.f32.mrf.mxu0  ;;  %3166 = vmatmul.msk.bf16.gmra.mxu1 %vm1157_vm3, %v4352_v6  ;;  %4986 = vst [vmem:[#allocation17_spill] sm:$0xff] %v4370_v33  ;;  %v4380_v42 = vpack.c.bf16 %v656_v29, %v656_v29 }
 0x17d   : > { %3213 = vmatmul.msk.bf16.gmra.mxu3 %vm1157_vm3, %v4352_v6  ;;  %v4365_v55 = vadd.f32 %v2073_v16, %v1985_v19  ;;  %v4987_v6 = vld [vmem:[#allocation25_spill] sm:$0xff]  ;;  %v658_v35 = vmax.f32 %v604_v44, 0.0 }
 0x17e   : > { %v1645_v16 = vrot.slane %v4987_v6, 5  ;;  %v2009_v38 = vshrl.u32 %v4380_v42, 16 }
 0x17f   : > { %4985 = vst [vmem:[#allocation15_spill] sm:$0xff] %v4365_v55  ;;  %v1362_v55 = vunpack.c.l.b16 %v4987_v6  ;;  %v1470_v6 = vadd.f32 %v1469_v57, %v4099_v20  ;;  %v2012_v20 = vshll.u32 %v4380_v42, 16 }
 0x180   : > { %v1921_v54 = vpop.f32.mrf.mxu3  ;;  %v1647_v40 = vrot.slane %v1645_v16, 4 }
 0x181   : > { %v1986_v36 = vadd.f32 %v1921_v54, %v1849_v0  ;;  %v1786_v49 = vpop.f32.mrf.mxu2  ;;  %v1471_v1 = vpop.f32.mrf.mxu1  ;;  %v4990_v0 = vld [vmem:[#allocation19_spill] sm:$0xff]  ;;  %v4388_v54 = vpack.c.bf16 %v657_v51, %v657_v51  ;;  %v4390_v8 = vpack.c.b16 %v1362_v55, %v1361_v9  ;;  %v4406_v9 = vpack.c.bf16 %v658_v35, %v658_v35 }
 0x182   : > { %v1850_v25 = vadd.f32 %v1786_v49, %v1467_v34  ;;  %v1649_v48 = vsel %vm3927_vm7, %v1647_v40, %v1648_v43  ;;  %v1472_v43 = vadd.f32 %v1471_v1, %v4123_v30  ;;  %v2014_v44 = vrot.slane %v2012_v20, 5  ;;  %v4993_v30 = vld [vmem:[#allocation29_spill] sm:$0xff] }
 0x183   : > { %4992 = vst [vmem:[#allocation24_spill] sm:$0xff] %v4390_v8  ;;  %v2018_v57 = vshll.u32 %v4388_v54, 16  ;;  %v2022_v55 = vshrl.u32 %v4388_v54, 16  ;;  %v1682_v51 = vunpack.c.l.b16 %v1649_v48  ;;  %v1874_v48 = vunpack.c.l.b16 %v4380_v42 }
 0x184   : > { %v2076_v19 = vpop.f32.mrf.mxu0  ;;  %v1875_v35 = vunpack.c.l.b16 %v4388_v54 }
 0x185   : > { %v4376_v31 = vadd.f32 %v2076_v19, %v1986_v36  ;;  %v1646_v19 = vsel %vm3927_vm7, %v3183_v56, %v1645_v16  ;;  %v2011_v56 = vrot.slane %v2009_v38, 4 }
 0x186   : > { %3198 = vmatmul.msk.bf16.gmra.mxu2 %vm1157_vm3, %v4370_v33  ;;  %v1681_v16 = vunpack.c.l.b16 %v1646_v19  ;;  %v2028_v19 = vshll.u32 %v4406_v9, 16 }
 0x187   : > { %4989 = vst [vmem:[#allocation25_spill] sm:$0xff] %v4376_v31  ;;  %3229 = vmatmul.msk.bf16.gmra.mxu0 %vm1157_vm3, %v4990_v0 }
 0x188   : > { %v1923_v50 = vpop.f32.mrf.mxu3  ;;  %v4409_v33 = vpack.c.b16 %v1682_v51, %v1681_v16  ;;  %v4421_v16 = vpack.c.b16 %v1875_v35, %v1874_v48 }
 0x189   : > { %v1987_v34 = vadd.f32 %v1923_v50, %v1850_v25  ;;  %v1789_v36 = vpop.f32.mrf.mxu2  ;;  %v1474_v49 = vpop.f32.mrf.mxu1  ;;  %v2020_v50 = vrot.slane %v2018_v57, 5  ;;  %v2030_v57 = vrot.slane %v2028_v19, 5 }
 0x18a   : > { %v1851_v29 = vadd.f32 %v1789_v36, %v1470_v6  ;;  %v2024_v6 = vrot.slane %v2022_v55, 4  ;;  %v1475_v1 = vadd.f32 %v1474_v49, %v4144_v46 }
 0x18c   : > { %v2078_v37 = vpop.f32.mrf.mxu0  ;;  %3167 = vmatmul.msk.bf16.gmra.mxu1 %vm1157_vm3, %v4390_v8 }
 0x18d   : > { %3214 = vmatmul.msk.bf16.gmra.mxu3 %vm1157_vm3, %v4390_v8  ;;  %v4404_v25 = vadd.f32 %v2078_v37, %v1987_v34  ;;  %v2015_v34 = vor.u32 %v2014_v44, %v2011_v56  ;;  %v2025_v37 = vor.u32 %v2024_v6, %v2020_v50 }
 0x18f   : > { %v2026_v20 = vrot.slane %v2025_v37, 4 }
 0x190   : > { %v1926_v40 = vpop.f32.mrf.mxu3 }
 0x191   : > { %v1988_v36 = vadd.f32 %v1926_v40, %v1851_v29  ;;  %v1791_v62 = vpop.f32.mrf.mxu2  ;;  %v1476_v31 = vpop.f32.mrf.mxu1  ;;  %v2016_v29 = vrot.slane %v2015_v34, 4  ;;  %v2031_v44 = vsel %vm3533_vm4, %v2026_v20, %v2030_v57 }
 0x192   : > { %v1852_v0 = vadd.f32 %v1791_v62, %v1472_v43  ;;  %v2034_v49 = vunpack.c.l.b16 %v2031_v44 }
 0x193   : > { %v2021_v43 = vsel %vm3533_vm4, %v2016_v29, %v2020_v50 }
 0x194   : > { %v2081_v8 = vpop.f32.mrf.mxu0 }
 0x195   : > { %v4414_v38 = vadd.f32 %v2081_v8, %v1988_v36  ;;  %v1477_v36 = vadd.f32 %v1476_v31, %v4160_v23 }
 0x196   : > { %3199 = vmatmul.msk.bf16.gmra.mxu2 %vm1157_vm3, %v4409_v33 }
 0x197   : > { %3230 = vmatmul.msk.bf16.gmra.mxu0 %vm1157_vm3, %v4993_v30 }
 0x198   : > { %v1928_v62 = vpop.f32.mrf.mxu3 }
 0x199   : > { %v1989_v55 = vadd.f32 %v1928_v62, %v1852_v0  ;;  %v1794_v51 = vpop.f32.mrf.mxu2  ;;  %v1479_v56 = vpop.f32.mrf.mxu1  ;;  %v2033_v0 = vunpack.c.l.b16 %v2021_v43 }
 0x19a   : > { %v1853_v40 = vadd.f32 %v1794_v51, %v1475_v1  ;;  %v1480_v1 = vadd.f32 %v1479_v56, %v4055_v45 }
 0x19b   : > { %v4434_v48 = vpack.c.b16 %v2034_v49, %v2033_v0 }
 0x19c   : > { %v2083_v8 = vpop.f32.mrf.mxu0  ;;  %3233 = vmatmul.msk.bf16.vlgmr.msra.gmra.mxu1 %vm1157_vm3, %v4001_v15 }
 0x19d   : > { %3215 = vmatmul.msk.bf16.gmra.mxu3 %vm1157_vm3, %v4421_v16  ;;  %v4431_v46 = vadd.f32 %v2083_v8, %v1989_v55 }
 0x1a0   : > { %v1931_v6 = vpop.f32.mrf.mxu3 }
 0x1a1   : > { %v1990_v34 = vadd.f32 %v1931_v6, %v1853_v40  ;;  %v1796_v37 = vpop.f32.mrf.mxu2  ;;  %v1481_v19 = vpop.f32.mrf.mxu1 }
 0x1a2   : > { %v1854_v50 = vadd.f32 %v1796_v37, %v1477_v36  ;;  %v1482_v51 = vadd.f32 %v1481_v19, %v4070_v10 }
 0x1a4   : > { %v2086_v35 = vpop.f32.mrf.mxu0 }
 0x1a5   : > { %v4436_v62 = vadd.f32 %v2086_v35, %v1990_v34 }
 0x1a6   : > { %3249 = vmatmul.msk.bf16.vlgmr.msra.gmra.mxu2 %vm1157_vm3, %v3982_v21 }
 0x1a7   : > { %3231 = vmatmul.msk.bf16.gmra.mxu0 %vm1157_vm3, %v4434_v48 }
 0x1a8   : > { %v1933_v15 = vpop.f32.mrf.mxu3 }
 0x1a9   : > { %v1991_v29 = vadd.f32 %v1933_v15, %v1854_v50  ;;  %v1799_v23 = vpop.f32.mrf.mxu2  ;;  %v1484_v31 = vpop.f32.mrf.mxu1 }
 0x1aa   : > { %v1855_v20 = vadd.f32 %v1799_v23, %v1480_v1 }
 0x1ac   : > { %v2088_v57 = vpop.f32.mrf.mxu0  ;;  %3234 = vmatmul.msk.bf16.gmra.mxu1 %vm1157_vm3, %v3999_v60 }
 0x1ad   : > { %3265 = vmatmul.msk.bf16.vlgmr.msra.gmra.mxu3 %vm1157_vm3, %v3852_v58  ;;  %v4447_v55 = vadd.f32 %v2088_v57, %v1991_v29  ;;  %v1485_v58 = vadd.f32 %v1484_v31, %v4090_v5 }
 0x1b0   : > { %v1936_v21 = vpop.f32.mrf.mxu3 }
 0x1b1   : > { %v1992_v40 = vadd.f32 %v1936_v21, %v1855_v20  ;;  %v1801_v8 = vpop.f32.mrf.mxu2  ;;  %v1486_v43 = vpop.f32.mrf.mxu1 }
 0x1b2   : > { %v1856_v45 = vadd.f32 %v1801_v8, %v1482_v51  ;;  %v1487_v19 = vadd.f32 %v1486_v43, %v4111_v28 }
 0x1b4   : > { %v2091_v56 = vpop.f32.mrf.mxu0 }
 0x1b5   : > { %v4450_v44 = vadd.f32 %v2091_v56, %v1992_v40 }
 0x1b6   : > { %3250 = vmatmul.msk.bf16.gmra.mxu2 %vm1157_vm3, %v4020_v27 }
 0x1b7   : > { %3282 = vmatmul.msk.bf16.vlgmr.msra.gmra.mxu0 %vm1157_vm3, %v3999_v60 }
 0x1b8   : > { %v1938_v0 = vpop.f32.mrf.mxu3 }
 0x1b9   : > { %v1993_v49 = vadd.f32 %v1938_v0, %v1856_v45  ;;  %v1804_v6 = vpop.f32.mrf.mxu2  ;;  %v1489_v36 = vpop.f32.mrf.mxu1 }
 0x1ba   : > { %v1857_v10 = vadd.f32 %v1804_v6, %v1485_v58 }
 0x1bc   : > { %v2093_v34 = vpop.f32.mrf.mxu0  ;;  %3235 = vmatmul.msk.bf16.gmra.mxu1 %vm1157_vm3, %v4032_v14 }
 0x1bd   : > { %3266 = vmatmul.msk.bf16.gmra.mxu3 %vm1157_vm3, %v3974_v53  ;;  %v4461_v37 = vadd.f32 %v2093_v34, %v1993_v49  ;;  %v1490_v53 = vadd.f32 %v1489_v36, %v4132_v26 }
 0x1c0   : > { %v1941_v27 = vpop.f32.mrf.mxu3 }
 0x1c1   : > { %v1994_v60 = vadd.f32 %v1941_v27, %v1857_v10  ;;  %v1806_v50 = vpop.f32.mrf.mxu2  ;;  %v1491_v35 = vpop.f32.mrf.mxu1 }
 0x1c2   : > { %v1858_v5 = vadd.f32 %v1806_v50, %v1487_v19  ;;  %v1492_v51 = vadd.f32 %v1491_v35, %v4156_v41 }
 0x1c4   : > { %v2096_v15 = vpop.f32.mrf.mxu0 }
 0x1c5   : > { %v4464_v1 = vadd.f32 %v2096_v15, %v1994_v60 }
 0x1c6   : > { %3251 = vmatmul.msk.bf16.gmra.mxu2 %vm1157_vm3, %v4045_v4 }
 0x1c7   : > { %3283 = vmatmul.msk.bf16.gmra.mxu0 %vm1157_vm3, %v4032_v14 }
 0x1c8   : > { %v1943_v29 = vpop.f32.mrf.mxu3 }
 0x1c9   : > { %v1995_v23 = vadd.f32 %v1943_v29, %v1858_v5  ;;  %v1809_v31 = vpop.f32.mrf.mxu2  ;;  %v1494_v20 = vpop.f32.mrf.mxu1 }
 0x1ca   : > { %v1859_v28 = vadd.f32 %v1809_v31, %v1490_v53  ;;  %v4996_v31 = vld [vmem:[#allocation14_spill] sm:$0xff] }
 0x1cc   : > { %v2098_v57 = vpop.f32.mrf.mxu0  ;;  %3236 = vmatmul.msk.bf16.gmra.mxu1 %vm1157_vm3, %v4059_v2 }
 0x1cd   : > { %3267 = vmatmul.msk.bf16.gmra.mxu3 %vm1157_vm3, %v3557_v39  ;;  %v4475_v21 = vadd.f32 %v2098_v57, %v1995_v23  ;;  %v1495_v39 = vadd.f32 %v1494_v20, %v4177_v7  ;;  %v4995_v23 = vld [vmem:[#allocation34_spill] sm:$0xff] }
 0x1d0   : > { %v1946_v4 = vpop.f32.mrf.mxu3 }
 0x1d1   : > { %v1996_v14 = vadd.f32 %v1946_v4, %v1859_v28  ;;  %v1811_v40 = vpop.f32.mrf.mxu2  ;;  %v1496_v8 = vpop.f32.mrf.mxu1  ;;  %v4997_v28 = vld [vmem:[#allocation31_spill] sm:$0xff] }
 0x1d2   : > { %v1860_v26 = vadd.f32 %v1811_v40, %v1492_v51  ;;  %v1497_v10 = vadd.f32 %v1496_v8, %v4191_v12 }
 0x1d4   : > { %v2101_v43 = vpop.f32.mrf.mxu0 }
 0x1d5   : > { %v4478_v45 = vadd.f32 %v2101_v43, %v1996_v14 }
 0x1d6   : > { %3252 = vmatmul.msk.bf16.gmra.mxu2 %vm1157_vm3, %v4076_v52 }
 0x1d7   : > { %3284 = vmatmul.msk.bf16.gmra.mxu0 %vm1157_vm3, %v4059_v2 }
 0x1d8   : > { %v1948_v56 = vpop.f32.mrf.mxu3 }
 0x1d9   : > { %v1997_v0 = vadd.f32 %v1948_v56, %v1860_v26  ;;  %v1814_v58 = vpop.f32.mrf.mxu2  ;;  %v1499_v49 = vpop.f32.mrf.mxu1  ;;  %v4998_v26 = vld [vmem:[#allocation35_spill] sm:$0xff]  ;;  %v4999_v56 = vld [vmem:[#allocation32_spill] sm:$0xff] }
 0x1da   : > { %v1861_v41 = vadd.f32 %v1814_v58, %v1495_v39 }
 0x1dc   : > { %v2103_v6 = vpop.f32.mrf.mxu0  ;;  %3237 = vmatmul.msk.bf16.gmra.mxu1 %vm1157_vm3, %v4094_v59 }
 0x1dd   : > { %3268 = vmatmul.msk.bf16.gmra.mxu3 %vm1157_vm3, %v3662_v24  ;;  %v4489_v36 = vadd.f32 %v2103_v6, %v1997_v0  ;;  %v4994_v24 = vld [vmem:[#allocation30_spill] sm:$0xff] }
 0x1de   : > { %v1500_v35 = vadd.f32 %v1499_v49, %v4994_v24 }
 0x1e0   : > { %v1951_v52 = vpop.f32.mrf.mxu3 }
 0x1e1   : > { %v1998_v2 = vadd.f32 %v1951_v52, %v1861_v41  ;;  %v1816_v34 = vpop.f32.mrf.mxu2  ;;  %v1501_v27 = vpop.f32.mrf.mxu1  ;;  %v5000_v52 = vld [vmem:[#allocation37_spill] sm:$0xff] }
 0x1e2   : > { %v1862_v7 = vadd.f32 %v1816_v34, %v1497_v10  ;;  %v1502_v57 = vadd.f32 %v1501_v27, %v4997_v28  ;;  %v5001_v10 = vld [vmem:[#allocation23_spill] sm:$0xff]  ;;  %v5002_v27 = vld [vmem:[#allocation33_spill] sm:$0xff] }
 0x1e4   : > { %v2106_v19 = vpop.f32.mrf.mxu0 }
 0x1e5   : > { %v4492_v60 = vadd.f32 %v2106_v19, %v1998_v2 }
 0x1e6   : > { %3253 = vmatmul.msk.bf16.gmra.mxu2 %vm1157_vm3, %v4109_v47 }
 0x1e7   : > { %3285 = vmatmul.msk.bf16.gmra.mxu0 %vm1157_vm3, %v4094_v59 }
 0x1e8   : > { %v1953_v50 = vpop.f32.mrf.mxu3 }
 0x1e9   : > { %v1999_v5 = vadd.f32 %v1953_v50, %v1862_v7  ;;  %v1819_v15 = vpop.f32.mrf.mxu2  ;;  %v1504_v29 = vpop.f32.mrf.mxu1 }
 0x1ea   : > { %v1863_v12 = vadd.f32 %v1819_v15, %v1500_v35  ;;  %v1505_v39 = vadd.f32 %v1504_v29, %v4999_v56  ;;  %v5003_v29 = vld [vmem:[#allocation39_spill] sm:$0xff] }
 0x1ec   : > { %v2108_v53 = vpop.f32.mrf.mxu0  ;;  %3238 = vmatmul.msk.bf16.gmra.mxu1 %vm1157_vm3, %v4995_v23 }
 0x1ed   : > { %3269 = vmatmul.msk.bf16.gmra.mxu3 %vm1157_vm3, %v4996_v31  ;;  %v4503_v20 = vadd.f32 %v2108_v53, %v1999_v5  ;;  %v5004_v53 = vld [vmem:[#allocation36_spill] sm:$0xff] }
 0x1f0   : > { %v1956_v47 = vpop.f32.mrf.mxu3 }
 0x1f1   : > { %v2000_v59 = vadd.f32 %v1956_v47, %v1863_v12  ;;  %v1821_v4 = vpop.f32.mrf.mxu2  ;;  %v1506_v51 = vpop.f32.mrf.mxu1 }
 0x1f2   : > { %v1864_v14 = vadd.f32 %v1821_v4, %v1502_v57  ;;  %v1507_v7 = vadd.f32 %v1506_v51, %v5002_v27  ;;  %v5005_v4 = vld [vmem:[#allocation41_spill] sm:$0xff] }
 0x1f3   : > { %v5006_v51 = vld [vmem:[#allocation5_spill] sm:$0xff] }
 0x1f4   : > { %v2111_v40 = vpop.f32.mrf.mxu0 }
 0x1f5   : > { %v4506_v8 = vadd.f32 %v2111_v40, %v2000_v59 }
 0x1f6   : > { %3254 = vmatmul.msk.bf16.gmra.mxu2 %vm1157_vm3, %v4998_v26  ;;  %v5007_v26 = vld [vmem:[#allocation38_spill] sm:$0xff] }
 0x1f7   : > { %3286 = vmatmul.msk.bf16.gmra.mxu0 %vm1157_vm3, %v4995_v23 }
 0x1f8   : > { %v1958_v43 = vpop.f32.mrf.mxu3 }
 0x1f9   : > { %v2001_v0 = vadd.f32 %v1958_v43, %v1864_v14  ;;  %v1824_v58 = vpop.f32.mrf.mxu2  ;;  %v1509_v49 = vpop.f32.mrf.mxu1 }
 0x1fa   : > { %v1865_v41 = vadd.f32 %v1824_v58, %v1505_v39  ;;  %v1510_v23 = vadd.f32 %v1509_v49, %v5004_v53 }
 0x1fc   : > { %v2113_v6 = vpop.f32.mrf.mxu0  ;;  %3239 = vmatmul.msk.bf16.gmra.mxu1 %vm1157_vm3, %v5000_v52 }
 0x1fd   : > { %3270 = vmatmul.msk.bf16.gmra.mxu3 %vm1157_vm3, %v5001_v10  ;;  %v4517_v2 = vadd.f32 %v2113_v6, %v2001_v0 }
 0x200   : > { %v1961_v34 = vpop.f32.mrf.mxu3 }
 0x201   : > { %v2002_v19 = vadd.f32 %v1961_v34, %v1865_v41  ;;  %v1826_v50 = vpop.f32.mrf.mxu2  ;;  %v1511_v24 = vpop.f32.mrf.mxu1 }
 0x202   : > { %v1866_v35 = vadd.f32 %v1826_v50, %v1507_v7  ;;  %v1512_v43 = vadd.f32 %v1511_v24, %v5007_v26  ;;  %v5009_v24 = vld [vmem:[#allocation10_spill] sm:$0xff]  ;;  %v5012_v26 = vld [vmem:[#allocation12_spill] sm:$0xff] }
 0x204   : > { %v2116_v5 = vpop.f32.mrf.mxu0 }
 0x205   : > { %v4520_v15 = vadd.f32 %v2116_v5, %v2002_v19  ;;  %v5010_v5 = vld [vmem:[#allocation42_spill] sm:$0xff] }
 0x206   : > { %3255 = vmatmul.msk.bf16.gmra.mxu2 %vm1157_vm3, %v5003_v29 }
 0x207   : > { %3287 = vmatmul.msk.bf16.gmra.mxu0 %vm1157_vm3, %v5000_v52  ;;  %v5008_v52 = vld [vmem:[#allocation40_spill] sm:$0xff] }
 0x208   : > { %v1963_v12 = vpop.f32.mrf.mxu3 }
 0x209   : > { %v2003_v31 = vadd.f32 %v1963_v12, %v1866_v35  ;;  %v1829_v47 = vpop.f32.mrf.mxu2  ;;  %v1514_v28 = vpop.f32.mrf.mxu1 }
 0x20a   : > { %v1867_v57 = vadd.f32 %v1829_v47, %v1510_v23  ;;  %v1515_v10 = vadd.f32 %v1514_v28, %v5008_v52 }
 0x20c   : > { %v2118_v59 = vpop.f32.mrf.mxu0  ;;  %3240 = vmatmul.msk.bf16.gmra.mxu1 %vm1157_vm3, %v5005_v4 }
 0x20d   : > { %3271 = vmatmul.msk.bf16.gmra.mxu3 %vm1157_vm3, %v5006_v51  ;;  %v4531_v14 = vadd.f32 %v2118_v59, %v2003_v31 }
 0x210   : > { %v1966_v40 = vpop.f32.mrf.mxu3 }
 0x211   : > { %v2004_v56 = vadd.f32 %v1966_v40, %v1867_v57  ;;  %v1831_v39 = vpop.f32.mrf.mxu2  ;;  %v1516_v0 = vpop.f32.mrf.mxu1  ;;  %v5011_v57 = vld [vmem:[#allocation13_spill] sm:$0xff] }
 0x212   : > { %v1868_v58 = vadd.f32 %v1831_v39, %v1512_v43  ;;  %v1517_v29 = vadd.f32 %v1516_v0, %v5010_v5 }
 0x214   : > { %v2121_v49 = vpop.f32.mrf.mxu0 }
 0x215   : > { %v4534_v41 = vadd.f32 %v2121_v49, %v2004_v56 }
 0x216   : > { %3256 = vmatmul.msk.bf16.gmra.mxu2 %vm1157_vm3, %v4209_v17 }
 0x217   : > { %3288 = vmatmul.msk.bf16.gmra.mxu0 %vm1157_vm3, %v5005_v4 }
 0x218   : > { %v1968_v6 = vpop.f32.mrf.mxu3 }
 0x219   : > { %v2005_v34 = vadd.f32 %v1968_v6, %v1868_v58  ;;  %v1834_v27 = vpop.f32.mrf.mxu2  ;;  %v2194_v7 = vpop.f32.mrf.mxu1 }
 0x21a   : > { %v1869_v19 = vadd.f32 %v1834_v27, %v1515_v10  ;;  %v2274_v43 = vadd.f32 %v2194_v7, %v5012_v26 }
 0x21c   : > { %v2123_v50 = vpop.f32.mrf.mxu0  ;;  %3241 = vmatmul.msk.bf16.gmra.mxu1 %vm1157_vm3, %v4222_v22 }
 0x21d   : > { %3272 = vmatmul.msk.bf16.gmra.mxu3 %vm1157_vm3, %v5009_v24  ;;  %v4545_v35 = vadd.f32 %v2123_v50, %v2005_v34 }
 0x220   : > { %v1971_v17 = vpop.f32.mrf.mxu3 }
 0x221   : > { %v2006_v12 = vadd.f32 %v1971_v17, %v1869_v19  ;;  %v1836_v53 = vpop.f32.mrf.mxu2  ;;  %v2196_v23 = vpop.f32.mrf.mxu1  ;;  %v5014_v17 = vld [vmem:[#allocation21_spill] sm:$0xff] }
 0x222   : > { %v1870_v31 = vadd.f32 %v1836_v53, %v1517_v29  ;;  %v2275_v52 = vadd.f32 %v2196_v23, %v4247_v3  ;;  %v5015_v23 = vld [vmem:[#allocation27_spill] sm:$0xff] }
 0x224   : > { %v2126_v47 = vpop.f32.mrf.mxu0 }
 0x225   : > { %v4548_v28 = vadd.f32 %v2126_v47, %v2006_v12 }
 0x226   : > { %3257 = vmatmul.msk.bf16.gmra.mxu2 %vm1157_vm3, %v5011_v57 }
 0x227   : > { %3289 = vmatmul.msk.bf16.gmra.mxu0 %vm1157_vm3, %v4222_v22 }
 0x228   : > { %v1973_v59 = vpop.f32.mrf.mxu3 }
 0x229   : > { %v2007_v4 = vadd.f32 %v1973_v59, %v1870_v31  ;;  %v2327_v51 = vpop.f32.mrf.mxu2  ;;  %v2199_v40 = vpop.f32.mrf.mxu1 }
 0x22a   : > { %v2407_v39 = vadd.f32 %v2327_v51, %v2274_v43  ;;  %v2276_v5 = vadd.f32 %v2199_v40, %v5014_v17 }
 0x22c   : > { %v2128_v56 = vpop.f32.mrf.mxu0  ;;  %3242 = vmatmul.msk.bf16.gmra.mxu1 %vm1157_vm3, %v4250_v63 }
 0x22d   : > { %3273 = vmatmul.msk.bf16.gmra.mxu3 %vm1157_vm3, %v4962_v32  ;;  %v4559_v0 = vadd.f32 %v2128_v56, %v2007_v4  ;;  %v5013_v32 = vld [vmem:[#allocation20_spill] sm:$0xff] }
 0x230   : > { %v2486_v58 = vpop.f32.mrf.mxu3 }
 0x231   : > { %v2566_v49 = vadd.f32 %v2486_v58, %v2407_v39  ;;  %v2329_v6 = vpop.f32.mrf.mxu2  ;;  %v2201_v22 = vpop.f32.mrf.mxu1 }
 0x232   : > { %v2408_v27 = vadd.f32 %v2329_v6, %v2275_v52 }
 0x234   : > { %v2625_v10 = vpop.f32.mrf.mxu0 }
 0x235   : > { %v2705_v34 = vadd.f32 %v2625_v10, %v2566_v49  ;;  %v5016_v49 = vld [vmem:[#allocation18_spill] sm:$0xff] }
 0x236   : > { %3258 = vmatmul.msk.bf16.gmra.mxu2 %vm1157_vm3, %v5013_v32  ;;  %v2277_v6 = vadd.f32 %v2201_v22, %v5016_v49 }
 0x237   : > { %3290 = vmatmul.msk.bf16.gmra.mxu0 %vm1157_vm3, %v4250_v63  ;;  %v2737_v7 = vpack.c.bf16 %v2705_v34, %v2705_v34  ;;  %v2878_v12 = vmul.f32 %v2705_v34, %v2705_v34  ;;  %v2809_v31 = vsel %vm1157_vm3, %v2705_v34, 0.0 }
 0x238   : > { %v2488_v19 = vpop.f32.mrf.mxu3 }
 0x239   : > { %2770 = vst.msk [vmem:[%s4566_s18] sm:$0xf] %vm2769_vm8, %v2737_v7  ;;  %v2567_v3 = vadd.f32 %v2488_v19, %v2408_v27  ;;  %v2332_v50 = vpop.f32.mrf.mxu2  ;;  %v2204_v24 = vpop.f32.mrf.mxu1  ;;  %v2910_v40 = vsel %vm1157_vm3, %v2878_v12, 0.0  ;;  %v5017_v12 = vld [vmem:[#allocation22_spill] sm:$0xff] }
 0x23a   : > { %v2409_v63 = vadd.f32 %v2332_v50, %v2276_v5 }
 0x23c   : > { %v2627_v29 = vpop.f32.mrf.mxu0  ;;  %3243 = vmatmul.msk.bf16.gmra.mxu1 %vm1157_vm3, %v4277_v13 }
 0x23d   : > { %v2706_v53 = vadd.f32 %v2627_v29, %v2567_v3  ;;  %3274 = vmatmul.msk.bf16.gmra.mxu3 %vm1157_vm3, %v5015_v23  ;;  %v5018_v23 = vld [vmem:[#allocation6_spill] sm:$0xff] }
 0x23f   : > { %v2738_v47 = vpack.c.bf16 %v2706_v53, %v2706_v53  ;;  %v2810_v57 = vsel %vm1157_vm3, %v2706_v53, 0.0  ;;  %v2879_v59 = vmul.f32 %v2706_v53, %v2706_v53 }
 0x240   : > { %v2811_v4 = vadd.f32 %v2810_v57, %v2809_v31  ;;  %v2491_v51 = vpop.f32.mrf.mxu3 }
 0x241   : > { %2771 = vst.msk [vmem:[%s4566_s18 + $0x4] sm:$0xf] %vm2769_vm8, %v2738_v47  ;;  %v2911_v26 = vsel %vm1157_vm3, %v2879_v59, 0.0  ;;  %v2568_v43 = vadd.f32 %v2491_v51, %v2409_v63  ;;  %v2334_v56 = vpop.f32.mrf.mxu2  ;;  %v2206_v39 = vpop.f32.mrf.mxu1 }
 0x242   : > { %v2912_v58 = vadd.f32 %v2911_v26, %v2910_v40  ;;  %v2410_v34 = vadd.f32 %v2334_v56, %v2277_v6  ;;  %v5019_v56 = vld [vmem:[#allocation3_spill] sm:$0xff] }
 0x244   : > { %v2630_v52 = vpop.f32.mrf.mxu0 }
 0x245   : > { %v2707_v10 = vadd.f32 %v2630_v52, %v2568_v43 }
 0x246   : > { %3259 = vmatmul.msk.bf16.gmra.mxu2 %vm1157_vm3, %v4291_v61  ;;  %v2278_v61 = vadd.f32 %v2204_v24, %v5017_v12 }
 0x247   : > { %3291 = vmatmul.msk.bf16.gmra.mxu0 %vm1157_vm3, %v4277_v13  ;;  %v2739_v27 = vpack.c.bf16 %v2707_v10, %v2707_v10  ;;  %v2812_v32 = vsel %vm1157_vm3, %v2707_v10, 0.0  ;;  %v2880_v7 = vmul.f32 %v2707_v10, %v2707_v10  ;;  %v5020_v10 = vld [vmem:[#allocation4_spill] sm:$0xff] }
 0x248   : > { %v2813_v19 = vadd.f32 %v2812_v32, %v2811_v4  ;;  %v2493_v3 = vpop.f32.mrf.mxu3 }
 0x249   : > { %2772 = vst.msk [vmem:[%s4566_s18 + $0x8] sm:$0xf] %vm2769_vm8, %v2739_v27  ;;  %v2913_v50 = vsel %vm1157_vm3, %v2880_v7, 0.0  ;;  %v2569_v22 = vadd.f32 %v2493_v3, %v2410_v34  ;;  %v2337_v17 = vpop.f32.mrf.mxu2  ;;  %v2209_v5 = vpop.f32.mrf.mxu1 }
 0x24a   : > { %v2914_v29 = vadd.f32 %v2913_v50, %v2912_v58  ;;  %v2411_v63 = vadd.f32 %v2337_v17, %v2278_v61  ;;  %v2279_v58 = vadd.f32 %v2206_v39, %v5019_v56 }
 0x24c   : > { %v2632_v53 = vpop.f32.mrf.mxu0  ;;  %3244 = vmatmul.msk.bf16.gmra.mxu1 %vm1157_vm3, %v4303_v18 }
 0x24d   : > { %v2708_v13 = vadd.f32 %v2632_v53, %v2569_v22  ;;  %3275 = vmatmul.msk.bf16.gmra.mxu3 %vm1157_vm3, %v5018_v23  ;;  %v5022_v53 = vld [vmem:[#allocation7_spill] sm:$0xff] }
 0x24f   : > { %v2740_v31 = vpack.c.bf16 %v2708_v13, %v2708_v13  ;;  %v2814_v47 = vsel %vm1157_vm3, %v2708_v13, 0.0  ;;  %v2881_v57 = vmul.f32 %v2708_v13, %v2708_v13  ;;  %v5023_v13 = vld [vmem:[#allocation11_spill] sm:$0xff] }
 0x250   : > { %v2815_v59 = vadd.f32 %v2814_v47, %v2813_v19  ;;  %v2496_v4 = vpop.f32.mrf.mxu3 }
 0x251   : > { %2773 = vst.msk [vmem:[%s4566_s18 + $0xc] sm:$0xf] %vm2769_vm8, %v2740_v31  ;;  %v2915_v51 = vsel %vm1157_vm3, %v2881_v57, 0.0  ;;  %v2570_v24 = vadd.f32 %v2496_v4, %v2411_v63  ;;  %v2339_v40 = vpop.f32.mrf.mxu2  ;;  %v2211_v26 = vpop.f32.mrf.mxu1 }
 0x252   : > { %v2916_v43 = vadd.f32 %v2915_v51, %v2914_v29  ;;  %v2412_v52 = vadd.f32 %v2339_v40, %v2279_v58  ;;  %v5021_v29 = vld [vmem:[#allocation2_spill] sm:$0xff] }
 0x253   : > { %v2280_v12 = vadd.f32 %v2209_v5, %v5021_v29 }
 0x254   : > { %v2635_v49 = vpop.f32.mrf.mxu0 }
 0x255   : > { %v2709_v6 = vadd.f32 %v2635_v49, %v2570_v24 }
 0x256   : > { %3260 = vmatmul.msk.bf16.gmra.mxu2 %vm1157_vm3, %v5020_v10 }
 0x257   : > { %3292 = vmatmul.msk.bf16.gmra.mxu0 %vm1157_vm3, %v4303_v18  ;;  %v2741_v34 = vpack.c.bf16 %v2709_v6, %v2709_v6  ;;  %v2816_v27 = vsel %vm1157_vm3, %v2709_v6, 0.0  ;;  %v2882_v32 = vmul.f32 %v2709_v6, %v2709_v6 }
 0x258   : > { %v2817_v7 = vadd.f32 %v2816_v27, %v2815_v59  ;;  %v2498_v19 = vpop.f32.mrf.mxu3 }
 0x259   : > { %2774 = vst.msk [vmem:[%s4566_s18 + $0x10] sm:$0xf] %vm2769_vm8, %v2741_v34  ;;  %v2917_v3 = vsel %vm1157_vm3, %v2882_v32, 0.0  ;;  %v2571_v39 = vadd.f32 %v2498_v19, %v2412_v52  ;;  %v2342_v50 = vpop.f32.mrf.mxu2  ;;  %v2214_v22 = vpop.f32.mrf.mxu1  ;;  %v5025_v52 = vld [vmem:[#allocation16_spill] sm:$0xff] }
 0x25a   : > { %v2918_v17 = vadd.f32 %v2917_v3, %v2916_v43  ;;  %v2413_v23 = vadd.f32 %v2342_v50, %v2280_v12  ;;  %v5024_v43 = vld [vmem:[#allocation8_spill] sm:$0xff] }
 0x25b   : > { %v2281_v56 = vadd.f32 %v2211_v26, %v5024_v43 }
 0x25c   : > { %v2637_v61 = vpop.f32.mrf.mxu0  ;;  %3245 = vmatmul.msk.bf16.gmra.mxu1 %vm1157_vm3, %v5022_v53 }
 0x25d   : > { %v2710_v18 = vadd.f32 %v2637_v61, %v2571_v39  ;;  %3276 = vmatmul.msk.bf16.gmra.mxu3 %vm1157_vm3, %v5023_v13  ;;  %v5027_v61 = vld [vmem:[#allocation17_spill] sm:$0xff] }
 0x25f   : > { %v2742_v63 = vpack.c.bf16 %v2710_v18, %v2710_v18  ;;  %v2818_v31 = vsel %vm1157_vm3, %v2710_v18, 0.0  ;;  %v2883_v47 = vmul.f32 %v2710_v18, %v2710_v18  ;;  %v5028_v18 = vld [vmem:[#allocation19_spill] sm:$0xff] }
 0x260   : > { %v2819_v57 = vadd.f32 %v2818_v31, %v2817_v7  ;;  %v2501_v59 = vpop.f32.mrf.mxu3 }
 0x261   : > { %2775 = vst.msk [vmem:[%s4566_s18 + $0x14] sm:$0xf] %vm2769_vm8, %v2742_v63  ;;  %v2919_v4 = vsel %vm1157_vm3, %v2883_v47, 0.0  ;;  %v2572_v5 = vadd.f32 %v2501_v59, %v2413_v23  ;;  %v2344_v51 = vpop.f32.mrf.mxu2  ;;  %v2216_v24 = vpop.f32.mrf.mxu1  ;;  %v435_v23 = vld [vmem:[%s4335_s15 + $0xc] sm:$0xff]  }
 0x262   : > { %v2920_v40 = vadd.f32 %v2919_v4, %v2918_v17  ;;  %v2414_v6 = vadd.f32 %v2344_v51, %v2281_v56  ;;  %v5026_v17 = vld [vmem:[#allocation9_spill] sm:$0xff]  ;;  %v489_v63 = vunpack.c.l.bf16 %v435_v23  ;;  %v490_v31 = vunpack.c.h.bf16 %v435_v23  ;;  %v3381_v56 = vld [vmem:[%s4842_s3] ss:$0 sm:$0xff] }
 0x263   : > { %v2282_v29 = vadd.f32 %v2214_v22, %v5026_v17 }
 0x264   : > { %v2640_v58 = vpop.f32.mrf.mxu0 }
 0x265   : > { %v2711_v49 = vadd.f32 %v2640_v58, %v2572_v5  ;;  %v548_v58 = vmul.f32 %v3381_v56, %v489_v63 }
 0x266   : > { %3261 = vmatmul.msk.bf16.gmra.mxu2 %vm1157_vm3, %v5025_v52  ;;  %v5029_v52 = vld [vmem:[#allocation15_spill] sm:$0xff] }
 0x267   : > { %3293 = vmatmul.msk.bf16.gmra.mxu0 %vm1157_vm3, %v5022_v53  ;;  %v2743_v10 = vpack.c.bf16 %v2711_v49, %v2711_v49  ;;  %v2820_v34 = vsel %vm1157_vm3, %v2711_v49, 0.0  ;;  %v2884_v27 = vmul.f32 %v2711_v49, %v2711_v49 }
 0x268   : > { %v2821_v32 = vadd.f32 %v2820_v34, %v2819_v57  ;;  %v2503_v7 = vpop.f32.mrf.mxu3  ;;  %v437_v34 = vld [vmem:[%s4335_s15 + $0x14] sm:$0x1] }
 0x269   : > { %2776 = vst.msk [vmem:[%s4566_s18 + $0x18] sm:$0xf] %vm2769_vm8, %v2743_v10  ;;  %v2921_v26 = vsel %vm1157_vm3, %v2884_v27, 0.0  ;;  %v2573_v19 = vadd.f32 %v2503_v7, %v2414_v6  ;;  %v2347_v3 = vpop.f32.mrf.mxu2  ;;  %v2219_v39 = vpop.f32.mrf.mxu1  ;;  %v549_v6 = vmul.f32 %v3381_v56, %v490_v31  ;;  %v2283_v10 = vadd.f32 %v2216_v24, %v5029_v52 }
 0x26a   : > { %v2922_v50 = vadd.f32 %v2921_v26, %v2920_v40  ;;  %v2415_v13 = vadd.f32 %v2347_v3, %v2282_v29  ;;  %v3382_v26 = vld [vmem:[%s4843_s4] ss:$0 sm:$0xff]  ;;  %v5030_v3 = vld [vmem:[#allocation24_spill] sm:$0xff]  ;;  %v491_v29 = vunpack.c.l.bf16 %v437_v34 }
 0x26b   : > { %v606_v17 = vadd.f32 %v3382_v26, %v549_v6 }
 0x26c   : > { %v2642_v12 = vpop.f32.mrf.mxu0  ;;  %3246 = vmatmul.msk.bf16.gmra.mxu1 %vm1157_vm3, %v5027_v61 }
 0x26d   : > { %v2712_v53 = vadd.f32 %v2642_v12, %v2573_v19  ;;  %3277 = vmatmul.msk.bf16.gmra.mxu3 %vm1157_vm3, %v5028_v18  ;;  %v605_v19 = vadd.f32 %v3382_v26, %v548_v58 }
 0x26f   : > { %v2744_v47 = vpack.c.bf16 %v2712_v53, %v2712_v53  ;;  %v2822_v57 = vsel %vm1157_vm3, %v2712_v53, 0.0  ;;  %v2885_v59 = vmul.f32 %v2712_v53, %v2712_v53 }
 0x270   : > { %v2823_v4 = vadd.f32 %v2822_v57, %v2821_v32  ;;  %v2506_v5 = vpop.f32.mrf.mxu3 }
 0x271   : > { %2777 = vst.msk [vmem:[%s4566_s18 + $0x1c] sm:$0xf] %vm2769_vm8, %v2744_v47  ;;  %v2923_v22 = vsel %vm1157_vm3, %v2885_v59, 0.0  ;;  %v2574_v51 = vadd.f32 %v2506_v5, %v2415_v13  ;;  %v2349_v40 = vpop.f32.mrf.mxu2  ;;  %v2221_v43 = vpop.f32.mrf.mxu1  ;;  %v659_v47 = vmax.f32 %v605_v19, 0.0  ;;  %v2166_v59 = vrot.slane %v4388_v54, 5 }
 0x272   : > { %v2924_v49 = vadd.f32 %v2923_v22, %v2922_v50  ;;  %v2416_v7 = vadd.f32 %v2349_v40, %v2283_v10  ;;  %v660_v5 = vmax.f32 %v606_v17, 0.0  ;;  %v5031_v22 = vld [vmem:[#allocation25_spill] sm:$0xff] }
 0x273   : > { %v4665_v52 = vpack.c.bf16 %v659_v47, %v659_v47 }
 0x274   : > { %v2645_v27 = vpop.f32.mrf.mxu0  ;;  %v4667_v54 = vpack.c.bf16 %v660_v5, %v660_v5 }
 0x275   : > { %v2713_v32 = vadd.f32 %v2645_v27, %v2574_v51  ;;  %v2284_v51 = vadd.f32 %v2219_v39, %v5031_v22  ;;  %v2169_v27 = vrot.slane %v4406_v9, 5  ;;  %v3281_v11 = vrot.slane %v4665_v52, 9 }
 0x276   : > { %3262 = vmatmul.msk.bf16.gmra.mxu2 %vm1157_vm3, %v5030_v3  ;;  %v2449_v9 = vshll.u32 %v4667_v54, 16 }
 0x277   : > { %3294 = vmatmul.msk.bf16.gmra.mxu0 %vm1157_vm3, %v5027_v61  ;;  %v2745_v50 = vpack.c.bf16 %v2713_v32, %v2713_v32  ;;  %v2824_v24 = vsel %vm1157_vm3, %v2713_v32, 0.0  ;;  %v2886_v12 = vmul.f32 %v2713_v32, %v2713_v32  ;;  %v550_v61 = vmul.f32 %v3381_v56, %v491_v29 }
 0x278   : > { %v2825_v53 = vadd.f32 %v2824_v24, %v2823_v4  ;;  %v2508_v18 = vpop.f32.mrf.mxu3  ;;  %v3232_v4 = vrot.slane %v4380_v42, 9 }
 0x279   : > { %2778 = vst.msk [vmem:[%s4566_s18 + $0x20] sm:$0xf] %vm2769_vm8, %v2745_v50  ;;  %v2925_v13 = vsel %vm1157_vm3, %v2886_v12, 0.0  ;;  %v2575_v23 = vadd.f32 %v2508_v18, %v2416_v7  ;;  %v2352_v63 = vpop.f32.mrf.mxu2  ;;  %v4656_v31 = vpop.f32.mrf.mxu1  ;;  %v607_v56 = vadd.f32 %v3382_v26, %v550_v61  ;;  %v2440_v26 = vshrl.u32 %v4665_v52, 16 }
 0x27a   : > { %v2926_v57 = vadd.f32 %v2925_v13, %v2924_v49  ;;  %v2417_v6 = vadd.f32 %v2352_v63, %v2284_v51  ;;  %v2168_v49 = vrot.slane %v2166_v59, 4  ;;  %v2167_v19 = vsel %vm3927_vm7, %v3232_v4, %v2166_v59 }
 0x27b   : > { %v2443_v50 = vshll.u32 %v4665_v52, 16  ;;  %v661_v12 = vmax.f32 %v607_v56, 0.0  ;;  %v2285_v18 = vadd.f32 %v2221_v43, %v4404_v25  ;;  %v2172_v63 = vunpack.c.l.b16 %v2167_v19 }
 0x27c   : > { %v2647_v40 = vpop.f32.mrf.mxu0  ;;  %3247 = vmatmul.msk.bf16.gmra.mxu1 %vm1157_vm3, %v4409_v33  ;;  %v2170_v13 = vsel %vm3927_vm7, %v2168_v49, %v2169_v27  ;;  %v2442_v5 = vrot.slane %v2440_v26, 4  ;;  %v2451_v51 = vrot.slane %v2449_v9, 5  ;;  %v2309_v26 = vunpack.c.l.b16 %v4665_v52 }
 0x27d   : > { %v2714_v58 = vadd.f32 %v2647_v40, %v2575_v23  ;;  %3278 = vmatmul.msk.bf16.gmra.mxu3 %vm1157_vm3, %v4993_v30  ;;  %v2445_v61 = vrot.slane %v2443_v50, 5  ;;  %v4685_v22 = vpack.c.bf16 %v661_v12, %v661_v12  ;;  %v2310_v50 = vunpack.c.l.b16 %v4667_v54 }
 0x27f   : > { %v2746_v10 = vpack.c.bf16 %v2714_v58, %v2714_v58  ;;  %v2826_v39 = vsel %vm1157_vm3, %v2714_v58, 0.0  ;;  %v2887_v34 = vmul.f32 %v2714_v58, %v2714_v58  ;;  %v2459_v19 = vshll.u32 %v4685_v22, 16 }
 0x280   : > { %v2827_v32 = vadd.f32 %v2826_v39, %v2825_v53  ;;  %v2511_v7 = vpop.f32.mrf.mxu3  ;;  %v2453_v53 = vshrl.u32 %v4667_v54, 16  ;;  %v2446_v39 = vor.u32 %v2445_v61, %v2442_v5 }
 0x281   : > { %2779 = vst.msk [vmem:[%s4566_s18 + $0x24] sm:$0xf] %vm2769_vm8, %v2746_v10  ;;  %v2927_v30 = vsel %vm1157_vm3, %v2887_v34, 0.0  ;;  %v2576_v3 = vadd.f32 %v2511_v7, %v2417_v6  ;;  %v2354_v17 = vpop.f32.mrf.mxu2  ;;  %v2226_v29 = vpop.f32.mrf.mxu1  ;;  %v2461_v12 = vrot.slane %v2459_v19, 5 }
 0x282   : > { %v2928_v24 = vadd.f32 %v2927_v30, %v2926_v57  ;;  %v2418_v59 = vadd.f32 %v2354_v17, %v2285_v18  ;;  %v2173_v57 = vunpack.c.l.b16 %v2170_v13  ;;  %v2455_v40 = vrot.slane %v2453_v53, 4 }
 0x283   : > { %v2447_v17 = vrot.slane %v2446_v39, 4  ;;  %v2604_v39 = vrot.slane %v4685_v22, 5 }
 0x284   : > { %v2650_v23 = vpop.f32.mrf.mxu0  ;;  %v2174_v27 = vpack.c.b16 %v2173_v57, %v2172_v63  ;;  %v2456_v7 = vor.u32 %v2455_v40, %v2451_v51  ;;  %v2287_v57 = vadd.f32 %v2226_v29, %v4431_v46 }
 0x285   : > { %v2715_v47 = vadd.f32 %v2650_v23, %v2576_v3  ;;  %v2452_v5 = vsel %vm3533_vm4, %v2447_v17, %v2451_v51 }
 0x286   : > { %3263 = vmatmul.msk.bf16.gmra.mxu2 %vm1157_vm3, %v4421_v16 }
 0x287   : > { %3295 = vmatmul.msk.bf16.gmra.mxu0 %vm1157_vm3, %v4409_v33  ;;  %v2747_v25 = vpack.c.bf16 %v2715_v47, %v2715_v47  ;;  %v2828_v43 = vsel %vm1157_vm3, %v2715_v47, 0.0  ;;  %v2888_v4 = vmul.f32 %v2715_v47, %v2715_v47  ;;  %v2286_v33 = vadd.f32 %v4656_v31, %v4414_v38 }
 0x288   : > { %v2829_v58 = vadd.f32 %v2828_v43, %v2827_v32  ;;  %v2513_v6 = vpop.f32.mrf.mxu3 }
 0x289   : > { %2780 = vst.msk [vmem:[%s4566_s18 + $0x28] sm:$0xf] %vm2769_vm8, %v2747_v25  ;;  %v2929_v49 = vsel %vm1157_vm3, %v2888_v4, 0.0  ;;  %v2577_v56 = vadd.f32 %v2513_v6, %v2418_v59  ;;  %v2357_v16 = vpop.f32.mrf.mxu2  ;;  %v2229_v10 = vpop.f32.mrf.mxu1  ;;  %v2311_v59 = vpack.c.b16 %v2310_v50, %v2309_v26  ;;  %v2601_v25 = vrot.slane %v4667_v54, 5 }
 0x28a   : > { %v2930_v34 = vadd.f32 %v2929_v49, %v2928_v24  ;;  %v2419_v3 = vadd.f32 %v2357_v16, %v2286_v33  ;;  %v2457_v24 = vrot.slane %v2456_v7, 4 }
 0x28b   : > { %v2603_v29 = vrot.slane %v2601_v25, 4  ;;  %v2602_v52 = vsel %vm3927_vm7, %v3281_v11, %v2601_v25 }
 0x28c   : > { %v2652_v30 = vpop.f32.mrf.mxu0  ;;  %3248 = vmatmul.msk.bf16.gmra.mxu1 %vm1157_vm3, %v2174_v27  ;;  %v2462_v61 = vsel %vm3533_vm4, %v2457_v24, %v2461_v12  ;;  %v2607_v26 = vunpack.c.l.b16 %v2602_v52 }
 0x28d   : > { %v2716_v32 = vadd.f32 %v2652_v30, %v2577_v56  ;;  %3279 = vmatmul.msk.bf16.gmra.mxu3 %vm1157_vm3, %v4434_v48  ;;  %v2465_v6 = vunpack.c.l.b16 %v2462_v61  ;;  %v2288_v30 = vadd.f32 %v2229_v10, %v4436_v62 }
 0x28f   : > { %v2748_v9 = vpack.c.bf16 %v2716_v32, %v2716_v32  ;;  %v2830_v53 = vsel %vm1157_vm3, %v2716_v32, 0.0  ;;  %v2889_v38 = vmul.f32 %v2716_v32, %v2716_v32 }
 0x290   : > { %v2831_v31 = vadd.f32 %v2830_v53, %v2829_v58  ;;  %v2516_v18 = vpop.f32.mrf.mxu3  ;;  %v2464_v58 = vunpack.c.l.b16 %v2452_v5 }
 0x291   : > { %2781 = vst.msk [vmem:[%s4566_s18 + $0x2c] sm:$0xf] %vm2769_vm8, %v2748_v9  ;;  %v2931_v13 = vsel %vm1157_vm3, %v2889_v38, 0.0  ;;  %v2578_v23 = vadd.f32 %v2516_v18, %v2419_v3  ;;  %v2359_v48 = vpop.f32.mrf.mxu2  ;;  %v2231_v63 = vpop.f32.mrf.mxu1  ;;  %v2605_v3 = vsel %vm3927_vm7, %v2603_v29, %v2604_v39 }
 0x292   : > { %v2932_v47 = vadd.f32 %v2931_v13, %v2930_v34  ;;  %v2420_v4 = vadd.f32 %v2359_v48, %v2287_v57  ;;  %v2466_v7 = vpack.c.b16 %v2465_v6, %v2464_v58  ;;  %v2608_v9 = vunpack.c.l.b16 %v2605_v3 }
 0x294   : > { %v2655_v40 = vpop.f32.mrf.mxu0  ;;  %v2609_v13 = vpack.c.b16 %v2608_v9, %v2607_v26 }
 0x295   : > { %v2717_v43 = vadd.f32 %v2655_v40, %v2578_v23  ;;  %v2289_v23 = vadd.f32 %v2231_v63, %v4447_v55 }
 0x296   : > { %3264 = vmatmul.msk.bf16.gmra.mxu2 %vm1157_vm3, %v2311_v59 }
 0x297   : > { %3296 = vmatmul.msk.bf16.gmra.mxu0 %vm1157_vm3, %v2174_v27  ;;  %v2749_v49 = vpack.c.bf16 %v2717_v43, %v2717_v43  ;;  %v2832_v51 = vsel %vm1157_vm3, %v2717_v43, 0.0  ;;  %v2890_v56 = vmul.f32 %v2717_v43, %v2717_v43 }
 0x298   : > { %v2833_v16 = vadd.f32 %v2832_v51, %v2831_v31  ;;  %v2518_v46 = vpop.f32.mrf.mxu3 }
 0x299   : > { %2782 = vst.msk [vmem:[%s4566_s18 + $0x30] sm:$0xf] %vm2769_vm8, %v2749_v49  ;;  %v2933_v54 = vsel %vm1157_vm3, %v2890_v56, 0.0  ;;  %v2579_v34 = vadd.f32 %v2518_v46, %v2420_v4  ;;  %v2362_v19 = vpop.f32.mrf.mxu2  ;;  %v2234_v33 = vpop.f32.mrf.mxu1 }
 0x29a   : > { %v2934_v27 = vadd.f32 %v2933_v54, %v2932_v47  ;;  %v2421_v17 = vadd.f32 %v2362_v19, %v2288_v30  ;;  %v2290_v63 = vadd.f32 %v2234_v33, %v4450_v44 }
 0x29c   : > { %v2657_v32 = vpop.f32.mrf.mxu0 }
 0x29d   : > { %v2718_v22 = vadd.f32 %v2657_v32, %v2579_v34  ;;  %3280 = vmatmul.msk.bf16.gmra.mxu3 %vm1157_vm3, %v2466_v7 }
 0x29f   : > { %v2750_v50 = vpack.c.bf16 %v2718_v22, %v2718_v22  ;;  %v2834_v24 = vsel %vm1157_vm3, %v2718_v22, 0.0  ;;  %v2891_v12 = vmul.f32 %v2718_v22, %v2718_v22 }
 0x2a0   : > { %v2835_v53 = vadd.f32 %v2834_v24, %v2833_v16  ;;  %v2521_v38 = vpop.f32.mrf.mxu3 }
 0x2a1   : > { %2783 = vst.msk [vmem:[%s4566_s18 + $0x34] sm:$0xf] %vm2769_vm8, %v2750_v50  ;;  %v2935_v62 = vsel %vm1157_vm3, %v2891_v12, 0.0  ;;  %v2580_v10 = vadd.f32 %v2521_v38, %v2421_v17  ;;  %v2364_v42 = vpop.f32.mrf.mxu2  ;;  %v2236_v31 = vpop.f32.mrf.mxu1 }
 0x2a2   : > { %v2936_v18 = vadd.f32 %v2935_v62, %v2934_v27  ;;  %v2422_v59 = vadd.f32 %v2364_v42, %v2289_v23  ;;  %v2291_v44 = vadd.f32 %v2236_v31, %v4461_v37 }
 0x2a4   : > { %v2660_v48 = vpop.f32.mrf.mxu0 }
 0x2a5   : > { %v2719_v47 = vadd.f32 %v2660_v48, %v2580_v10 }
 0x2a7   : > { %3297 = vmatmul.msk.bf16.gmra.mxu0 %vm1157_vm3, %v2609_v13  ;;  %v2751_v5 = vpack.c.bf16 %v2719_v47, %v2719_v47  ;;  %v2836_v61 = vsel %vm1157_vm3, %v2719_v47, 0.0  ;;  %v2892_v57 = vmul.f32 %v2719_v47, %v2719_v47 }
 0x2a8   : > { %v2837_v40 = vadd.f32 %v2836_v61, %v2835_v53  ;;  %v2523_v25 = vpop.f32.mrf.mxu3 }
 0x2a9   : > { %2784 = vst.msk [vmem:[%s4566_s18 + $0x38] sm:$0xf] %vm2769_vm8, %v2751_v5  ;;  %v2937_v43 = vsel %vm1157_vm3, %v2892_v57, 0.0  ;;  %v2581_v4 = vadd.f32 %v2523_v25, %v2422_v59  ;;  %v2367_v58 = vpop.f32.mrf.mxu2  ;;  %v2239_v6 = vpop.f32.mrf.mxu1 }
 0x2aa   : > { %v2938_v55 = vadd.f32 %v2937_v43, %v2936_v18  ;;  %v2423_v56 = vadd.f32 %v2367_v58, %v2290_v63  ;;  %v2292_v37 = vadd.f32 %v2239_v6, %v4464_v1 }
 0x2ac   : > { %v2662_v49 = vpop.f32.mrf.mxu0 }
 0x2ad   : > { %v2720_v51 = vadd.f32 %v2662_v49, %v2581_v4 }
 0x2af   : > { %v2752_v11 = vpack.c.bf16 %v2720_v51, %v2720_v51  ;;  %v2838_v16 = vsel %vm1157_vm3, %v2720_v51, 0.0  ;;  %v2893_v46 = vmul.f32 %v2720_v51, %v2720_v51 }
 0x2b0   : > { %v2839_v29 = vadd.f32 %v2838_v16, %v2837_v40  ;;  %v2526_v39 = vpop.f32.mrf.mxu3 }
 0x2b1   : > { %2785 = vst.msk [vmem:[%s4566_s18 + $0x3c] sm:$0xf] %vm2769_vm8, %v2752_v11  ;;  %v2939_v54 = vsel %vm1157_vm3, %v2893_v46, 0.0  ;;  %v2582_v34 = vadd.f32 %v2526_v39, %v2423_v56  ;;  %v2369_v7 = vpop.f32.mrf.mxu2  ;;  %v2241_v19 = vpop.f32.mrf.mxu1 }
 0x2b2   : > { %v2940_v27 = vadd.f32 %v2939_v54, %v2938_v55  ;;  %v2424_v52 = vadd.f32 %v2369_v7, %v2291_v44  ;;  %v2293_v1 = vadd.f32 %v2241_v19, %v4475_v21 }
 0x2b4   : > { %v2665_v33 = vpop.f32.mrf.mxu0 }
 0x2b5   : > { %v2721_v30 = vadd.f32 %v2665_v33, %v2582_v34 }
 0x2b7   : > { %v2753_v32 = vpack.c.bf16 %v2721_v30, %v2721_v30  ;;  %v2840_v3 = vsel %vm1157_vm3, %v2721_v30, 0.0  ;;  %v2894_v22 = vmul.f32 %v2721_v30, %v2721_v30 }
 0x2b8   : > { %v2841_v17 = vadd.f32 %v2840_v3, %v2839_v29  ;;  %v2528_v26 = vpop.f32.mrf.mxu3 }
 0x2b9   : > { %2786 = vst.msk [vmem:[%s4566_s18 + $0x40] sm:$0xf] %vm2769_vm8, %v2753_v32  ;;  %v2941_v50 = vsel %vm1157_vm3, %v2894_v22, 0.0  ;;  %v2583_v24 = vadd.f32 %v2528_v26, %v2424_v52  ;;  %v2372_v12 = vpop.f32.mrf.mxu2  ;;  %v2244_v9 = vpop.f32.mrf.mxu1 }
 0x2ba   : > { %v2942_v53 = vadd.f32 %v2941_v50, %v2940_v27  ;;  %v2425_v10 = vadd.f32 %v2372_v12, %v2292_v37  ;;  %v2294_v21 = vadd.f32 %v2244_v9, %v4478_v45 }
 0x2bc   : > { %v2667_v38 = vpop.f32.mrf.mxu0 }
 0x2bd   : > { %v2722_v62 = vadd.f32 %v2667_v38, %v2583_v24 }
 0x2bf   : > { %v2754_v42 = vpack.c.bf16 %v2722_v62, %v2722_v62  ;;  %v2842_v31 = vsel %vm1157_vm3, %v2722_v62, 0.0  ;;  %v2895_v18 = vmul.f32 %v2722_v62, %v2722_v62 }
 0x2c0   : > { %v2843_v13 = vadd.f32 %v2842_v31, %v2841_v17  ;;  %v2531_v23 = vpop.f32.mrf.mxu3 }
 0x2c1   : > { %2787 = vst.msk [vmem:[%s4566_s18 + $0x44] sm:$0xf] %vm2769_vm8, %v2754_v42  ;;  %v2943_v48 = vsel %vm1157_vm3, %v2895_v18, 0.0  ;;  %v2584_v47 = vadd.f32 %v2531_v23, %v2425_v10  ;;  %v2374_v59 = vpop.f32.mrf.mxu2  ;;  %v2246_v5 = vpop.f32.mrf.mxu1 }
 0x2c2   : > { %v2944_v61 = vadd.f32 %v2943_v48, %v2942_v53  ;;  %v2426_v25 = vadd.f32 %v2374_v59, %v2293_v1  ;;  %v2295_v45 = vadd.f32 %v2246_v5, %v4489_v36 }
 0x2c4   : > { %v2670_v57 = vpop.f32.mrf.mxu0 }
 0x2c5   : > { %v2723_v40 = vadd.f32 %v2670_v57, %v2584_v47 }
 0x2c7   : > { %v2755_v43 = vpack.c.bf16 %v2723_v40, %v2723_v40  ;;  %v2844_v4 = vsel %vm1157_vm3, %v2723_v40, 0.0  ;;  %v2896_v58 = vmul.f32 %v2723_v40, %v2723_v40 }
 0x2c8   : > { %v2845_v6 = vadd.f32 %v2844_v4, %v2843_v13  ;;  %v2533_v55 = vpop.f32.mrf.mxu3 }
 0x2c9   : > { %2788 = vst.msk [vmem:[%s4566_s18 + $0x48] sm:$0xf] %vm2769_vm8, %v2755_v43  ;;  %v2945_v63 = vsel %vm1157_vm3, %v2896_v58, 0.0  ;;  %v2585_v49 = vadd.f32 %v2533_v55, %v2426_v25  ;;  %v2377_v51 = vpop.f32.mrf.mxu2  ;;  %v2249_v56 = vpop.f32.mrf.mxu1 }
 0x2ca   : > { %v2946_v11 = vadd.f32 %v2945_v63, %v2944_v61  ;;  %v2427_v29 = vadd.f32 %v2377_v51, %v2294_v21  ;;  %v2296_v36 = vadd.f32 %v2249_v56, %v4492_v60 }
 0x2cc   : > { %v2672_v16 = vpop.f32.mrf.mxu0 }
 0x2cd   : > { %v2724_v46 = vadd.f32 %v2672_v16, %v2585_v49 }
 0x2cf   : > { %v2756_v39 = vpack.c.bf16 %v2724_v46, %v2724_v46  ;;  %v2846_v54 = vsel %vm1157_vm3, %v2724_v46, 0.0  ;;  %v2897_v34 = vmul.f32 %v2724_v46, %v2724_v46 }
 0x2d0   : > { %v2847_v7 = vadd.f32 %v2846_v54, %v2845_v6  ;;  %v2536_v19 = vpop.f32.mrf.mxu3 }
 0x2d1   : > { %2789 = vst.msk [vmem:[%s4566_s18 + $0x4c] sm:$0xf] %vm2769_vm8, %v2756_v39  ;;  %v2947_v27 = vsel %vm1157_vm3, %v2897_v34, 0.0  ;;  %v2586_v44 = vadd.f32 %v2536_v19, %v2427_v29  ;;  %v2379_v33 = vpop.f32.mrf.mxu2  ;;  %v2251_v30 = vpop.f32.mrf.mxu1 }
 0x2d2   : > { %v2948_v52 = vadd.f32 %v2947_v27, %v2946_v11  ;;  %v2428_v22 = vadd.f32 %v2379_v33, %v2295_v45  ;;  %v2297_v57 = vadd.f32 %v2251_v30, %v4503_v20 }
 0x2d4   : > { %v2675_v32 = vpop.f32.mrf.mxu0 }
 0x2d5   : > { %v2725_v3 = vadd.f32 %v2675_v32, %v2586_v44 }
 0x2d7   : > { %v2757_v17 = vpack.c.bf16 %v2725_v3, %v2725_v3  ;;  %v2848_v26 = vsel %vm1157_vm3, %v2725_v3, 0.0  ;;  %v2898_v50 = vmul.f32 %v2725_v3, %v2725_v3 }
 0x2d8   : > { %v2849_v24 = vadd.f32 %v2848_v26, %v2847_v7  ;;  %v2538_v12 = vpop.f32.mrf.mxu3 }
 0x2d9   : > { %2790 = vst.msk [vmem:[%s4566_s18 + $0x50] sm:$0xf] %vm2769_vm8, %v2757_v17  ;;  %v2949_v9 = vsel %vm1157_vm3, %v2898_v50, 0.0  ;;  %v2587_v53 = vadd.f32 %v2538_v12, %v2428_v22  ;;  %v2382_v37 = vpop.f32.mrf.mxu2  ;;  %v2254_v62 = vpop.f32.mrf.mxu1 }
 0x2da   : > { %v2950_v38 = vadd.f32 %v2949_v9, %v2948_v52  ;;  %v2429_v31 = vadd.f32 %v2382_v37, %v2296_v36  ;;  %v2298_v20 = vadd.f32 %v2254_v62, %v4506_v8 }
 0x2dc   : > { %v2677_v10 = vpop.f32.mrf.mxu0 }
 0x2dd   : > { %v2726_v42 = vadd.f32 %v2677_v10, %v2587_v53 }
 0x2df   : > { %v2758_v18 = vpack.c.bf16 %v2726_v42, %v2726_v42  ;;  %v2850_v13 = vsel %vm1157_vm3, %v2726_v42, 0.0  ;;  %v2899_v23 = vmul.f32 %v2726_v42, %v2726_v42 }
 0x2e0   : > { %v2851_v48 = vadd.f32 %v2850_v13, %v2849_v24  ;;  %v2541_v47 = vpop.f32.mrf.mxu3 }
 0x2e1   : > { %2791 = vst.msk [vmem:[%s4566_s18 + $0x54] sm:$0xf] %vm2769_vm8, %v2758_v18  ;;  %v2951_v59 = vsel %vm1157_vm3, %v2899_v23, 0.0  ;;  %v2588_v5 = vadd.f32 %v2541_v47, %v2429_v31  ;;  %v2384_v61 = vpop.f32.mrf.mxu2  ;;  %v2256_v40 = vpop.f32.mrf.mxu1 }
 0x2e2   : > { %v2952_v1 = vadd.f32 %v2951_v59, %v2950_v38  ;;  %v2430_v43 = vadd.f32 %v2384_v61, %v2297_v57  ;;  %v2299_v8 = vadd.f32 %v2256_v40, %v4517_v2 }
 0x2e4   : > { %v2680_v60 = vpop.f32.mrf.mxu0 }
 0x2e5   : > { %v2727_v25 = vadd.f32 %v2680_v60, %v2588_v5 }
 0x2e7   : > { %v2759_v4 = vpack.c.bf16 %v2727_v25, %v2727_v25  ;;  %v2852_v58 = vsel %vm1157_vm3, %v2727_v25, 0.0  ;;  %v2900_v6 = vmul.f32 %v2727_v25, %v2727_v25 }
 0x2e8   : > { %v2853_v55 = vadd.f32 %v2852_v58, %v2851_v48  ;;  %v2543_v63 = vpop.f32.mrf.mxu3 }
 0x2e9   : > { %2792 = vst.msk [vmem:[%s4566_s18 + $0x58] sm:$0xf] %vm2769_vm8, %v2759_v4  ;;  %v2953_v49 = vsel %vm1157_vm3, %v2900_v6, 0.0  ;;  %v2589_v51 = vadd.f32 %v2543_v63, %v2430_v43  ;;  %v2387_v56 = vpop.f32.mrf.mxu2  ;;  %v2259_v29 = vpop.f32.mrf.mxu1 }
 0x2ea   : > { %v2954_v11 = vadd.f32 %v2953_v49, %v2952_v1  ;;  %v2431_v46 = vadd.f32 %v2387_v56, %v2298_v20  ;;  %v2300_v2 = vadd.f32 %v2259_v29, %v4520_v15 }
 0x2ec   : > { %v2682_v21 = vpop.f32.mrf.mxu0 }
 0x2ed   : > { %v2728_v16 = vadd.f32 %v2682_v21, %v2589_v51 }
 0x2ef   : > { %v2760_v39 = vpack.c.bf16 %v2728_v16, %v2728_v16  ;;  %v2854_v54 = vsel %vm1157_vm3, %v2728_v16, 0.0  ;;  %v2901_v34 = vmul.f32 %v2728_v16, %v2728_v16 }
 0x2f0   : > { %v2855_v7 = vadd.f32 %v2854_v54, %v2853_v55  ;;  %v2546_v19 = vpop.f32.mrf.mxu3 }
 0x2f1   : > { %2793 = vst.msk [vmem:[%s4566_s18 + $0x5c] sm:$0xf] %vm2769_vm8, %v2760_v39  ;;  %v2955_v27 = vsel %vm1157_vm3, %v2901_v34, 0.0  ;;  %v2590_v44 = vadd.f32 %v2546_v19, %v2431_v46  ;;  %v2389_v33 = vpop.f32.mrf.mxu2  ;;  %v2261_v24 = vpop.f32.mrf.mxu1 }
 0x2f2   : > { %v2956_v30 = vadd.f32 %v2955_v27, %v2954_v11  ;;  %v2432_v32 = vadd.f32 %v2389_v33, %v2299_v8  ;;  %v2301_v15 = vadd.f32 %v2261_v24, %v4531_v14 }
 0x2f4   : > { %v2685_v52 = vpop.f32.mrf.mxu0 }
 0x2f5   : > { %v2729_v45 = vadd.f32 %v2685_v52, %v2590_v44 }
 0x2f7   : > { %v2761_v3 = vpack.c.bf16 %v2729_v45, %v2729_v45  ;;  %v2856_v22 = vsel %vm1157_vm3, %v2729_v45, 0.0  ;;  %v2902_v17 = vmul.f32 %v2729_v45, %v2729_v45 }
 0x2f8   : > { %v2857_v26 = vadd.f32 %v2856_v22, %v2855_v7  ;;  %v2548_v50 = vpop.f32.mrf.mxu3  ;;  %v3407_v7 = vmov 0.0  }
 0x2f9   : > { %2794 = vst.msk [vmem:[%s4566_s18 + $0x60] sm:$0xf] %vm2769_vm8, %v2761_v3  ;;  %v2957_v12 = vsel %vm1157_vm3, %v2902_v17, 0.0  ;;  %v2591_v9 = vadd.f32 %v2548_v50, %v2432_v32  ;;  %v2392_v53 = vpop.f32.mrf.mxu2  ;;  %v2264_v5 = vpop.f32.mrf.mxu1 }
 0x2fa   : > { %v2958_v37 = vadd.f32 %v2957_v12, %v2956_v30  ;;  %v2433_v36 = vadd.f32 %v2392_v53, %v2300_v2  ;;  %v2302_v14 = vadd.f32 %v2264_v5, %v4534_v41  ;;  %2807 = vst.msk [vmem:[%s4801_s7] sm:$0x3] %vm2806_vm9, %v3407_v7 }
 0x2fc   : > { %v2687_v38 = vpop.f32.mrf.mxu0 }
 0x2fd   : > { %v2730_v62 = vadd.f32 %v2687_v38, %v2591_v9 }
 0x2ff   : > { %v2762_v10 = vpack.c.bf16 %v2730_v62, %v2730_v62  ;;  %v2858_v42 = vsel %vm1157_vm3, %v2730_v62, 0.0  ;;  %v2903_v31 = vmul.f32 %v2730_v62, %v2730_v62 }
 0x300   : > { %v2859_v18 = vadd.f32 %v2858_v42, %v2857_v26  ;;  %v2551_v13 = vpop.f32.mrf.mxu3 }
 0x301   : > { %2795 = vst.msk [vmem:[%s4566_s18 + $0x64] sm:$0xf] %vm2769_vm8, %v2762_v10  ;;  %v2959_v23 = vsel %vm1157_vm3, %v2903_v31, 0.0  ;;  %v2592_v48 = vadd.f32 %v2551_v13, %v2433_v36  ;;  %v2394_v47 = vpop.f32.mrf.mxu2  ;;  %v2266_v51 = vpop.f32.mrf.mxu1 }
 0x302   : > { %v2960_v59 = vadd.f32 %v2959_v23, %v2958_v37  ;;  %v2434_v57 = vadd.f32 %v2394_v47, %v2301_v15  ;;  %v2303_v19 = vadd.f32 %v2266_v51, %v4545_v35 }
 0x304   : > { %v2690_v61 = vpop.f32.mrf.mxu0 }
 0x305   : > { %v2731_v1 = vadd.f32 %v2690_v61, %v2592_v48 }
 0x307   : > { %v2763_v60 = vpack.c.bf16 %v2731_v1, %v2731_v1  ;;  %v2860_v40 = vsel %vm1157_vm3, %v2731_v1, 0.0  ;;  %v2904_v25 = vmul.f32 %v2731_v1, %v2731_v1 }
 0x308   : > { %v2861_v43 = vadd.f32 %v2860_v40, %v2859_v18  ;;  %v2553_v4 = vpop.f32.mrf.mxu3 }
 0x309   : > { %2796 = vst.msk [vmem:[%s4566_s18 + $0x68] sm:$0xf] %vm2769_vm8, %v2763_v60  ;;  %v2961_v58 = vsel %vm1157_vm3, %v2904_v25, 0.0  ;;  %v2593_v6 = vadd.f32 %v2553_v4, %v2434_v57  ;;  %v2397_v55 = vpop.f32.mrf.mxu2  ;;  %v2269_v30 = vpop.f32.mrf.mxu1 }
 0x30a   : > { %v2962_v63 = vadd.f32 %v2961_v58, %v2960_v59  ;;  %v2435_v11 = vadd.f32 %v2397_v55, %v2302_v14  ;;  %v2304_v35 = vadd.f32 %v2269_v30, %v4548_v28 }
 0x30c   : > { %v2692_v49 = vpop.f32.mrf.mxu0 }
 0x30d   : > { %v2732_v56 = vadd.f32 %v2692_v49, %v2593_v6 }
 0x30f   : > { %v2764_v20 = vpack.c.bf16 %v2732_v56, %v2732_v56  ;;  %v2862_v21 = vsel %vm1157_vm3, %v2732_v56, 0.0  ;;  %v2905_v16 = vmul.f32 %v2732_v56, %v2732_v56 }
 0x310   : > { %v2863_v46 = vadd.f32 %v2862_v21, %v2861_v43  ;;  %v2556_v29 = vpop.f32.mrf.mxu3 }
 0x311   : > { %2797 = vst.msk [vmem:[%s4566_s18 + $0x6c] sm:$0xf] %vm2769_vm8, %v2764_v20  ;;  %v2963_v41 = vsel %vm1157_vm3, %v2905_v16, 0.0  ;;  %v2594_v39 = vadd.f32 %v2556_v29, %v2435_v11  ;;  %v2399_v54 = vpop.f32.mrf.mxu2  ;;  %v2271_v36 = vpop.f32.mrf.mxu1  ;;  %v2808_v29 = vld [vmem:[%s4801_s7] sm:$0x3] }
 0x312   : > { %v2964_v34 = vadd.f32 %v2963_v41, %v2962_v63  ;;  %v2436_v33 = vadd.f32 %v2399_v54, %v2303_v19  ;;  %v2305_v28 = vadd.f32 %v2271_v36, %v4559_v0 }
 0x314   : > { %v2695_v27 = vpop.f32.mrf.mxu0 }
 0x315   : > { %v2733_v44 = vadd.f32 %v2695_v27, %v2594_v39 }
 0x317   : > { %v2765_v8 = vpack.c.bf16 %v2733_v44, %v2733_v44  ;;  %v2864_v52 = vsel %vm1157_vm3, %v2733_v44, 0.0  ;;  %v2906_v45 = vmul.f32 %v2733_v44, %v2733_v44 }
 0x318   : > { %v2865_v32 = vadd.f32 %v2864_v52, %v2863_v46  ;;  %v2558_v3 = vpop.f32.mrf.mxu3 }
 0x319   : > { %2798 = vst.msk [vmem:[%s4566_s18 + $0x70] sm:$0xf] %vm2769_vm8, %v2765_v8  ;;  %v2965_v22 = vsel %vm1157_vm3, %v2906_v45, 0.0  ;;  %v2595_v17 = vadd.f32 %v2558_v3, %v2436_v33  ;;  %v2402_v26 = vpop.f32.mrf.mxu2 }
 0x31a   : > { %v2966_v50 = vadd.f32 %v2965_v22, %v2964_v34  ;;  %v2437_v9 = vadd.f32 %v2402_v26, %v2304_v35 }
 0x31c   : > { %v2697_v24 = vpop.f32.mrf.mxu0 }
 0x31d   : > { %v2734_v12 = vadd.f32 %v2697_v24, %v2595_v17 }
 0x31f   : > { %v2766_v53 = vpack.c.bf16 %v2734_v12, %v2734_v12  ;;  %v2866_v37 = vsel %vm1157_vm3, %v2734_v12, 0.0  ;;  %v2907_v2 = vmul.f32 %v2734_v12, %v2734_v12 }
 0x320   : > { %v2867_v38 = vadd.f32 %v2866_v37, %v2865_v32  ;;  %v2561_v62 = vpop.f32.mrf.mxu3 }
 0x321   : > { %2799 = vst.msk [vmem:[%s4566_s18 + $0x74] sm:$0xf] %vm2769_vm8, %v2766_v53  ;;  %v2967_v10 = vsel %vm1157_vm3, %v2907_v2, 0.0  ;;  %v2596_v42 = vadd.f32 %v2561_v62, %v2437_v9  ;;  %v2404_v18 = vpop.f32.mrf.mxu2 }
 0x322   : > { %v2968_v31 = vadd.f32 %v2967_v10, %v2966_v50  ;;  %v2438_v48 = vadd.f32 %v2404_v18, %v2305_v28 }
 0x324   : > { %v2700_v13 = vpop.f32.mrf.mxu0 }
 0x325   : > { %v2735_v23 = vadd.f32 %v2700_v13, %v2596_v42 }
 0x327   : > { %v2767_v47 = vpack.c.bf16 %v2735_v23, %v2735_v23  ;;  %v2868_v59 = vsel %vm1157_vm3, %v2735_v23, 0.0  ;;  %v2908_v5 = vmul.f32 %v2735_v23, %v2735_v23 }
 0x328   : > { %v2869_v15 = vadd.f32 %v2868_v59, %v2867_v38  ;;  %v2563_v61 = vpop.f32.mrf.mxu3 }
 0x329   : > { %2800 = vst.msk [vmem:[%s4566_s18 + $0x78] sm:$0xf] %vm2769_vm8, %v2767_v47  ;;  %v2969_v1 = vsel %vm1157_vm3, %v2908_v5, 0.0  ;;  %v2597_v57 = vadd.f32 %v2563_v61, %v2438_v48 }
 0x32a   : > { %v2970_v60 = vadd.f32 %v2969_v1, %v2968_v31 }
 0x32c   : > { %v2702_v40 = vpop.f32.mrf.mxu0 }
 0x32d   : > { %v2736_v25 = vadd.f32 %v2702_v40, %v2597_v57 }
 0x32f   : > { %v2768_v43 = vpack.c.bf16 %v2736_v25, %v2736_v25  ;;  %v2870_v0 = vsel %vm1157_vm3, %v2736_v25, 0.0  ;;  %v2909_v4 = vmul.f32 %v2736_v25, %v2736_v25 }
 0x330   : > { %v2871_v58 = vadd.f32 %v2870_v0, %v2869_v15 }
 0x331   : > { %2801 = vst.msk [vmem:[%s4566_s18 + $0x7c] sm:$0xf] %vm2769_vm8, %v2768_v43  ;;  %v2971_v6 = vsel %vm1157_vm3, %v2909_v4, 0.0 }
 0x332   : > { %v2872_v55 = vrot.slane %v2871_v58, 4  ;;  %v2972_v63 = vadd.f32 %v2971_v6, %v2970_v60 }
 0x334   : > { %v2873_v14 = vadd.f32 %v2872_v55, %v2871_v58  ;;  %v2973_v49 = vrot.slane %v2972_v63, 4 }
 0x336   : > { %v2874_v51 = vrot.slane %v2873_v14, 2  ;;  %v2974_v56 = vadd.f32 %v2973_v49, %v2972_v63 }
 0x338   : > { %v2875_v11 = vadd.f32 %v2874_v51, %v2873_v14  ;;  %v2975_v20 = vrot.slane %v2974_v56, 2 }
 0x33a   : > { %v2876_v21 = vrot.slane %v2875_v11, 1  ;;  %v2976_v16 = vadd.f32 %v2975_v20, %v2974_v56 }
 0x33c   : > { %v2977_v46 = vrot.slane %v2976_v16, 1  ;;  %v2877_v41 = vadd.f32 %v2876_v21, %v2875_v11 }
 0x33e   : > { %v2978_v39 = vadd.f32 %v2977_v46, %v2976_v16 }
 0x340   : > { %v2980_v54 = vsel %vm2979_vm10, %v2877_v41, %v2978_v39 }
 0x341   : > { %v2981_v34 = vadd.f32 %v2980_v54, %v2808_v29 }
 0x343   : > { %2983 = vst.msk [vmem:[%s4801_s7] sm:$0x3] %vm2806_vm9, %v2981_v34 }
 0x344 PF: > { %s17_s23 = sadd.s32 1, %s3405_s23   ;;  %s5033_s21 = smov %s3401_s22 }
 0x345   : > { %p14_p5 = scmp.ge.s32.totalorder %s17_s23, 4   ;;  %s5034_s22 = smov %s5036_s24 }
 0x347   :  { %16 = sbr.rel (!%p14_p5) target bundleno = 2 (0x2), region = 89 }

</bundles_post_ra>
